<compile_context>
chip_gen: v7x
topology: tpu7x:2x2x1
jax: 0.10.0
libtpu: 0.0.40
codegen_flags: <defaults>
</compile_context>

<pallas_src>
import jax
import jax.numpy as jnp
from jax.experimental import pallas as pl
from jax.experimental.pallas import tpu as pltpu


# Set to jnp.bfloat16 on v6e/v7x for the fast MXU path (accumulation stays
# f32 via preferred_element_type). Kept f32 by default to match the PyTorch
# module's numerics; the workload is launch/HBM-bound, not MXU-bound.
MXU_DTYPE = jnp.float32


# -----------------------------------------------------------------------------
# Fused forward kernel (one batch element per grid step)
# -----------------------------------------------------------------------------
def _fused_kernel(xcol_ref, w1_ref, b1_ref, w2_ref, b2_ref, w3_ref, b3_ref,
                  fc1w_ref, fc1b_ref, fc2w_ref, fc2b_ref,
                  out_ref, s1p_ref, s2p_ref):
    f32 = jnp.float32

    def gemm(a, w_ref, b_ref, relu=True):
        acc = jnp.dot(a.astype(MXU_DTYPE), w_ref[...].astype(MXU_DTYPE),
                      preferred_element_type=f32)
        acc = acc + b_ref[...]
        return jnp.maximum(acc, 0.0) if relu else acc

    # --- Stage 1: conv1(1->32, 3x3, pad 1) + ReLU + MaxPool2d(2) -------------
    # xcol rows are pre-grouped by 2x2 pooling corner, so the pool is just a
    # max over four [64, 32] GEMM outputs (rows = io*8 + jo, lanes = channels).
    pooled1 = gemm(xcol_ref[0, 0], w1_ref, b1_ref)
    for corner in range(1, 4):
        pooled1 = jnp.maximum(pooled1, gemm(xcol_ref[0, corner], w1_ref, b1_ref))

    # Stage-2 input: zero-padded NHWC scratch [10, 10, 32].
    s1p_ref[...] = jnp.zeros(s1p_ref.shape, f32)
    for io in range(8):
        s1p_ref[io + 1, 1:9, :] = pooled1[8 * io:8 * io + 8, :]

    # --- Stage 2: conv2(32->64) + ReLU + MaxPool2d(2) ------------------------
    # In-VMEM im2col: rows = i*8 + j, columns ordered (kh, kw, cin).
    patches2 = jnp.concatenate(
        [jnp.concatenate([s1p_ref[i + kh, kw:kw + 8, :]
                          for kh in range(3) for kw in range(3)], axis=-1)
         for i in range(8)],
        axis=0)                                                  # [64, 288]
    y2 = gemm(patches2, w2_ref, b2_ref)                          # [64, 64]

    s2p_ref[...] = jnp.zeros(s2p_ref.shape, f32)
    for io in range(4):
        # vertical 2x1 max: rows i = 2*io and 2*io + 1
        v = jnp.maximum(y2[16 * io:16 * io + 8, :],
                        y2[16 * io + 8:16 * io + 16, :])         # [8, 64]
        # horizontal 1x2 max: adjacent j pairs
        row = jnp.concatenate(
            [jnp.maximum(v[2 * jo:2 * jo + 1, :], v[2 * jo + 1:2 * jo + 2, :])
             for jo in range(4)], axis=0)                        # [4, 64]
        s2p_ref[io + 1, 1:5, :] = row

    # --- Stage 3: conv3(64->128) + ReLU with fused global average pool ------
    gap = jnp.zeros((1, 128), f32)
    for i in range(4):
        patches_row = jnp.concatenate(
            [s2p_ref[i + kh, kw:kw + 4, :]
             for kh in range(3) for kw in range(3)], axis=-1)    # [4, 576]
        y3 = gemm(patches_row, w3_ref, b3_ref)                   # [4, 128]
        gap = gap + jnp.sum(y3, axis=0, keepdims=True)
    gap = gap * (1.0 / 16.0)                                     # [1, 128]

    # --- Classifier: Linear(128,64)+ReLU, Dropout(eval)=id, Linear(64,10) ---
    hidden = gemm(gap, fc1w_ref, fc1b_ref)                       # [1, 64]
    logits = gemm(hidden, fc2w_ref, fc2b_ref, relu=False)        # [1, 10]
    out_ref[0] = logits


# -----------------------------------------------------------------------------
# Host-side prep (tiny, once per forward): conv1 im2col grouped by pool corner
# -----------------------------------------------------------------------------
def _conv1_corner_patches(x):
    """x: [N, 1, 16, 16] -> [N, 4, 64, 9].

    dim1 = pooling-window corner (di, dj); rows = io*8 + jo; cols = kh*3 + kw.
    """
    n = x.shape[0]
    xp = jnp.pad(x[:, 0], ((0, 0), (1, 1), (1, 1)))              # [N, 18, 18]
    corners = []
    for di in (0, 1):
        for dj in (0, 1):
            cols = [xp[:, di + kh:di + kh + 15:2, dj + kw:dj + kw + 15:2]
                    for kh in range(3) for kw in range(3)]       # 9 x [N, 8, 8]
            corners.append(jnp.stack(cols, axis=-1).reshape(n, 64, 9))
    return jnp.stack(corners, axis=1)                            # [N, 4, 64, 9]


# -----------------------------------------------------------------------------
# Forward pass
# -----------------------------------------------------------------------------
def digit_classifier_forward(kparams, x):
    n, cin, h, w = x.shape
    assert (cin, h, w) == (1, 16, 16), "kernel is specialized to 1x16x16 inputs"
    xcol = _conv1_corner_patches(x)                              # [N, 4, 64, 9]

    def full(arr):
        # Whole (small) weight resident in VMEM; constant block index so it is
        # DMA'd once and stays resident across grid steps.
        return pl.BlockSpec(arr.shape, lambda b: (0,) * arr.ndim)

    weights = (kparams["w1"], kparams["b1"], kparams["w2"], kparams["b2"],
               kparams["w3"], kparams["b3"], kparams["fc1w"], kparams["fc1b"],
               kparams["fc2w"], kparams["fc2b"])

    out = pl.pallas_call(
        _fused_kernel,
        out_shape=jax.ShapeDtypeStruct((n, 1, 10), jnp.float32),
        grid_spec=pltpu.PrefetchScalarGridSpec(
            num_scalar_prefetch=0,
            grid=(n,),
            in_specs=[pl.BlockSpec((1, 4, 64, 9), lambda b: (b, 0, 0, 0))]
                     + [full(a) for a in weights],
            out_specs=pl.BlockSpec((1, 1, 10), lambda b: (b, 0, 0)),
            scratch_shapes=[
                pltpu.VMEM((10, 10, 32), jnp.float32),  # padded pooled conv1
                pltpu.VMEM((6, 6, 64), jnp.float32),    # padded pooled conv2
            ],
        ),
        compiler_params=pltpu.CompilerParams(
            dimension_semantics=("parallel",)),
    )(xcol, *weights)
    return out[:, 0, :]


# -----------------------------------------------------------------------------
# Parameters (PyTorch layouts) + one-time conversion to kernel layouts
# -----------------------------------------------------------------------------
def init_params(key):
    keys = jax.random.split(key, 10)

    def w(k, shape, fan_in):
        return jax.random.normal(k, shape, jnp.float32) * (1.0 / fan_in) ** 0.5

    return {
        "conv1_w": w(keys[0], (32, 1, 3, 3), 1 * 9),
        "conv1_b": w(keys[1], (32,), 1 * 9),
        "conv2_w": w(keys[2], (64, 32, 3, 3), 32 * 9),
        "conv2_b": w(keys[3], (64,), 32 * 9),
        "conv3_w": w(keys[4], (128, 64, 3, 3), 64 * 9),
        "conv3_b": w(keys[5], (128,), 64 * 9),
        "fc1_w": w(keys[6], (64, 128), 128),   # PyTorch Linear: [out, in]
        "fc1_b": w(keys[7], (64,), 128),
        "fc2_w": w(keys[8], (10, 64), 64),
        "fc2_b": w(keys[9], (10,), 64),
    }


def prepare_kernel_params(p):
    """Convert PyTorch layouts to kernel layouts once, outside the forward:
    conv [Cout, Cin, 3, 3] -> [(kh, kw, cin), Cout]; linear [out, in] -> [in, out]."""
    def conv_w(wt):
        return wt.transpose(2, 3, 1, 0).reshape(-1, wt.shape[0])

    return {
        "w1": conv_w(p["conv1_w"]), "b1": p["conv1_b"].reshape(1, -1),
        "w2": conv_w(p["conv2_w"]), "b2": p["conv2_b"].reshape(1, -1),
        "w3": conv_w(p["conv3_w"]), "b3": p["conv3_b"].reshape(1, -1),
        "fc1w": p["fc1_w"].T, "fc1b": p["fc1_b"].reshape(1, -1),
        "fc2w": p["fc2_w"].T, "fc2b": p["fc2_b"].reshape(1, -1),
    }


# -----------------------------------------------------------------------------
# Pure-JAX reference (mirrors DigitClassifier.forward in eval mode)
# -----------------------------------------------------------------------------
def _reference_forward(params, x):
    dn = ("NCHW", "OIHW", "NCHW")
    hp = jax.lax.Precision.HIGHEST

    def conv(z, wt, b):
        y = jax.lax.conv_general_dilated(z, wt, (1, 1), ((1, 1), (1, 1)),
                                         dimension_numbers=dn, precision=hp)
        return jax.nn.relu(y + b[None, :, None, None])

    def pool(z):
        return jax.lax.reduce_window(z, -jnp.inf, jax.lax.max,
                                     (1, 1, 2, 2), (1, 1, 2, 2), "VALID")

    z = pool(conv(x, params["conv1_w"], params["conv1_b"]))
    z = pool(conv(z, params["conv2_w"], params["conv2_b"]))
    z = conv(z, params["conv3_w"], params["conv3_b"])
    z = jnp.mean(z, axis=(2, 3))                                  # [N, 128]
    z = jax.nn.relu(jnp.dot(z, params["fc1_w"].T, precision=hp) + params["fc1_b"])
    # Dropout(0.2) is identity at inference.
    return jnp.dot(z, params["fc2_w"].T, precision=hp) + params["fc2_b"]


if __name__ == "__main__":
    key = jax.random.PRNGKey(0)
    pkey, xkey = jax.random.split(key)
    params = init_params(pkey)
    kparams = prepare_kernel_params(params)
    x = jax.random.normal(xkey, (2, 1, 16, 16), jnp.float32)

    fwd = jax.jit(digit_classifier_forward)
    out = jax.block_until_ready(fwd(kparams, x))
    assert out.shape == (2, 10), out.shape

    ref = jax.block_until_ready(jax.jit(_reference_forward)(params, x))
    max_err = float(jnp.max(jnp.abs(out - ref)))
    assert bool(jnp.allclose(out, ref, rtol=2e-2, atol=2e-2)), max_err

    print("KERNEL_OK")
</pallas_src>

<mosaic_0001>
module attributes {stable_mosaic.version = 11 : i64} {
  func.func @_fused_kernel(%arg0: i32, %arg1: memref<1x4x64x9xf32, #tpu.memory_space<vmem>>, %arg2: memref<9x32xf32, #tpu.memory_space<vmem>>, %arg3: memref<1x32xf32, #tpu.memory_space<vmem>>, %arg4: memref<288x64xf32, #tpu.memory_space<vmem>>, %arg5: memref<1x64xf32, #tpu.memory_space<vmem>>, %arg6: memref<576x128xf32, #tpu.memory_space<vmem>>, %arg7: memref<1x128xf32, #tpu.memory_space<vmem>>, %arg8: memref<128x64xf32, #tpu.memory_space<vmem>>, %arg9: memref<1x64xf32, #tpu.memory_space<vmem>>, %arg10: memref<64x10xf32, #tpu.memory_space<vmem>>, %arg11: memref<1x10xf32, #tpu.memory_space<vmem>>, %arg12: memref<1x1x10xf32, #tpu.memory_space<vmem>>, %arg13: memref<10x10x32xf32, #tpu.memory_space<vmem>>, %arg14: memref<6x6x64xf32, #tpu.memory_space<vmem>>) attributes {dimension_semantics = [#tpu.dimension_semantics<parallel>], iteration_bounds = array<i64: 2>, scalar_prefetch = 0 : i64, scratch_operands = 2 : i64, tpu.core_type = #tpu.core_type<tc>, window_params = [{transform_indices = @transform_0, window_bounds = array<i64: 1, 4, 64, 9>}, {pipeline_mode = #tpu.pipeline_mode<synchronous>, transform_indices = @transform_1, window_bounds = array<i64: 9, 32>}, {pipeline_mode = #tpu.pipeline_mode<synchronous>, transform_indices = @transform_2, window_bounds = array<i64: 1, 32>}, {pipeline_mode = #tpu.pipeline_mode<synchronous>, transform_indices = @transform_3, window_bounds = array<i64: 288, 64>}, {pipeline_mode = #tpu.pipeline_mode<synchronous>, transform_indices = @transform_4, window_bounds = array<i64: 1, 64>}, {pipeline_mode = #tpu.pipeline_mode<synchronous>, transform_indices = @transform_5, window_bounds = array<i64: 576, 128>}, {pipeline_mode = #tpu.pipeline_mode<synchronous>, transform_indices = @transform_6, window_bounds = array<i64: 1, 128>}, {pipeline_mode = #tpu.pipeline_mode<synchronous>, transform_indices = @transform_7, window_bounds = array<i64: 128, 64>}, {pipeline_mode = #tpu.pipeline_mode<synchronous>, transform_indices = @transform_8, window_bounds = array<i64: 1, 64>}, {pipeline_mode = #tpu.pipeline_mode<synchronous>, transform_indices = @transform_9, window_bounds = array<i64: 64, 10>}, {pipeline_mode = #tpu.pipeline_mode<synchronous>, transform_indices = @transform_10, window_bounds = array<i64: 1, 10>}, {transform_indices = @transform_11, window_bounds = array<i64: 1, 1, 10>}]} {
    %c0 = arith.constant 0 : index
    %c0_0 = arith.constant 0 : index
    %c0_1 = arith.constant 0 : index
    %c0_2 = arith.constant 0 : index
    %0 = vector.load %arg1[%c0, %c0_0, %c0_1, %c0_2] : memref<1x4x64x9xf32, #tpu.memory_space<vmem>>, vector<1x1x64x9xf32>
    %1 = vector.shape_cast %0 : vector<1x1x64x9xf32> to vector<64x9xf32>
    %c0_3 = arith.constant 0 : index
    %c0_4 = arith.constant 0 : index
    %2 = vector.load %arg2[%c0_3, %c0_4] : memref<9x32xf32, #tpu.memory_space<vmem>>, vector<9x32xf32>
    %cst = arith.constant dense<0.000000e+00> : vector<64x32xf32>
    %3 = tpu.matmul %1, %2, %cst {dimension_numbers = #tpu.dot_dimension_numbers<[1], [0], [0], [1], [0, 0, 1, 1], [], []>} : vector<64x9xf32>, vector<9x32xf32>, vector<64x32xf32> -> vector<64x32xf32>
    %c0_5 = arith.constant 0 : index
    %c0_6 = arith.constant 0 : index
    %4 = vector.load %arg3[%c0_5, %c0_6] : memref<1x32xf32, #tpu.memory_space<vmem>>, vector<1x32xf32>
    %5 = vector.broadcast %4 : vector<1x32xf32> to vector<64x32xf32>
    %6 = arith.addf %3, %5 : vector<64x32xf32>
    %cst_7 = arith.constant 0.000000e+00 : f32
    %7 = vector.broadcast %cst_7 : f32 to vector<64x32xf32>
    %8 = arith.maximumf %6, %7 : vector<64x32xf32>
    %c0_8 = arith.constant 0 : index
    %c1 = arith.constant 1 : index
    %c0_9 = arith.constant 0 : index
    %c0_10 = arith.constant 0 : index
    %9 = vector.load %arg1[%c0_8, %c1, %c0_9, %c0_10] : memref<1x4x64x9xf32, #tpu.memory_space<vmem>>, vector<1x1x64x9xf32>
    %10 = vector.shape_cast %9 : vector<1x1x64x9xf32> to vector<64x9xf32>
    %c0_11 = arith.constant 0 : index
    %c0_12 = arith.constant 0 : index
    %11 = vector.load %arg2[%c0_11, %c0_12] : memref<9x32xf32, #tpu.memory_space<vmem>>, vector<9x32xf32>
    %cst_13 = arith.constant dense<0.000000e+00> : vector<64x32xf32>
    %12 = tpu.matmul %10, %11, %cst_13 {dimension_numbers = #tpu.dot_dimension_numbers<[1], [0], [0], [1], [0, 0, 1, 1], [], []>} : vector<64x9xf32>, vector<9x32xf32>, vector<64x32xf32> -> vector<64x32xf32>
    %c0_14 = arith.constant 0 : index
    %c0_15 = arith.constant 0 : index
    %13 = vector.load %arg3[%c0_14, %c0_15] : memref<1x32xf32, #tpu.memory_space<vmem>>, vector<1x32xf32>
    %14 = vector.broadcast %13 : vector<1x32xf32> to vector<64x32xf32>
    %15 = arith.addf %12, %14 : vector<64x32xf32>
    %cst_16 = arith.constant 0.000000e+00 : f32
    %16 = vector.broadcast %cst_16 : f32 to vector<64x32xf32>
    %17 = arith.maximumf %15, %16 : vector<64x32xf32>
    %18 = arith.maximumf %8, %17 : vector<64x32xf32>
    %c0_17 = arith.constant 0 : index
    %c2 = arith.constant 2 : index
    %c0_18 = arith.constant 0 : index
    %c0_19 = arith.constant 0 : index
    %19 = vector.load %arg1[%c0_17, %c2, %c0_18, %c0_19] : memref<1x4x64x9xf32, #tpu.memory_space<vmem>>, vector<1x1x64x9xf32>
    %20 = vector.shape_cast %19 : vector<1x1x64x9xf32> to vector<64x9xf32>
    %c0_20 = arith.constant 0 : index
    %c0_21 = arith.constant 0 : index
    %21 = vector.load %arg2[%c0_20, %c0_21] : memref<9x32xf32, #tpu.memory_space<vmem>>, vector<9x32xf32>
    %cst_22 = arith.constant dense<0.000000e+00> : vector<64x32xf32>
    %22 = tpu.matmul %20, %21, %cst_22 {dimension_numbers = #tpu.dot_dimension_numbers<[1], [0], [0], [1], [0, 0, 1, 1], [], []>} : vector<64x9xf32>, vector<9x32xf32>, vector<64x32xf32> -> vector<64x32xf32>
    %c0_23 = arith.constant 0 : index
    %c0_24 = arith.constant 0 : index
    %23 = vector.load %arg3[%c0_23, %c0_24] : memref<1x32xf32, #tpu.memory_space<vmem>>, vector<1x32xf32>
    %24 = vector.broadcast %23 : vector<1x32xf32> to vector<64x32xf32>
    %25 = arith.addf %22, %24 : vector<64x32xf32>
    %cst_25 = arith.constant 0.000000e+00 : f32
    %26 = vector.broadcast %cst_25 : f32 to vector<64x32xf32>
    %27 = arith.maximumf %25, %26 : vector<64x32xf32>
    %28 = arith.maximumf %18, %27 : vector<64x32xf32>
    %c0_26 = arith.constant 0 : index
    %c3 = arith.constant 3 : index
    %c0_27 = arith.constant 0 : index
    %c0_28 = arith.constant 0 : index
    %29 = vector.load %arg1[%c0_26, %c3, %c0_27, %c0_28] : memref<1x4x64x9xf32, #tpu.memory_space<vmem>>, vector<1x1x64x9xf32>
    %30 = vector.shape_cast %29 : vector<1x1x64x9xf32> to vector<64x9xf32>
    %c0_29 = arith.constant 0 : index
    %c0_30 = arith.constant 0 : index
    %31 = vector.load %arg2[%c0_29, %c0_30] : memref<9x32xf32, #tpu.memory_space<vmem>>, vector<9x32xf32>
    %cst_31 = arith.constant dense<0.000000e+00> : vector<64x32xf32>
    %32 = tpu.matmul %30, %31, %cst_31 {dimension_numbers = #tpu.dot_dimension_numbers<[1], [0], [0], [1], [0, 0, 1, 1], [], []>} : vector<64x9xf32>, vector<9x32xf32>, vector<64x32xf32> -> vector<64x32xf32>
    %c0_32 = arith.constant 0 : index
    %c0_33 = arith.constant 0 : index
    %33 = vector.load %arg3[%c0_32, %c0_33] : memref<1x32xf32, #tpu.memory_space<vmem>>, vector<1x32xf32>
    %34 = vector.broadcast %33 : vector<1x32xf32> to vector<64x32xf32>
    %35 = arith.addf %32, %34 : vector<64x32xf32>
    %cst_34 = arith.constant 0.000000e+00 : f32
    %36 = vector.broadcast %cst_34 : f32 to vector<64x32xf32>
    %37 = arith.maximumf %35, %36 : vector<64x32xf32>
    %38 = arith.maximumf %28, %37 : vector<64x32xf32>
    %cst_35 = arith.constant 0.000000e+00 : f32
    %39 = vector.broadcast %cst_35 : f32 to vector<10x10x32xf32>
    %c0_36 = arith.constant 0 : index
    %c0_37 = arith.constant 0 : index
    %c0_38 = arith.constant 0 : index
    %40 = vector.load %arg13[%c0_36, %c0_37, %c0_38] : memref<10x10x32xf32, #tpu.memory_space<vmem>>, vector<10x10x32xf32>
    tpu.vector_store %arg13[%c0_36, %c0_37, %c0_38], %39 {strides = array<i32>} : memref<10x10x32xf32, #tpu.memory_space<vmem>>, vector<10x10x32xf32>,
    %41 = vector.extract_strided_slice %38 {offsets = [0, 0], sizes = [8, 32], strides = [1, 1]} : vector<64x32xf32> to vector<8x32xf32>
    %c1_39 = arith.constant 1 : index
    %c1_40 = arith.constant 1 : index
    %c0_41 = arith.constant 0 : index
    %42 = vector.load %arg13[%c1_39, %c1_40, %c0_41] : memref<10x10x32xf32, #tpu.memory_space<vmem>>, vector<1x8x32xf32>
    %43 = vector.shape_cast %42 : vector<1x8x32xf32> to vector<8x32xf32>
    %44 = vector.shape_cast %41 : vector<8x32xf32> to vector<1x8x32xf32>
    tpu.vector_store %arg13[%c1_39, %c1_40, %c0_41], %44 {strides = array<i32>} : memref<10x10x32xf32, #tpu.memory_space<vmem>>, vector<1x8x32xf32>,
    %45 = vector.extract_strided_slice %38 {offsets = [8, 0], sizes = [8, 32], strides = [1, 1]} : vector<64x32xf32> to vector<8x32xf32>
    %c2_42 = arith.constant 2 : index
    %c1_43 = arith.constant 1 : index
    %c0_44 = arith.constant 0 : index
    %46 = vector.load %arg13[%c2_42, %c1_43, %c0_44] : memref<10x10x32xf32, #tpu.memory_space<vmem>>, vector<1x8x32xf32>
    %47 = vector.shape_cast %46 : vector<1x8x32xf32> to vector<8x32xf32>
    %48 = vector.shape_cast %45 : vector<8x32xf32> to vector<1x8x32xf32>
    tpu.vector_store %arg13[%c2_42, %c1_43, %c0_44], %48 {strides = array<i32>} : memref<10x10x32xf32, #tpu.memory_space<vmem>>, vector<1x8x32xf32>,
    %49 = vector.extract_strided_slice %38 {offsets = [16, 0], sizes = [8, 32], strides = [1, 1]} : vector<64x32xf32> to vector<8x32xf32>
    %c3_45 = arith.constant 3 : index
    %c1_46 = arith.constant 1 : index
    %c0_47 = arith.constant 0 : index
    %50 = vector.load %arg13[%c3_45, %c1_46, %c0_47] : memref<10x10x32xf32, #tpu.memory_space<vmem>>, vector<1x8x32xf32>
    %51 = vector.shape_cast %50 : vector<1x8x32xf32> to vector<8x32xf32>
    %52 = vector.shape_cast %49 : vector<8x32xf32> to vector<1x8x32xf32>
    tpu.vector_store %arg13[%c3_45, %c1_46, %c0_47], %52 {strides = array<i32>} : memref<10x10x32xf32, #tpu.memory_space<vmem>>, vector<1x8x32xf32>,
    %53 = vector.extract_strided_slice %38 {offsets = [24, 0], sizes = [8, 32], strides = [1, 1]} : vector<64x32xf32> to vector<8x32xf32>
    %c4 = arith.constant 4 : index
    %c1_48 = arith.constant 1 : index
    %c0_49 = arith.constant 0 : index
    %54 = vector.load %arg13[%c4, %c1_48, %c0_49] : memref<10x10x32xf32, #tpu.memory_space<vmem>>, vector<1x8x32xf32>
    %55 = vector.shape_cast %54 : vector<1x8x32xf32> to vector<8x32xf32>
    %56 = vector.shape_cast %53 : vector<8x32xf32> to vector<1x8x32xf32>
    tpu.vector_store %arg13[%c4, %c1_48, %c0_49], %56 {strides = array<i32>} : memref<10x10x32xf32, #tpu.memory_space<vmem>>, vector<1x8x32xf32>,
    %57 = vector.extract_strided_slice %38 {offsets = [32, 0], sizes = [8, 32], strides = [1, 1]} : vector<64x32xf32> to vector<8x32xf32>
    %c5 = arith.constant 5 : index
    %c1_50 = arith.constant 1 : index
    %c0_51 = arith.constant 0 : index
    %58 = vector.load %arg13[%c5, %c1_50, %c0_51] : memref<10x10x32xf32, #tpu.memory_space<vmem>>, vector<1x8x32xf32>
    %59 = vector.shape_cast %58 : vector<1x8x32xf32> to vector<8x32xf32>
    %60 = vector.shape_cast %57 : vector<8x32xf32> to vector<1x8x32xf32>
    tpu.vector_store %arg13[%c5, %c1_50, %c0_51], %60 {strides = array<i32>} : memref<10x10x32xf32, #tpu.memory_space<vmem>>, vector<1x8x32xf32>,
    %61 = vector.extract_strided_slice %38 {offsets = [40, 0], sizes = [8, 32], strides = [1, 1]} : vector<64x32xf32> to vector<8x32xf32>
    %c6 = arith.constant 6 : index
    %c1_52 = arith.constant 1 : index
    %c0_53 = arith.constant 0 : index
    %62 = vector.load %arg13[%c6, %c1_52, %c0_53] : memref<10x10x32xf32, #tpu.memory_space<vmem>>, vector<1x8x32xf32>
    %63 = vector.shape_cast %62 : vector<1x8x32xf32> to vector<8x32xf32>
    %64 = vector.shape_cast %61 : vector<8x32xf32> to vector<1x8x32xf32>
    tpu.vector_store %arg13[%c6, %c1_52, %c0_53], %64 {strides = array<i32>} : memref<10x10x32xf32, #tpu.memory_space<vmem>>, vector<1x8x32xf32>,
    %65 = vector.extract_strided_slice %38 {offsets = [48, 0], sizes = [8, 32], strides = [1, 1]} : vector<64x32xf32> to vector<8x32xf32>
    %c7 = arith.constant 7 : index
    %c1_54 = arith.constant 1 : index
    %c0_55 = arith.constant 0 : index
    %66 = vector.load %arg13[%c7, %c1_54, %c0_55] : memref<10x10x32xf32, #tpu.memory_space<vmem>>, vector<1x8x32xf32>
    %67 = vector.shape_cast %66 : vector<1x8x32xf32> to vector<8x32xf32>
    %68 = vector.shape_cast %65 : vector<8x32xf32> to vector<1x8x32xf32>
    tpu.vector_store %arg13[%c7, %c1_54, %c0_55], %68 {strides = array<i32>} : memref<10x10x32xf32, #tpu.memory_space<vmem>>, vector<1x8x32xf32>,
    %69 = vector.extract_strided_slice %38 {offsets = [56, 0], sizes = [8, 32], strides = [1, 1]} : vector<64x32xf32> to vector<8x32xf32>
    %c8 = arith.constant 8 : index
    %c1_56 = arith.constant 1 : index
    %c0_57 = arith.constant 0 : index
    %70 = vector.load %arg13[%c8, %c1_56, %c0_57] : memref<10x10x32xf32, #tpu.memory_space<vmem>>, vector<1x8x32xf32>
    %71 = vector.shape_cast %70 : vector<1x8x32xf32> to vector<8x32xf32>
    %72 = vector.shape_cast %69 : vector<8x32xf32> to vector<1x8x32xf32>
    tpu.vector_store %arg13[%c8, %c1_56, %c0_57], %72 {strides = array<i32>} : memref<10x10x32xf32, #tpu.memory_space<vmem>>, vector<1x8x32xf32>,
    %c0_58 = arith.constant 0 : index
    %c0_59 = arith.constant 0 : index
    %c0_60 = arith.constant 0 : index
    %73 = vector.load %arg13[%c0_58, %c0_59, %c0_60] : memref<10x10x32xf32, #tpu.memory_space<vmem>>, vector<1x8x32xf32>
    %74 = vector.shape_cast %73 : vector<1x8x32xf32> to vector<8x32xf32>
    %c0_61 = arith.constant 0 : index
    %c1_62 = arith.constant 1 : index
    %c0_63 = arith.constant 0 : index
    %75 = vector.load %arg13[%c0_61, %c1_62, %c0_63] : memref<10x10x32xf32, #tpu.memory_space<vmem>>, vector<1x8x32xf32>
    %76 = vector.shape_cast %75 : vector<1x8x32xf32> to vector<8x32xf32>
    %c0_64 = arith.constant 0 : index
    %c2_65 = arith.constant 2 : index
    %c0_66 = arith.constant 0 : index
    %77 = vector.load %arg13[%c0_64, %c2_65, %c0_66] : memref<10x10x32xf32, #tpu.memory_space<vmem>>, vector<1x8x32xf32>
    %78 = vector.shape_cast %77 : vector<1x8x32xf32> to vector<8x32xf32>
    %c1_67 = arith.constant 1 : index
    %c0_68 = arith.constant 0 : index
    %c0_69 = arith.constant 0 : index
    %79 = vector.load %arg13[%c1_67, %c0_68, %c0_69] : memref<10x10x32xf32, #tpu.memory_space<vmem>>, vector<1x8x32xf32>
    %80 = vector.shape_cast %79 : vector<1x8x32xf32> to vector<8x32xf32>
    %c1_70 = arith.constant 1 : index
    %c1_71 = arith.constant 1 : index
    %c0_72 = arith.constant 0 : index
    %81 = vector.load %arg13[%c1_70, %c1_71, %c0_72] : memref<10x10x32xf32, #tpu.memory_space<vmem>>, vector<1x8x32xf32>
    %82 = vector.shape_cast %81 : vector<1x8x32xf32> to vector<8x32xf32>
    %c1_73 = arith.constant 1 : index
    %c2_74 = arith.constant 2 : index
    %c0_75 = arith.constant 0 : index
    %83 = vector.load %arg13[%c1_73, %c2_74, %c0_75] : memref<10x10x32xf32, #tpu.memory_space<vmem>>, vector<1x8x32xf32>
    %84 = vector.shape_cast %83 : vector<1x8x32xf32> to vector<8x32xf32>
    %c2_76 = arith.constant 2 : index
    %c0_77 = arith.constant 0 : index
    %c0_78 = arith.constant 0 : index
    %85 = vector.load %arg13[%c2_76, %c0_77, %c0_78] : memref<10x10x32xf32, #tpu.memory_space<vmem>>, vector<1x8x32xf32>
    %86 = vector.shape_cast %85 : vector<1x8x32xf32> to vector<8x32xf32>
    %c2_79 = arith.constant 2 : index
    %c1_80 = arith.constant 1 : index
    %c0_81 = arith.constant 0 : index
    %87 = vector.load %arg13[%c2_79, %c1_80, %c0_81] : memref<10x10x32xf32, #tpu.memory_space<vmem>>, vector<1x8x32xf32>
    %88 = vector.shape_cast %87 : vector<1x8x32xf32> to vector<8x32xf32>
    %c2_82 = arith.constant 2 : index
    %c2_83 = arith.constant 2 : index
    %c0_84 = arith.constant 0 : index
    %89 = vector.load %arg13[%c2_82, %c2_83, %c0_84] : memref<10x10x32xf32, #tpu.memory_space<vmem>>, vector<1x8x32xf32>
    %90 = vector.shape_cast %89 : vector<1x8x32xf32> to vector<8x32xf32>
    %91 = tpu.concatenate %74, %76, %78, %80, %82, %84, %86, %88, %90 in 1 : vector<8x32xf32>, vector<8x32xf32>, vector<8x32xf32>, vector<8x32xf32>, vector<8x32xf32>, vector<8x32xf32>, vector<8x32xf32>, vector<8x32xf32>, vector<8x32xf32> -> vector<8x288xf32>
    %c1_85 = arith.constant 1 : index
    %c0_86 = arith.constant 0 : index
    %c0_87 = arith.constant 0 : index
    %92 = vector.load %arg13[%c1_85, %c0_86, %c0_87] : memref<10x10x32xf32, #tpu.memory_space<vmem>>, vector<1x8x32xf32>
    %93 = vector.shape_cast %92 : vector<1x8x32xf32> to vector<8x32xf32>
    %c1_88 = arith.constant 1 : index
    %c1_89 = arith.constant 1 : index
    %c0_90 = arith.constant 0 : index
    %94 = vector.load %arg13[%c1_88, %c1_89, %c0_90] : memref<10x10x32xf32, #tpu.memory_space<vmem>>, vector<1x8x32xf32>
    %95 = vector.shape_cast %94 : vector<1x8x32xf32> to vector<8x32xf32>
    %c1_91 = arith.constant 1 : index
    %c2_92 = arith.constant 2 : index
    %c0_93 = arith.constant 0 : index
    %96 = vector.load %arg13[%c1_91, %c2_92, %c0_93] : memref<10x10x32xf32, #tpu.memory_space<vmem>>, vector<1x8x32xf32>
    %97 = vector.shape_cast %96 : vector<1x8x32xf32> to vector<8x32xf32>
    %c2_94 = arith.constant 2 : index
    %c0_95 = arith.constant 0 : index
    %c0_96 = arith.constant 0 : index
    %98 = vector.load %arg13[%c2_94, %c0_95, %c0_96] : memref<10x10x32xf32, #tpu.memory_space<vmem>>, vector<1x8x32xf32>
    %99 = vector.shape_cast %98 : vector<1x8x32xf32> to vector<8x32xf32>
    %c2_97 = arith.constant 2 : index
    %c1_98 = arith.constant 1 : index
    %c0_99 = arith.constant 0 : index
    %100 = vector.load %arg13[%c2_97, %c1_98, %c0_99] : memref<10x10x32xf32, #tpu.memory_space<vmem>>, vector<1x8x32xf32>
    %101 = vector.shape_cast %100 : vector<1x8x32xf32> to vector<8x32xf32>
    %c2_100 = arith.constant 2 : index
    %c2_101 = arith.constant 2 : index
    %c0_102 = arith.constant 0 : index
    %102 = vector.load %arg13[%c2_100, %c2_101, %c0_102] : memref<10x10x32xf32, #tpu.memory_space<vmem>>, vector<1x8x32xf32>
    %103 = vector.shape_cast %102 : vector<1x8x32xf32> to vector<8x32xf32>
    %c3_103 = arith.constant 3 : index
    %c0_104 = arith.constant 0 : index
    %c0_105 = arith.constant 0 : index
    %104 = vector.load %arg13[%c3_103, %c0_104, %c0_105] : memref<10x10x32xf32, #tpu.memory_space<vmem>>, vector<1x8x32xf32>
    %105 = vector.shape_cast %104 : vector<1x8x32xf32> to vector<8x32xf32>
    %c3_106 = arith.constant 3 : index
    %c1_107 = arith.constant 1 : index
    %c0_108 = arith.constant 0 : index
    %106 = vector.load %arg13[%c3_106, %c1_107, %c0_108] : memref<10x10x32xf32, #tpu.memory_space<vmem>>, vector<1x8x32xf32>
    %107 = vector.shape_cast %106 : vector<1x8x32xf32> to vector<8x32xf32>
    %c3_109 = arith.constant 3 : index
    %c2_110 = arith.constant 2 : index
    %c0_111 = arith.constant 0 : index
    %108 = vector.load %arg13[%c3_109, %c2_110, %c0_111] : memref<10x10x32xf32, #tpu.memory_space<vmem>>, vector<1x8x32xf32>
    %109 = vector.shape_cast %108 : vector<1x8x32xf32> to vector<8x32xf32>
    %110 = tpu.concatenate %93, %95, %97, %99, %101, %103, %105, %107, %109 in 1 : vector<8x32xf32>, vector<8x32xf32>, vector<8x32xf32>, vector<8x32xf32>, vector<8x32xf32>, vector<8x32xf32>, vector<8x32xf32>, vector<8x32xf32>, vector<8x32xf32> -> vector<8x288xf32>
    %c2_112 = arith.constant 2 : index
    %c0_113 = arith.constant 0 : index
    %c0_114 = arith.constant 0 : index
    %111 = vector.load %arg13[%c2_112, %c0_113, %c0_114] : memref<10x10x32xf32, #tpu.memory_space<vmem>>, vector<1x8x32xf32>
    %112 = vector.shape_cast %111 : vector<1x8x32xf32> to vector<8x32xf32>
    %c2_115 = arith.constant 2 : index
    %c1_116 = arith.constant 1 : index
    %c0_117 = arith.constant 0 : index
    %113 = vector.load %arg13[%c2_115, %c1_116, %c0_117] : memref<10x10x32xf32, #tpu.memory_space<vmem>>, vector<1x8x32xf32>
    %114 = vector.shape_cast %113 : vector<1x8x32xf32> to vector<8x32xf32>
    %c2_118 = arith.constant 2 : index
    %c2_119 = arith.constant 2 : index
    %c0_120 = arith.constant 0 : index
    %115 = vector.load %arg13[%c2_118, %c2_119, %c0_120] : memref<10x10x32xf32, #tpu.memory_space<vmem>>, vector<1x8x32xf32>
    %116 = vector.shape_cast %115 : vector<1x8x32xf32> to vector<8x32xf32>
    %c3_121 = arith.constant 3 : index
    %c0_122 = arith.constant 0 : index
    %c0_123 = arith.constant 0 : index
    %117 = vector.load %arg13[%c3_121, %c0_122, %c0_123] : memref<10x10x32xf32, #tpu.memory_space<vmem>>, vector<1x8x32xf32>
    %118 = vector.shape_cast %117 : vector<1x8x32xf32> to vector<8x32xf32>
    %c3_124 = arith.constant 3 : index
    %c1_125 = arith.constant 1 : index
    %c0_126 = arith.constant 0 : index
    %119 = vector.load %arg13[%c3_124, %c1_125, %c0_126] : memref<10x10x32xf32, #tpu.memory_space<vmem>>, vector<1x8x32xf32>
    %120 = vector.shape_cast %119 : vector<1x8x32xf32> to vector<8x32xf32>
    %c3_127 = arith.constant 3 : index
    %c2_128 = arith.constant 2 : index
    %c0_129 = arith.constant 0 : index
    %121 = vector.load %arg13[%c3_127, %c2_128, %c0_129] : memref<10x10x32xf32, #tpu.memory_space<vmem>>, vector<1x8x32xf32>
    %122 = vector.shape_cast %121 : vector<1x8x32xf32> to vector<8x32xf32>
    %c4_130 = arith.constant 4 : index
    %c0_131 = arith.constant 0 : index
    %c0_132 = arith.constant 0 : index
    %123 = vector.load %arg13[%c4_130, %c0_131, %c0_132] : memref<10x10x32xf32, #tpu.memory_space<vmem>>, vector<1x8x32xf32>
    %124 = vector.shape_cast %123 : vector<1x8x32xf32> to vector<8x32xf32>
    %c4_133 = arith.constant 4 : index
    %c1_134 = arith.constant 1 : index
    %c0_135 = arith.constant 0 : index
    %125 = vector.load %arg13[%c4_133, %c1_134, %c0_135] : memref<10x10x32xf32, #tpu.memory_space<vmem>>, vector<1x8x32xf32>
    %126 = vector.shape_cast %125 : vector<1x8x32xf32> to vector<8x32xf32>
    %c4_136 = arith.constant 4 : index
    %c2_137 = arith.constant 2 : index
    %c0_138 = arith.constant 0 : index
    %127 = vector.load %arg13[%c4_136, %c2_137, %c0_138] : memref<10x10x32xf32, #tpu.memory_space<vmem>>, vector<1x8x32xf32>
    %128 = vector.shape_cast %127 : vector<1x8x32xf32> to vector<8x32xf32>
    %129 = tpu.concatenate %112, %114, %116, %118, %120, %122, %124, %126, %128 in 1 : vector<8x32xf32>, vector<8x32xf32>, vector<8x32xf32>, vector<8x32xf32>, vector<8x32xf32>, vector<8x32xf32>, vector<8x32xf32>, vector<8x32xf32>, vector<8x32xf32> -> vector<8x288xf32>
    %c3_139 = arith.constant 3 : index
    %c0_140 = arith.constant 0 : index
    %c0_141 = arith.constant 0 : index
    %130 = vector.load %arg13[%c3_139, %c0_140, %c0_141] : memref<10x10x32xf32, #tpu.memory_space<vmem>>, vector<1x8x32xf32>
    %131 = vector.shape_cast %130 : vector<1x8x32xf32> to vector<8x32xf32>
    %c3_142 = arith.constant 3 : index
    %c1_143 = arith.constant 1 : index
    %c0_144 = arith.constant 0 : index
    %132 = vector.load %arg13[%c3_142, %c1_143, %c0_144] : memref<10x10x32xf32, #tpu.memory_space<vmem>>, vector<1x8x32xf32>
    %133 = vector.shape_cast %132 : vector<1x8x32xf32> to vector<8x32xf32>
    %c3_145 = arith.constant 3 : index
    %c2_146 = arith.constant 2 : index
    %c0_147 = arith.constant 0 : index
    %134 = vector.load %arg13[%c3_145, %c2_146, %c0_147] : memref<10x10x32xf32, #tpu.memory_space<vmem>>, vector<1x8x32xf32>
    %135 = vector.shape_cast %134 : vector<1x8x32xf32> to vector<8x32xf32>
    %c4_148 = arith.constant 4 : index
    %c0_149 = arith.constant 0 : index
    %c0_150 = arith.constant 0 : index
    %136 = vector.load %arg13[%c4_148, %c0_149, %c0_150] : memref<10x10x32xf32, #tpu.memory_space<vmem>>, vector<1x8x32xf32>
    %137 = vector.shape_cast %136 : vector<1x8x32xf32> to vector<8x32xf32>
    %c4_151 = arith.constant 4 : index
    %c1_152 = arith.constant 1 : index
    %c0_153 = arith.constant 0 : index
    %138 = vector.load %arg13[%c4_151, %c1_152, %c0_153] : memref<10x10x32xf32, #tpu.memory_space<vmem>>, vector<1x8x32xf32>
    %139 = vector.shape_cast %138 : vector<1x8x32xf32> to vector<8x32xf32>
    %c4_154 = arith.constant 4 : index
    %c2_155 = arith.constant 2 : index
    %c0_156 = arith.constant 0 : index
    %140 = vector.load %arg13[%c4_154, %c2_155, %c0_156] : memref<10x10x32xf32, #tpu.memory_space<vmem>>, vector<1x8x32xf32>
    %141 = vector.shape_cast %140 : vector<1x8x32xf32> to vector<8x32xf32>
    %c5_157 = arith.constant 5 : index
    %c0_158 = arith.constant 0 : index
    %c0_159 = arith.constant 0 : index
    %142 = vector.load %arg13[%c5_157, %c0_158, %c0_159] : memref<10x10x32xf32, #tpu.memory_space<vmem>>, vector<1x8x32xf32>
    %143 = vector.shape_cast %142 : vector<1x8x32xf32> to vector<8x32xf32>
    %c5_160 = arith.constant 5 : index
    %c1_161 = arith.constant 1 : index
    %c0_162 = arith.constant 0 : index
    %144 = vector.load %arg13[%c5_160, %c1_161, %c0_162] : memref<10x10x32xf32, #tpu.memory_space<vmem>>, vector<1x8x32xf32>
    %145 = vector.shape_cast %144 : vector<1x8x32xf32> to vector<8x32xf32>
    %c5_163 = arith.constant 5 : index
    %c2_164 = arith.constant 2 : index
    %c0_165 = arith.constant 0 : index
    %146 = vector.load %arg13[%c5_163, %c2_164, %c0_165] : memref<10x10x32xf32, #tpu.memory_space<vmem>>, vector<1x8x32xf32>
    %147 = vector.shape_cast %146 : vector<1x8x32xf32> to vector<8x32xf32>
    %148 = tpu.concatenate %131, %133, %135, %137, %139, %141, %143, %145, %147 in 1 : vector<8x32xf32>, vector<8x32xf32>, vector<8x32xf32>, vector<8x32xf32>, vector<8x32xf32>, vector<8x32xf32>, vector<8x32xf32>, vector<8x32xf32>, vector<8x32xf32> -> vector<8x288xf32>
    %c4_166 = arith.constant 4 : index
    %c0_167 = arith.constant 0 : index
    %c0_168 = arith.constant 0 : index
    %149 = vector.load %arg13[%c4_166, %c0_167, %c0_168] : memref<10x10x32xf32, #tpu.memory_space<vmem>>, vector<1x8x32xf32>
    %150 = vector.shape_cast %149 : vector<1x8x32xf32> to vector<8x32xf32>
    %c4_169 = arith.constant 4 : index
    %c1_170 = arith.constant 1 : index
    %c0_171 = arith.constant 0 : index
    %151 = vector.load %arg13[%c4_169, %c1_170, %c0_171] : memref<10x10x32xf32, #tpu.memory_space<vmem>>, vector<1x8x32xf32>
    %152 = vector.shape_cast %151 : vector<1x8x32xf32> to vector<8x32xf32>
    %c4_172 = arith.constant 4 : index
    %c2_173 = arith.constant 2 : index
    %c0_174 = arith.constant 0 : index
    %153 = vector.load %arg13[%c4_172, %c2_173, %c0_174] : memref<10x10x32xf32, #tpu.memory_space<vmem>>, vector<1x8x32xf32>
    %154 = vector.shape_cast %153 : vector<1x8x32xf32> to vector<8x32xf32>
    %c5_175 = arith.constant 5 : index
    %c0_176 = arith.constant 0 : index
    %c0_177 = arith.constant 0 : index
    %155 = vector.load %arg13[%c5_175, %c0_176, %c0_177] : memref<10x10x32xf32, #tpu.memory_space<vmem>>, vector<1x8x32xf32>
    %156 = vector.shape_cast %155 : vector<1x8x32xf32> to vector<8x32xf32>
    %c5_178 = arith.constant 5 : index
    %c1_179 = arith.constant 1 : index
    %c0_180 = arith.constant 0 : index
    %157 = vector.load %arg13[%c5_178, %c1_179, %c0_180] : memref<10x10x32xf32, #tpu.memory_space<vmem>>, vector<1x8x32xf32>
    %158 = vector.shape_cast %157 : vector<1x8x32xf32> to vector<8x32xf32>
    %c5_181 = arith.constant 5 : index
    %c2_182 = arith.constant 2 : index
    %c0_183 = arith.constant 0 : index
    %159 = vector.load %arg13[%c5_181, %c2_182, %c0_183] : memref<10x10x32xf32, #tpu.memory_space<vmem>>, vector<1x8x32xf32>
    %160 = vector.shape_cast %159 : vector<1x8x32xf32> to vector<8x32xf32>
    %c6_184 = arith.constant 6 : index
    %c0_185 = arith.constant 0 : index
    %c0_186 = arith.constant 0 : index
    %161 = vector.load %arg13[%c6_184, %c0_185, %c0_186] : memref<10x10x32xf32, #tpu.memory_space<vmem>>, vector<1x8x32xf32>
    %162 = vector.shape_cast %161 : vector<1x8x32xf32> to vector<8x32xf32>
    %c6_187 = arith.constant 6 : index
    %c1_188 = arith.constant 1 : index
    %c0_189 = arith.constant 0 : index
    %163 = vector.load %arg13[%c6_187, %c1_188, %c0_189] : memref<10x10x32xf32, #tpu.memory_space<vmem>>, vector<1x8x32xf32>
    %164 = vector.shape_cast %163 : vector<1x8x32xf32> to vector<8x32xf32>
    %c6_190 = arith.constant 6 : index
    %c2_191 = arith.constant 2 : index
    %c0_192 = arith.constant 0 : index
    %165 = vector.load %arg13[%c6_190, %c2_191, %c0_192] : memref<10x10x32xf32, #tpu.memory_space<vmem>>, vector<1x8x32xf32>
    %166 = vector.shape_cast %165 : vector<1x8x32xf32> to vector<8x32xf32>
    %167 = tpu.concatenate %150, %152, %154, %156, %158, %160, %162, %164, %166 in 1 : vector<8x32xf32>, vector<8x32xf32>, vector<8x32xf32>, vector<8x32xf32>, vector<8x32xf32>, vector<8x32xf32>, vector<8x32xf32>, vector<8x32xf32>, vector<8x32xf32> -> vector<8x288xf32>
    %c5_193 = arith.constant 5 : index
    %c0_194 = arith.constant 0 : index
    %c0_195 = arith.constant 0 : index
    %168 = vector.load %arg13[%c5_193, %c0_194, %c0_195] : memref<10x10x32xf32, #tpu.memory_space<vmem>>, vector<1x8x32xf32>
    %169 = vector.shape_cast %168 : vector<1x8x32xf32> to vector<8x32xf32>
    %c5_196 = arith.constant 5 : index
    %c1_197 = arith.constant 1 : index
    %c0_198 = arith.constant 0 : index
    %170 = vector.load %arg13[%c5_196, %c1_197, %c0_198] : memref<10x10x32xf32, #tpu.memory_space<vmem>>, vector<1x8x32xf32>
    %171 = vector.shape_cast %170 : vector<1x8x32xf32> to vector<8x32xf32>
    %c5_199 = arith.constant 5 : index
    %c2_200 = arith.constant 2 : index
    %c0_201 = arith.constant 0 : index
    %172 = vector.load %arg13[%c5_199, %c2_200, %c0_201] : memref<10x10x32xf32, #tpu.memory_space<vmem>>, vector<1x8x32xf32>
    %173 = vector.shape_cast %172 : vector<1x8x32xf32> to vector<8x32xf32>
    %c6_202 = arith.constant 6 : index
    %c0_203 = arith.constant 0 : index
    %c0_204 = arith.constant 0 : index
    %174 = vector.load %arg13[%c6_202, %c0_203, %c0_204] : memref<10x10x32xf32, #tpu.memory_space<vmem>>, vector<1x8x32xf32>
    %175 = vector.shape_cast %174 : vector<1x8x32xf32> to vector<8x32xf32>
    %c6_205 = arith.constant 6 : index
    %c1_206 = arith.constant 1 : index
    %c0_207 = arith.constant 0 : index
    %176 = vector.load %arg13[%c6_205, %c1_206, %c0_207] : memref<10x10x32xf32, #tpu.memory_space<vmem>>, vector<1x8x32xf32>
    %177 = vector.shape_cast %176 : vector<1x8x32xf32> to vector<8x32xf32>
    %c6_208 = arith.constant 6 : index
    %c2_209 = arith.constant 2 : index
    %c0_210 = arith.constant 0 : index
    %178 = vector.load %arg13[%c6_208, %c2_209, %c0_210] : memref<10x10x32xf32, #tpu.memory_space<vmem>>, vector<1x8x32xf32>
    %179 = vector.shape_cast %178 : vector<1x8x32xf32> to vector<8x32xf32>
    %c7_211 = arith.constant 7 : index
    %c0_212 = arith.constant 0 : index
    %c0_213 = arith.constant 0 : index
    %180 = vector.load %arg13[%c7_211, %c0_212, %c0_213] : memref<10x10x32xf32, #tpu.memory_space<vmem>>, vector<1x8x32xf32>
    %181 = vector.shape_cast %180 : vector<1x8x32xf32> to vector<8x32xf32>
    %c7_214 = arith.constant 7 : index
    %c1_215 = arith.constant 1 : index
    %c0_216 = arith.constant 0 : index
    %182 = vector.load %arg13[%c7_214, %c1_215, %c0_216] : memref<10x10x32xf32, #tpu.memory_space<vmem>>, vector<1x8x32xf32>
    %183 = vector.shape_cast %182 : vector<1x8x32xf32> to vector<8x32xf32>
    %c7_217 = arith.constant 7 : index
    %c2_218 = arith.constant 2 : index
    %c0_219 = arith.constant 0 : index
    %184 = vector.load %arg13[%c7_217, %c2_218, %c0_219] : memref<10x10x32xf32, #tpu.memory_space<vmem>>, vector<1x8x32xf32>
    %185 = vector.shape_cast %184 : vector<1x8x32xf32> to vector<8x32xf32>
    %186 = tpu.concatenate %169, %171, %173, %175, %177, %179, %181, %183, %185 in 1 : vector<8x32xf32>, vector<8x32xf32>, vector<8x32xf32>, vector<8x32xf32>, vector<8x32xf32>, vector<8x32xf32>, vector<8x32xf32>, vector<8x32xf32>, vector<8x32xf32> -> vector<8x288xf32>
    %c6_220 = arith.constant 6 : index
    %c0_221 = arith.constant 0 : index
    %c0_222 = arith.constant 0 : index
    %187 = vector.load %arg13[%c6_220, %c0_221, %c0_222] : memref<10x10x32xf32, #tpu.memory_space<vmem>>, vector<1x8x32xf32>
    %188 = vector.shape_cast %187 : vector<1x8x32xf32> to vector<8x32xf32>
    %c6_223 = arith.constant 6 : index
    %c1_224 = arith.constant 1 : index
    %c0_225 = arith.constant 0 : index
    %189 = vector.load %arg13[%c6_223, %c1_224, %c0_225] : memref<10x10x32xf32, #tpu.memory_space<vmem>>, vector<1x8x32xf32>
    %190 = vector.shape_cast %189 : vector<1x8x32xf32> to vector<8x32xf32>
    %c6_226 = arith.constant 6 : index
    %c2_227 = arith.constant 2 : index
    %c0_228 = arith.constant 0 : index
    %191 = vector.load %arg13[%c6_226, %c2_227, %c0_228] : memref<10x10x32xf32, #tpu.memory_space<vmem>>, vector<1x8x32xf32>
    %192 = vector.shape_cast %191 : vector<1x8x32xf32> to vector<8x32xf32>
    %c7_229 = arith.constant 7 : index
    %c0_230 = arith.constant 0 : index
    %c0_231 = arith.constant 0 : index
    %193 = vector.load %arg13[%c7_229, %c0_230, %c0_231] : memref<10x10x32xf32, #tpu.memory_space<vmem>>, vector<1x8x32xf32>
    %194 = vector.shape_cast %193 : vector<1x8x32xf32> to vector<8x32xf32>
    %c7_232 = arith.constant 7 : index
    %c1_233 = arith.constant 1 : index
    %c0_234 = arith.constant 0 : index
    %195 = vector.load %arg13[%c7_232, %c1_233, %c0_234] : memref<10x10x32xf32, #tpu.memory_space<vmem>>, vector<1x8x32xf32>
    %196 = vector.shape_cast %195 : vector<1x8x32xf32> to vector<8x32xf32>
    %c7_235 = arith.constant 7 : index
    %c2_236 = arith.constant 2 : index
    %c0_237 = arith.constant 0 : index
    %197 = vector.load %arg13[%c7_235, %c2_236, %c0_237] : memref<10x10x32xf32, #tpu.memory_space<vmem>>, vector<1x8x32xf32>
    %198 = vector.shape_cast %197 : vector<1x8x32xf32> to vector<8x32xf32>
    %c8_238 = arith.constant 8 : index
    %c0_239 = arith.constant 0 : index
    %c0_240 = arith.constant 0 : index
    %199 = vector.load %arg13[%c8_238, %c0_239, %c0_240] : memref<10x10x32xf32, #tpu.memory_space<vmem>>, vector<1x8x32xf32>
    %200 = vector.shape_cast %199 : vector<1x8x32xf32> to vector<8x32xf32>
    %c8_241 = arith.constant 8 : index
    %c1_242 = arith.constant 1 : index
    %c0_243 = arith.constant 0 : index
    %201 = vector.load %arg13[%c8_241, %c1_242, %c0_243] : memref<10x10x32xf32, #tpu.memory_space<vmem>>, vector<1x8x32xf32>
    %202 = vector.shape_cast %201 : vector<1x8x32xf32> to vector<8x32xf32>
    %c8_244 = arith.constant 8 : index
    %c2_245 = arith.constant 2 : index
    %c0_246 = arith.constant 0 : index
    %203 = vector.load %arg13[%c8_244, %c2_245, %c0_246] : memref<10x10x32xf32, #tpu.memory_space<vmem>>, vector<1x8x32xf32>
    %204 = vector.shape_cast %203 : vector<1x8x32xf32> to vector<8x32xf32>
    %205 = tpu.concatenate %188, %190, %192, %194, %196, %198, %200, %202, %204 in 1 : vector<8x32xf32>, vector<8x32xf32>, vector<8x32xf32>, vector<8x32xf32>, vector<8x32xf32>, vector<8x32xf32>, vector<8x32xf32>, vector<8x32xf32>, vector<8x32xf32> -> vector<8x288xf32>
    %c7_247 = arith.constant 7 : index
    %c0_248 = arith.constant 0 : index
    %c0_249 = arith.constant 0 : index
    %206 = vector.load %arg13[%c7_247, %c0_248, %c0_249] : memref<10x10x32xf32, #tpu.memory_space<vmem>>, vector<1x8x32xf32>
    %207 = vector.shape_cast %206 : vector<1x8x32xf32> to vector<8x32xf32>
    %c7_250 = arith.constant 7 : index
    %c1_251 = arith.constant 1 : index
    %c0_252 = arith.constant 0 : index
    %208 = vector.load %arg13[%c7_250, %c1_251, %c0_252] : memref<10x10x32xf32, #tpu.memory_space<vmem>>, vector<1x8x32xf32>
    %209 = vector.shape_cast %208 : vector<1x8x32xf32> to vector<8x32xf32>
    %c7_253 = arith.constant 7 : index
    %c2_254 = arith.constant 2 : index
    %c0_255 = arith.constant 0 : index
    %210 = vector.load %arg13[%c7_253, %c2_254, %c0_255] : memref<10x10x32xf32, #tpu.memory_space<vmem>>, vector<1x8x32xf32>
    %211 = vector.shape_cast %210 : vector<1x8x32xf32> to vector<8x32xf32>
    %c8_256 = arith.constant 8 : index
    %c0_257 = arith.constant 0 : index
    %c0_258 = arith.constant 0 : index
    %212 = vector.load %arg13[%c8_256, %c0_257, %c0_258] : memref<10x10x32xf32, #tpu.memory_space<vmem>>, vector<1x8x32xf32>
    %213 = vector.shape_cast %212 : vector<1x8x32xf32> to vector<8x32xf32>
    %c8_259 = arith.constant 8 : index
    %c1_260 = arith.constant 1 : index
    %c0_261 = arith.constant 0 : index
    %214 = vector.load %arg13[%c8_259, %c1_260, %c0_261] : memref<10x10x32xf32, #tpu.memory_space<vmem>>, vector<1x8x32xf32>
    %215 = vector.shape_cast %214 : vector<1x8x32xf32> to vector<8x32xf32>
    %c8_262 = arith.constant 8 : index
    %c2_263 = arith.constant 2 : index
    %c0_264 = arith.constant 0 : index
    %216 = vector.load %arg13[%c8_262, %c2_263, %c0_264] : memref<10x10x32xf32, #tpu.memory_space<vmem>>, vector<1x8x32xf32>
    %217 = vector.shape_cast %216 : vector<1x8x32xf32> to vector<8x32xf32>
    %c9 = arith.constant 9 : index
    %c0_265 = arith.constant 0 : index
    %c0_266 = arith.constant 0 : index
    %218 = vector.load %arg13[%c9, %c0_265, %c0_266] : memref<10x10x32xf32, #tpu.memory_space<vmem>>, vector<1x8x32xf32>
    %219 = vector.shape_cast %218 : vector<1x8x32xf32> to vector<8x32xf32>
    %c9_267 = arith.constant 9 : index
    %c1_268 = arith.constant 1 : index
    %c0_269 = arith.constant 0 : index
    %220 = vector.load %arg13[%c9_267, %c1_268, %c0_269] : memref<10x10x32xf32, #tpu.memory_space<vmem>>, vector<1x8x32xf32>
    %221 = vector.shape_cast %220 : vector<1x8x32xf32> to vector<8x32xf32>
    %c9_270 = arith.constant 9 : index
    %c2_271 = arith.constant 2 : index
    %c0_272 = arith.constant 0 : index
    %222 = vector.load %arg13[%c9_270, %c2_271, %c0_272] : memref<10x10x32xf32, #tpu.memory_space<vmem>>, vector<1x8x32xf32>
    %223 = vector.shape_cast %222 : vector<1x8x32xf32> to vector<8x32xf32>
    %224 = tpu.concatenate %207, %209, %211, %213, %215, %217, %219, %221, %223 in 1 : vector<8x32xf32>, vector<8x32xf32>, vector<8x32xf32>, vector<8x32xf32>, vector<8x32xf32>, vector<8x32xf32>, vector<8x32xf32>, vector<8x32xf32>, vector<8x32xf32> -> vector<8x288xf32>
    %225 = tpu.concatenate %91, %110, %129, %148, %167, %186, %205, %224 in 0 : vector<8x288xf32>, vector<8x288xf32>, vector<8x288xf32>, vector<8x288xf32>, vector<8x288xf32>, vector<8x288xf32>, vector<8x288xf32>, vector<8x288xf32> -> vector<64x288xf32>
    %c0_273 = arith.constant 0 : index
    %c0_274 = arith.constant 0 : index
    %226 = vector.load %arg4[%c0_273, %c0_274] : memref<288x64xf32, #tpu.memory_space<vmem>>, vector<288x64xf32>
    %cst_275 = arith.constant dense<0.000000e+00> : vector<64x64xf32>
    %227 = tpu.matmul %225, %226, %cst_275 {dimension_numbers = #tpu.dot_dimension_numbers<[1], [0], [0], [1], [0, 0, 1, 1], [], []>} : vector<64x288xf32>, vector<288x64xf32>, vector<64x64xf32> -> vector<64x64xf32>
    %c0_276 = arith.constant 0 : index
    %c0_277 = arith.constant 0 : index
    %228 = vector.load %arg5[%c0_276, %c0_277] : memref<1x64xf32, #tpu.memory_space<vmem>>, vector<1x64xf32>
    %229 = vector.broadcast %228 : vector<1x64xf32> to vector<64x64xf32>
    %230 = arith.addf %227, %229 : vector<64x64xf32>
    %cst_278 = arith.constant 0.000000e+00 : f32
    %231 = vector.broadcast %cst_278 : f32 to vector<64x64xf32>
    %232 = arith.maximumf %230, %231 : vector<64x64xf32>
    %cst_279 = arith.constant 0.000000e+00 : f32
    %233 = vector.broadcast %cst_279 : f32 to vector<6x6x64xf32>
    %c0_280 = arith.constant 0 : index
    %c0_281 = arith.constant 0 : index
    %c0_282 = arith.constant 0 : index
    %234 = vector.load %arg14[%c0_280, %c0_281, %c0_282] : memref<6x6x64xf32, #tpu.memory_space<vmem>>, vector<6x6x64xf32>
    tpu.vector_store %arg14[%c0_280, %c0_281, %c0_282], %233 {strides = array<i32>} : memref<6x6x64xf32, #tpu.memory_space<vmem>>, vector<6x6x64xf32>,
    %235 = vector.extract_strided_slice %232 {offsets = [0, 0], sizes = [8, 64], strides = [1, 1]} : vector<64x64xf32> to vector<8x64xf32>
    %236 = vector.extract_strided_slice %232 {offsets = [8, 0], sizes = [8, 64], strides = [1, 1]} : vector<64x64xf32> to vector<8x64xf32>
    %237 = arith.maximumf %235, %236 : vector<8x64xf32>
    %238 = vector.extract_strided_slice %237 {offsets = [0, 0], sizes = [1, 64], strides = [1, 1]} : vector<8x64xf32> to vector<1x64xf32>
    %239 = vector.extract_strided_slice %237 {offsets = [1, 0], sizes = [1, 64], strides = [1, 1]} : vector<8x64xf32> to vector<1x64xf32>
    %240 = arith.maximumf %238, %239 : vector<1x64xf32>
    %241 = vector.extract_strided_slice %237 {offsets = [2, 0], sizes = [1, 64], strides = [1, 1]} : vector<8x64xf32> to vector<1x64xf32>
    %242 = vector.extract_strided_slice %237 {offsets = [3, 0], sizes = [1, 64], strides = [1, 1]} : vector<8x64xf32> to vector<1x64xf32>
    %243 = arith.maximumf %241, %242 : vector<1x64xf32>
    %244 = vector.extract_strided_slice %237 {offsets = [4, 0], sizes = [1, 64], strides = [1, 1]} : vector<8x64xf32> to vector<1x64xf32>
    %245 = vector.extract_strided_slice %237 {offsets = [5, 0], sizes = [1, 64], strides = [1, 1]} : vector<8x64xf32> to vector<1x64xf32>
    %246 = arith.maximumf %244, %245 : vector<1x64xf32>
    %247 = vector.extract_strided_slice %237 {offsets = [6, 0], sizes = [1, 64], strides = [1, 1]} : vector<8x64xf32> to vector<1x64xf32>
    %248 = vector.extract_strided_slice %237 {offsets = [7, 0], sizes = [1, 64], strides = [1, 1]} : vector<8x64xf32> to vector<1x64xf32>
    %249 = arith.maximumf %247, %248 : vector<1x64xf32>
    %250 = tpu.concatenate %240, %243, %246, %249 in 0 : vector<1x64xf32>, vector<1x64xf32>, vector<1x64xf32>, vector<1x64xf32> -> vector<4x64xf32>
    %c1_283 = arith.constant 1 : index
    %c1_284 = arith.constant 1 : index
    %c0_285 = arith.constant 0 : index
    %251 = vector.load %arg14[%c1_283, %c1_284, %c0_285] : memref<6x6x64xf32, #tpu.memory_space<vmem>>, vector<1x4x64xf32>
    %252 = vector.shape_cast %251 : vector<1x4x64xf32> to vector<4x64xf32>
    %253 = vector.shape_cast %250 : vector<4x64xf32> to vector<1x4x64xf32>
    tpu.vector_store %arg14[%c1_283, %c1_284, %c0_285], %253 {strides = array<i32>} : memref<6x6x64xf32, #tpu.memory_space<vmem>>, vector<1x4x64xf32>,
    %254 = vector.extract_strided_slice %232 {offsets = [16, 0], sizes = [8, 64], strides = [1, 1]} : vector<64x64xf32> to vector<8x64xf32>
    %255 = vector.extract_strided_slice %232 {offsets = [24, 0], sizes = [8, 64], strides = [1, 1]} : vector<64x64xf32> to vector<8x64xf32>
    %256 = arith.maximumf %254, %255 : vector<8x64xf32>
    %257 = vector.extract_strided_slice %256 {offsets = [0, 0], sizes = [1, 64], strides = [1, 1]} : vector<8x64xf32> to vector<1x64xf32>
    %258 = vector.extract_strided_slice %256 {offsets = [1, 0], sizes = [1, 64], strides = [1, 1]} : vector<8x64xf32> to vector<1x64xf32>
    %259 = arith.maximumf %257, %258 : vector<1x64xf32>
    %260 = vector.extract_strided_slice %256 {offsets = [2, 0], sizes = [1, 64], strides = [1, 1]} : vector<8x64xf32> to vector<1x64xf32>
    %261 = vector.extract_strided_slice %256 {offsets = [3, 0], sizes = [1, 64], strides = [1, 1]} : vector<8x64xf32> to vector<1x64xf32>
    %262 = arith.maximumf %260, %261 : vector<1x64xf32>
    %263 = vector.extract_strided_slice %256 {offsets = [4, 0], sizes = [1, 64], strides = [1, 1]} : vector<8x64xf32> to vector<1x64xf32>
    %264 = vector.extract_strided_slice %256 {offsets = [5, 0], sizes = [1, 64], strides = [1, 1]} : vector<8x64xf32> to vector<1x64xf32>
    %265 = arith.maximumf %263, %264 : vector<1x64xf32>
    %266 = vector.extract_strided_slice %256 {offsets = [6, 0], sizes = [1, 64], strides = [1, 1]} : vector<8x64xf32> to vector<1x64xf32>
    %267 = vector.extract_strided_slice %256 {offsets = [7, 0], sizes = [1, 64], strides = [1, 1]} : vector<8x64xf32> to vector<1x64xf32>
    %268 = arith.maximumf %266, %267 : vector<1x64xf32>
    %269 = tpu.concatenate %259, %262, %265, %268 in 0 : vector<1x64xf32>, vector<1x64xf32>, vector<1x64xf32>, vector<1x64xf32> -> vector<4x64xf32>
    %c2_286 = arith.constant 2 : index
    %c1_287 = arith.constant 1 : index
    %c0_288 = arith.constant 0 : index
    %270 = vector.load %arg14[%c2_286, %c1_287, %c0_288] : memref<6x6x64xf32, #tpu.memory_space<vmem>>, vector<1x4x64xf32>
    %271 = vector.shape_cast %270 : vector<1x4x64xf32> to vector<4x64xf32>
    %272 = vector.shape_cast %269 : vector<4x64xf32> to vector<1x4x64xf32>
    tpu.vector_store %arg14[%c2_286, %c1_287, %c0_288], %272 {strides = array<i32>} : memref<6x6x64xf32, #tpu.memory_space<vmem>>, vector<1x4x64xf32>,
    %273 = vector.extract_strided_slice %232 {offsets = [32, 0], sizes = [8, 64], strides = [1, 1]} : vector<64x64xf32> to vector<8x64xf32>
    %274 = vector.extract_strided_slice %232 {offsets = [40, 0], sizes = [8, 64], strides = [1, 1]} : vector<64x64xf32> to vector<8x64xf32>
    %275 = arith.maximumf %273, %274 : vector<8x64xf32>
    %276 = vector.extract_strided_slice %275 {offsets = [0, 0], sizes = [1, 64], strides = [1, 1]} : vector<8x64xf32> to vector<1x64xf32>
    %277 = vector.extract_strided_slice %275 {offsets = [1, 0], sizes = [1, 64], strides = [1, 1]} : vector<8x64xf32> to vector<1x64xf32>
    %278 = arith.maximumf %276, %277 : vector<1x64xf32>
    %279 = vector.extract_strided_slice %275 {offsets = [2, 0], sizes = [1, 64], strides = [1, 1]} : vector<8x64xf32> to vector<1x64xf32>
    %280 = vector.extract_strided_slice %275 {offsets = [3, 0], sizes = [1, 64], strides = [1, 1]} : vector<8x64xf32> to vector<1x64xf32>
    %281 = arith.maximumf %279, %280 : vector<1x64xf32>
    %282 = vector.extract_strided_slice %275 {offsets = [4, 0], sizes = [1, 64], strides = [1, 1]} : vector<8x64xf32> to vector<1x64xf32>
    %283 = vector.extract_strided_slice %275 {offsets = [5, 0], sizes = [1, 64], strides = [1, 1]} : vector<8x64xf32> to vector<1x64xf32>
    %284 = arith.maximumf %282, %283 : vector<1x64xf32>
    %285 = vector.extract_strided_slice %275 {offsets = [6, 0], sizes = [1, 64], strides = [1, 1]} : vector<8x64xf32> to vector<1x64xf32>
    %286 = vector.extract_strided_slice %275 {offsets = [7, 0], sizes = [1, 64], strides = [1, 1]} : vector<8x64xf32> to vector<1x64xf32>
    %287 = arith.maximumf %285, %286 : vector<1x64xf32>
    %288 = tpu.concatenate %278, %281, %284, %287 in 0 : vector<1x64xf32>, vector<1x64xf32>, vector<1x64xf32>, vector<1x64xf32> -> vector<4x64xf32>
    %c3_289 = arith.constant 3 : index
    %c1_290 = arith.constant 1 : index
    %c0_291 = arith.constant 0 : index
    %289 = vector.load %arg14[%c3_289, %c1_290, %c0_291] : memref<6x6x64xf32, #tpu.memory_space<vmem>>, vector<1x4x64xf32>
    %290 = vector.shape_cast %289 : vector<1x4x64xf32> to vector<4x64xf32>
    %291 = vector.shape_cast %288 : vector<4x64xf32> to vector<1x4x64xf32>
    tpu.vector_store %arg14[%c3_289, %c1_290, %c0_291], %291 {strides = array<i32>} : memref<6x6x64xf32, #tpu.memory_space<vmem>>, vector<1x4x64xf32>,
    %292 = vector.extract_strided_slice %232 {offsets = [48, 0], sizes = [8, 64], strides = [1, 1]} : vector<64x64xf32> to vector<8x64xf32>
    %293 = vector.extract_strided_slice %232 {offsets = [56, 0], sizes = [8, 64], strides = [1, 1]} : vector<64x64xf32> to vector<8x64xf32>
    %294 = arith.maximumf %292, %293 : vector<8x64xf32>
    %295 = vector.extract_strided_slice %294 {offsets = [0, 0], sizes = [1, 64], strides = [1, 1]} : vector<8x64xf32> to vector<1x64xf32>
    %296 = vector.extract_strided_slice %294 {offsets = [1, 0], sizes = [1, 64], strides = [1, 1]} : vector<8x64xf32> to vector<1x64xf32>
    %297 = arith.maximumf %295, %296 : vector<1x64xf32>
    %298 = vector.extract_strided_slice %294 {offsets = [2, 0], sizes = [1, 64], strides = [1, 1]} : vector<8x64xf32> to vector<1x64xf32>
    %299 = vector.extract_strided_slice %294 {offsets = [3, 0], sizes = [1, 64], strides = [1, 1]} : vector<8x64xf32> to vector<1x64xf32>
    %300 = arith.maximumf %298, %299 : vector<1x64xf32>
    %301 = vector.extract_strided_slice %294 {offsets = [4, 0], sizes = [1, 64], strides = [1, 1]} : vector<8x64xf32> to vector<1x64xf32>
    %302 = vector.extract_strided_slice %294 {offsets = [5, 0], sizes = [1, 64], strides = [1, 1]} : vector<8x64xf32> to vector<1x64xf32>
    %303 = arith.maximumf %301, %302 : vector<1x64xf32>
    %304 = vector.extract_strided_slice %294 {offsets = [6, 0], sizes = [1, 64], strides = [1, 1]} : vector<8x64xf32> to vector<1x64xf32>
    %305 = vector.extract_strided_slice %294 {offsets = [7, 0], sizes = [1, 64], strides = [1, 1]} : vector<8x64xf32> to vector<1x64xf32>
    %306 = arith.maximumf %304, %305 : vector<1x64xf32>
    %307 = tpu.concatenate %297, %300, %303, %306 in 0 : vector<1x64xf32>, vector<1x64xf32>, vector<1x64xf32>, vector<1x64xf32> -> vector<4x64xf32>
    %c4_292 = arith.constant 4 : index
    %c1_293 = arith.constant 1 : index
    %c0_294 = arith.constant 0 : index
    %308 = vector.load %arg14[%c4_292, %c1_293, %c0_294] : memref<6x6x64xf32, #tpu.memory_space<vmem>>, vector<1x4x64xf32>
    %309 = vector.shape_cast %308 : vector<1x4x64xf32> to vector<4x64xf32>
    %310 = vector.shape_cast %307 : vector<4x64xf32> to vector<1x4x64xf32>
    tpu.vector_store %arg14[%c4_292, %c1_293, %c0_294], %310 {strides = array<i32>} : memref<6x6x64xf32, #tpu.memory_space<vmem>>, vector<1x4x64xf32>,
    %cst_295 = arith.constant 0.000000e+00 : f32
    %311 = vector.broadcast %cst_295 : f32 to vector<1x128xf32>
    %c0_296 = arith.constant 0 : index
    %c0_297 = arith.constant 0 : index
    %c0_298 = arith.constant 0 : index
    %312 = vector.load %arg14[%c0_296, %c0_297, %c0_298] : memref<6x6x64xf32, #tpu.memory_space<vmem>>, vector<1x4x64xf32>
    %313 = vector.shape_cast %312 : vector<1x4x64xf32> to vector<4x64xf32>
    %c0_299 = arith.constant 0 : index
    %c1_300 = arith.constant 1 : index
    %c0_301 = arith.constant 0 : index
    %314 = vector.load %arg14[%c0_299, %c1_300, %c0_301] : memref<6x6x64xf32, #tpu.memory_space<vmem>>, vector<1x4x64xf32>
    %315 = vector.shape_cast %314 : vector<1x4x64xf32> to vector<4x64xf32>
    %c0_302 = arith.constant 0 : index
    %c2_303 = arith.constant 2 : index
    %c0_304 = arith.constant 0 : index
    %316 = vector.load %arg14[%c0_302, %c2_303, %c0_304] : memref<6x6x64xf32, #tpu.memory_space<vmem>>, vector<1x4x64xf32>
    %317 = vector.shape_cast %316 : vector<1x4x64xf32> to vector<4x64xf32>
    %c1_305 = arith.constant 1 : index
    %c0_306 = arith.constant 0 : index
    %c0_307 = arith.constant 0 : index
    %318 = vector.load %arg14[%c1_305, %c0_306, %c0_307] : memref<6x6x64xf32, #tpu.memory_space<vmem>>, vector<1x4x64xf32>
    %319 = vector.shape_cast %318 : vector<1x4x64xf32> to vector<4x64xf32>
    %c1_308 = arith.constant 1 : index
    %c1_309 = arith.constant 1 : index
    %c0_310 = arith.constant 0 : index
    %320 = vector.load %arg14[%c1_308, %c1_309, %c0_310] : memref<6x6x64xf32, #tpu.memory_space<vmem>>, vector<1x4x64xf32>
    %321 = vector.shape_cast %320 : vector<1x4x64xf32> to vector<4x64xf32>
    %c1_311 = arith.constant 1 : index
    %c2_312 = arith.constant 2 : index
    %c0_313 = arith.constant 0 : index
    %322 = vector.load %arg14[%c1_311, %c2_312, %c0_313] : memref<6x6x64xf32, #tpu.memory_space<vmem>>, vector<1x4x64xf32>
    %323 = vector.shape_cast %322 : vector<1x4x64xf32> to vector<4x64xf32>
    %c2_314 = arith.constant 2 : index
    %c0_315 = arith.constant 0 : index
    %c0_316 = arith.constant 0 : index
    %324 = vector.load %arg14[%c2_314, %c0_315, %c0_316] : memref<6x6x64xf32, #tpu.memory_space<vmem>>, vector<1x4x64xf32>
    %325 = vector.shape_cast %324 : vector<1x4x64xf32> to vector<4x64xf32>
    %c2_317 = arith.constant 2 : index
    %c1_318 = arith.constant 1 : index
    %c0_319 = arith.constant 0 : index
    %326 = vector.load %arg14[%c2_317, %c1_318, %c0_319] : memref<6x6x64xf32, #tpu.memory_space<vmem>>, vector<1x4x64xf32>
    %327 = vector.shape_cast %326 : vector<1x4x64xf32> to vector<4x64xf32>
    %c2_320 = arith.constant 2 : index
    %c2_321 = arith.constant 2 : index
    %c0_322 = arith.constant 0 : index
    %328 = vector.load %arg14[%c2_320, %c2_321, %c0_322] : memref<6x6x64xf32, #tpu.memory_space<vmem>>, vector<1x4x64xf32>
    %329 = vector.shape_cast %328 : vector<1x4x64xf32> to vector<4x64xf32>
    %330 = tpu.concatenate %313, %315, %317, %319, %321, %323, %325, %327, %329 in 1 : vector<4x64xf32>, vector<4x64xf32>, vector<4x64xf32>, vector<4x64xf32>, vector<4x64xf32>, vector<4x64xf32>, vector<4x64xf32>, vector<4x64xf32>, vector<4x64xf32> -> vector<4x576xf32>
    %c0_323 = arith.constant 0 : index
    %c0_324 = arith.constant 0 : index
    %331 = vector.load %arg6[%c0_323, %c0_324] : memref<576x128xf32, #tpu.memory_space<vmem>>, vector<576x128xf32>
    %cst_325 = arith.constant dense<0.000000e+00> : vector<4x128xf32>
    %332 = tpu.matmul %330, %331, %cst_325 {dimension_numbers = #tpu.dot_dimension_numbers<[1], [0], [0], [1], [0, 0, 1, 1], [], []>} : vector<4x576xf32>, vector<576x128xf32>, vector<4x128xf32> -> vector<4x128xf32>
    %c0_326 = arith.constant 0 : index
    %c0_327 = arith.constant 0 : index
    %333 = vector.load %arg7[%c0_326, %c0_327] : memref<1x128xf32, #tpu.memory_space<vmem>>, vector<1x128xf32>
    %334 = vector.broadcast %333 : vector<1x128xf32> to vector<4x128xf32>
    %335 = arith.addf %332, %334 : vector<4x128xf32>
    %cst_328 = arith.constant 0.000000e+00 : f32
    %336 = vector.broadcast %cst_328 : f32 to vector<4x128xf32>
    %337 = arith.maximumf %335, %336 : vector<4x128xf32>
    %cst_329 = arith.constant dense<0.000000e+00> : vector<128xf32>
    %338 = vector.multi_reduction <add>, %337, %cst_329 [0] : vector<4x128xf32> to vector<128xf32>
    %339 = vector.shape_cast %338 : vector<128xf32> to vector<1x128xf32>
    %340 = arith.addf %311, %339 : vector<1x128xf32>
    %c1_330 = arith.constant 1 : index
    %c0_331 = arith.constant 0 : index
    %c0_332 = arith.constant 0 : index
    %341 = vector.load %arg14[%c1_330, %c0_331, %c0_332] : memref<6x6x64xf32, #tpu.memory_space<vmem>>, vector<1x4x64xf32>
    %342 = vector.shape_cast %341 : vector<1x4x64xf32> to vector<4x64xf32>
    %c1_333 = arith.constant 1 : index
    %c1_334 = arith.constant 1 : index
    %c0_335 = arith.constant 0 : index
    %343 = vector.load %arg14[%c1_333, %c1_334, %c0_335] : memref<6x6x64xf32, #tpu.memory_space<vmem>>, vector<1x4x64xf32>
    %344 = vector.shape_cast %343 : vector<1x4x64xf32> to vector<4x64xf32>
    %c1_336 = arith.constant 1 : index
    %c2_337 = arith.constant 2 : index
    %c0_338 = arith.constant 0 : index
    %345 = vector.load %arg14[%c1_336, %c2_337, %c0_338] : memref<6x6x64xf32, #tpu.memory_space<vmem>>, vector<1x4x64xf32>
    %346 = vector.shape_cast %345 : vector<1x4x64xf32> to vector<4x64xf32>
    %c2_339 = arith.constant 2 : index
    %c0_340 = arith.constant 0 : index
    %c0_341 = arith.constant 0 : index
    %347 = vector.load %arg14[%c2_339, %c0_340, %c0_341] : memref<6x6x64xf32, #tpu.memory_space<vmem>>, vector<1x4x64xf32>
    %348 = vector.shape_cast %347 : vector<1x4x64xf32> to vector<4x64xf32>
    %c2_342 = arith.constant 2 : index
    %c1_343 = arith.constant 1 : index
    %c0_344 = arith.constant 0 : index
    %349 = vector.load %arg14[%c2_342, %c1_343, %c0_344] : memref<6x6x64xf32, #tpu.memory_space<vmem>>, vector<1x4x64xf32>
    %350 = vector.shape_cast %349 : vector<1x4x64xf32> to vector<4x64xf32>
    %c2_345 = arith.constant 2 : index
    %c2_346 = arith.constant 2 : index
    %c0_347 = arith.constant 0 : index
    %351 = vector.load %arg14[%c2_345, %c2_346, %c0_347] : memref<6x6x64xf32, #tpu.memory_space<vmem>>, vector<1x4x64xf32>
    %352 = vector.shape_cast %351 : vector<1x4x64xf32> to vector<4x64xf32>
    %c3_348 = arith.constant 3 : index
    %c0_349 = arith.constant 0 : index
    %c0_350 = arith.constant 0 : index
    %353 = vector.load %arg14[%c3_348, %c0_349, %c0_350] : memref<6x6x64xf32, #tpu.memory_space<vmem>>, vector<1x4x64xf32>
    %354 = vector.shape_cast %353 : vector<1x4x64xf32> to vector<4x64xf32>
    %c3_351 = arith.constant 3 : index
    %c1_352 = arith.constant 1 : index
    %c0_353 = arith.constant 0 : index
    %355 = vector.load %arg14[%c3_351, %c1_352, %c0_353] : memref<6x6x64xf32, #tpu.memory_space<vmem>>, vector<1x4x64xf32>
    %356 = vector.shape_cast %355 : vector<1x4x64xf32> to vector<4x64xf32>
    %c3_354 = arith.constant 3 : index
    %c2_355 = arith.constant 2 : index
    %c0_356 = arith.constant 0 : index
    %357 = vector.load %arg14[%c3_354, %c2_355, %c0_356] : memref<6x6x64xf32, #tpu.memory_space<vmem>>, vector<1x4x64xf32>
    %358 = vector.shape_cast %357 : vector<1x4x64xf32> to vector<4x64xf32>
    %359 = tpu.concatenate %342, %344, %346, %348, %350, %352, %354, %356, %358 in 1 : vector<4x64xf32>, vector<4x64xf32>, vector<4x64xf32>, vector<4x64xf32>, vector<4x64xf32>, vector<4x64xf32>, vector<4x64xf32>, vector<4x64xf32>, vector<4x64xf32> -> vector<4x576xf32>
    %c0_357 = arith.constant 0 : index
    %c0_358 = arith.constant 0 : index
    %360 = vector.load %arg6[%c0_357, %c0_358] : memref<576x128xf32, #tpu.memory_space<vmem>>, vector<576x128xf32>
    %cst_359 = arith.constant dense<0.000000e+00> : vector<4x128xf32>
    %361 = tpu.matmul %359, %360, %cst_359 {dimension_numbers = #tpu.dot_dimension_numbers<[1], [0], [0], [1], [0, 0, 1, 1], [], []>} : vector<4x576xf32>, vector<576x128xf32>, vector<4x128xf32> -> vector<4x128xf32>
    %c0_360 = arith.constant 0 : index
    %c0_361 = arith.constant 0 : index
    %362 = vector.load %arg7[%c0_360, %c0_361] : memref<1x128xf32, #tpu.memory_space<vmem>>, vector<1x128xf32>
    %363 = vector.broadcast %362 : vector<1x128xf32> to vector<4x128xf32>
    %364 = arith.addf %361, %363 : vector<4x128xf32>
    %cst_362 = arith.constant 0.000000e+00 : f32
    %365 = vector.broadcast %cst_362 : f32 to vector<4x128xf32>
    %366 = arith.maximumf %364, %365 : vector<4x128xf32>
    %cst_363 = arith.constant dense<0.000000e+00> : vector<128xf32>
    %367 = vector.multi_reduction <add>, %366, %cst_363 [0] : vector<4x128xf32> to vector<128xf32>
    %368 = vector.shape_cast %367 : vector<128xf32> to vector<1x128xf32>
    %369 = arith.addf %340, %368 : vector<1x128xf32>
    %c2_364 = arith.constant 2 : index
    %c0_365 = arith.constant 0 : index
    %c0_366 = arith.constant 0 : index
    %370 = vector.load %arg14[%c2_364, %c0_365, %c0_366] : memref<6x6x64xf32, #tpu.memory_space<vmem>>, vector<1x4x64xf32>
    %371 = vector.shape_cast %370 : vector<1x4x64xf32> to vector<4x64xf32>
    %c2_367 = arith.constant 2 : index
    %c1_368 = arith.constant 1 : index
    %c0_369 = arith.constant 0 : index
    %372 = vector.load %arg14[%c2_367, %c1_368, %c0_369] : memref<6x6x64xf32, #tpu.memory_space<vmem>>, vector<1x4x64xf32>
    %373 = vector.shape_cast %372 : vector<1x4x64xf32> to vector<4x64xf32>
    %c2_370 = arith.constant 2 : index
    %c2_371 = arith.constant 2 : index
    %c0_372 = arith.constant 0 : index
    %374 = vector.load %arg14[%c2_370, %c2_371, %c0_372] : memref<6x6x64xf32, #tpu.memory_space<vmem>>, vector<1x4x64xf32>
    %375 = vector.shape_cast %374 : vector<1x4x64xf32> to vector<4x64xf32>
    %c3_373 = arith.constant 3 : index
    %c0_374 = arith.constant 0 : index
    %c0_375 = arith.constant 0 : index
    %376 = vector.load %arg14[%c3_373, %c0_374, %c0_375] : memref<6x6x64xf32, #tpu.memory_space<vmem>>, vector<1x4x64xf32>
    %377 = vector.shape_cast %376 : vector<1x4x64xf32> to vector<4x64xf32>
    %c3_376 = arith.constant 3 : index
    %c1_377 = arith.constant 1 : index
    %c0_378 = arith.constant 0 : index
    %378 = vector.load %arg14[%c3_376, %c1_377, %c0_378] : memref<6x6x64xf32, #tpu.memory_space<vmem>>, vector<1x4x64xf32>
    %379 = vector.shape_cast %378 : vector<1x4x64xf32> to vector<4x64xf32>
    %c3_379 = arith.constant 3 : index
    %c2_380 = arith.constant 2 : index
    %c0_381 = arith.constant 0 : index
    %380 = vector.load %arg14[%c3_379, %c2_380, %c0_381] : memref<6x6x64xf32, #tpu.memory_space<vmem>>, vector<1x4x64xf32>
    %381 = vector.shape_cast %380 : vector<1x4x64xf32> to vector<4x64xf32>
    %c4_382 = arith.constant 4 : index
    %c0_383 = arith.constant 0 : index
    %c0_384 = arith.constant 0 : index
    %382 = vector.load %arg14[%c4_382, %c0_383, %c0_384] : memref<6x6x64xf32, #tpu.memory_space<vmem>>, vector<1x4x64xf32>
    %383 = vector.shape_cast %382 : vector<1x4x64xf32> to vector<4x64xf32>
    %c4_385 = arith.constant 4 : index
    %c1_386 = arith.constant 1 : index
    %c0_387 = arith.constant 0 : index
    %384 = vector.load %arg14[%c4_385, %c1_386, %c0_387] : memref<6x6x64xf32, #tpu.memory_space<vmem>>, vector<1x4x64xf32>
    %385 = vector.shape_cast %384 : vector<1x4x64xf32> to vector<4x64xf32>
    %c4_388 = arith.constant 4 : index
    %c2_389 = arith.constant 2 : index
    %c0_390 = arith.constant 0 : index
    %386 = vector.load %arg14[%c4_388, %c2_389, %c0_390] : memref<6x6x64xf32, #tpu.memory_space<vmem>>, vector<1x4x64xf32>
    %387 = vector.shape_cast %386 : vector<1x4x64xf32> to vector<4x64xf32>
    %388 = tpu.concatenate %371, %373, %375, %377, %379, %381, %383, %385, %387 in 1 : vector<4x64xf32>, vector<4x64xf32>, vector<4x64xf32>, vector<4x64xf32>, vector<4x64xf32>, vector<4x64xf32>, vector<4x64xf32>, vector<4x64xf32>, vector<4x64xf32> -> vector<4x576xf32>
    %c0_391 = arith.constant 0 : index
    %c0_392 = arith.constant 0 : index
    %389 = vector.load %arg6[%c0_391, %c0_392] : memref<576x128xf32, #tpu.memory_space<vmem>>, vector<576x128xf32>
    %cst_393 = arith.constant dense<0.000000e+00> : vector<4x128xf32>
    %390 = tpu.matmul %388, %389, %cst_393 {dimension_numbers = #tpu.dot_dimension_numbers<[1], [0], [0], [1], [0, 0, 1, 1], [], []>} : vector<4x576xf32>, vector<576x128xf32>, vector<4x128xf32> -> vector<4x128xf32>
    %c0_394 = arith.constant 0 : index
    %c0_395 = arith.constant 0 : index
    %391 = vector.load %arg7[%c0_394, %c0_395] : memref<1x128xf32, #tpu.memory_space<vmem>>, vector<1x128xf32>
    %392 = vector.broadcast %391 : vector<1x128xf32> to vector<4x128xf32>
    %393 = arith.addf %390, %392 : vector<4x128xf32>
    %cst_396 = arith.constant 0.000000e+00 : f32
    %394 = vector.broadcast %cst_396 : f32 to vector<4x128xf32>
    %395 = arith.maximumf %393, %394 : vector<4x128xf32>
    %cst_397 = arith.constant dense<0.000000e+00> : vector<128xf32>
    %396 = vector.multi_reduction <add>, %395, %cst_397 [0] : vector<4x128xf32> to vector<128xf32>
    %397 = vector.shape_cast %396 : vector<128xf32> to vector<1x128xf32>
    %398 = arith.addf %369, %397 : vector<1x128xf32>
    %c3_398 = arith.constant 3 : index
    %c0_399 = arith.constant 0 : index
    %c0_400 = arith.constant 0 : index
    %399 = vector.load %arg14[%c3_398, %c0_399, %c0_400] : memref<6x6x64xf32, #tpu.memory_space<vmem>>, vector<1x4x64xf32>
    %400 = vector.shape_cast %399 : vector<1x4x64xf32> to vector<4x64xf32>
    %c3_401 = arith.constant 3 : index
    %c1_402 = arith.constant 1 : index
    %c0_403 = arith.constant 0 : index
    %401 = vector.load %arg14[%c3_401, %c1_402, %c0_403] : memref<6x6x64xf32, #tpu.memory_space<vmem>>, vector<1x4x64xf32>
    %402 = vector.shape_cast %401 : vector<1x4x64xf32> to vector<4x64xf32>
    %c3_404 = arith.constant 3 : index
    %c2_405 = arith.constant 2 : index
    %c0_406 = arith.constant 0 : index
    %403 = vector.load %arg14[%c3_404, %c2_405, %c0_406] : memref<6x6x64xf32, #tpu.memory_space<vmem>>, vector<1x4x64xf32>
    %404 = vector.shape_cast %403 : vector<1x4x64xf32> to vector<4x64xf32>
    %c4_407 = arith.constant 4 : index
    %c0_408 = arith.constant 0 : index
    %c0_409 = arith.constant 0 : index
    %405 = vector.load %arg14[%c4_407, %c0_408, %c0_409] : memref<6x6x64xf32, #tpu.memory_space<vmem>>, vector<1x4x64xf32>
    %406 = vector.shape_cast %405 : vector<1x4x64xf32> to vector<4x64xf32>
    %c4_410 = arith.constant 4 : index
    %c1_411 = arith.constant 1 : index
    %c0_412 = arith.constant 0 : index
    %407 = vector.load %arg14[%c4_410, %c1_411, %c0_412] : memref<6x6x64xf32, #tpu.memory_space<vmem>>, vector<1x4x64xf32>
    %408 = vector.shape_cast %407 : vector<1x4x64xf32> to vector<4x64xf32>
    %c4_413 = arith.constant 4 : index
    %c2_414 = arith.constant 2 : index
    %c0_415 = arith.constant 0 : index
    %409 = vector.load %arg14[%c4_413, %c2_414, %c0_415] : memref<6x6x64xf32, #tpu.memory_space<vmem>>, vector<1x4x64xf32>
    %410 = vector.shape_cast %409 : vector<1x4x64xf32> to vector<4x64xf32>
    %c5_416 = arith.constant 5 : index
    %c0_417 = arith.constant 0 : index
    %c0_418 = arith.constant 0 : index
    %411 = vector.load %arg14[%c5_416, %c0_417, %c0_418] : memref<6x6x64xf32, #tpu.memory_space<vmem>>, vector<1x4x64xf32>
    %412 = vector.shape_cast %411 : vector<1x4x64xf32> to vector<4x64xf32>
    %c5_419 = arith.constant 5 : index
    %c1_420 = arith.constant 1 : index
    %c0_421 = arith.constant 0 : index
    %413 = vector.load %arg14[%c5_419, %c1_420, %c0_421] : memref<6x6x64xf32, #tpu.memory_space<vmem>>, vector<1x4x64xf32>
    %414 = vector.shape_cast %413 : vector<1x4x64xf32> to vector<4x64xf32>
    %c5_422 = arith.constant 5 : index
    %c2_423 = arith.constant 2 : index
    %c0_424 = arith.constant 0 : index
    %415 = vector.load %arg14[%c5_422, %c2_423, %c0_424] : memref<6x6x64xf32, #tpu.memory_space<vmem>>, vector<1x4x64xf32>
    %416 = vector.shape_cast %415 : vector<1x4x64xf32> to vector<4x64xf32>
    %417 = tpu.concatenate %400, %402, %404, %406, %408, %410, %412, %414, %416 in 1 : vector<4x64xf32>, vector<4x64xf32>, vector<4x64xf32>, vector<4x64xf32>, vector<4x64xf32>, vector<4x64xf32>, vector<4x64xf32>, vector<4x64xf32>, vector<4x64xf32> -> vector<4x576xf32>
    %c0_425 = arith.constant 0 : index
    %c0_426 = arith.constant 0 : index
    %418 = vector.load %arg6[%c0_425, %c0_426] : memref<576x128xf32, #tpu.memory_space<vmem>>, vector<576x128xf32>
    %cst_427 = arith.constant dense<0.000000e+00> : vector<4x128xf32>
    %419 = tpu.matmul %417, %418, %cst_427 {dimension_numbers = #tpu.dot_dimension_numbers<[1], [0], [0], [1], [0, 0, 1, 1], [], []>} : vector<4x576xf32>, vector<576x128xf32>, vector<4x128xf32> -> vector<4x128xf32>
    %c0_428 = arith.constant 0 : index
    %c0_429 = arith.constant 0 : index
    %420 = vector.load %arg7[%c0_428, %c0_429] : memref<1x128xf32, #tpu.memory_space<vmem>>, vector<1x128xf32>
    %421 = vector.broadcast %420 : vector<1x128xf32> to vector<4x128xf32>
    %422 = arith.addf %419, %421 : vector<4x128xf32>
    %cst_430 = arith.constant 0.000000e+00 : f32
    %423 = vector.broadcast %cst_430 : f32 to vector<4x128xf32>
    %424 = arith.maximumf %422, %423 : vector<4x128xf32>
    %cst_431 = arith.constant dense<0.000000e+00> : vector<128xf32>
    %425 = vector.multi_reduction <add>, %424, %cst_431 [0] : vector<4x128xf32> to vector<128xf32>
    %426 = vector.shape_cast %425 : vector<128xf32> to vector<1x128xf32>
    %427 = arith.addf %398, %426 : vector<1x128xf32>
    %cst_432 = arith.constant 6.250000e-02 : f32
    %428 = vector.broadcast %cst_432 : f32 to vector<1x128xf32>
    %429 = arith.mulf %427, %428 : vector<1x128xf32>
    %c0_433 = arith.constant 0 : index
    %c0_434 = arith.constant 0 : index
    %430 = vector.load %arg8[%c0_433, %c0_434] : memref<128x64xf32, #tpu.memory_space<vmem>>, vector<128x64xf32>
    %cst_435 = arith.constant dense<0.000000e+00> : vector<1x64xf32>
    %431 = tpu.matmul %429, %430, %cst_435 {dimension_numbers = #tpu.dot_dimension_numbers<[1], [0], [0], [1], [0, 0, 1, 1], [], []>} : vector<1x128xf32>, vector<128x64xf32>, vector<1x64xf32> -> vector<1x64xf32>
    %c0_436 = arith.constant 0 : index
    %c0_437 = arith.constant 0 : index
    %432 = vector.load %arg9[%c0_436, %c0_437] : memref<1x64xf32, #tpu.memory_space<vmem>>, vector<1x64xf32>
    %433 = arith.addf %431, %432 : vector<1x64xf32>
    %cst_438 = arith.constant 0.000000e+00 : f32
    %434 = vector.broadcast %cst_438 : f32 to vector<1x64xf32>
    %435 = arith.maximumf %433, %434 : vector<1x64xf32>
    %c0_439 = arith.constant 0 : index
    %c0_440 = arith.constant 0 : index
    %436 = vector.load %arg10[%c0_439, %c0_440] : memref<64x10xf32, #tpu.memory_space<vmem>>, vector<64x10xf32>
    %cst_441 = arith.constant dense<0.000000e+00> : vector<1x10xf32>
    %437 = tpu.matmul %435, %436, %cst_441 {dimension_numbers = #tpu.dot_dimension_numbers<[1], [0], [0], [1], [0, 0, 1, 1], [], []>} : vector<1x64xf32>, vector<64x10xf32>, vector<1x10xf32> -> vector<1x10xf32>
    %c0_442 = arith.constant 0 : index
    %c0_443 = arith.constant 0 : index
    %438 = vector.load %arg11[%c0_442, %c0_443] : memref<1x10xf32, #tpu.memory_space<vmem>>, vector<1x10xf32>
    %439 = arith.addf %437, %438 : vector<1x10xf32>
    %c0_444 = arith.constant 0 : index
    %c0_445 = arith.constant 0 : index
    %c0_446 = arith.constant 0 : index
    %440 = vector.load %arg12[%c0_444, %c0_445, %c0_446] : memref<1x1x10xf32, #tpu.memory_space<vmem>>, vector<1x1x10xf32>
    %441 = vector.shape_cast %440 : vector<1x1x10xf32> to vector<1x10xf32>
    %442 = vector.shape_cast %439 : vector<1x10xf32> to vector<1x1x10xf32>
    tpu.vector_store %arg12[%c0_444, %c0_445, %c0_446], %442 {strides = array<i32>} : memref<1x1x10xf32, #tpu.memory_space<vmem>>, vector<1x1x10xf32>,
    return
  }
  func.func @transform_0(%arg0: i32) -> (i32, i32, i32, i32) {
    %c0_i32 = arith.constant 0 : i32
    %c0_i32_0 = arith.constant 0 : i32
    %c0_i32_1 = arith.constant 0 : i32
    %c0_i32_2 = arith.constant 0 : i32
    return %arg0, %c0_i32, %c0_i32_0, %c0_i32_1 : i32, i32, i32, i32
  }
  func.func @transform_1(%arg0: i32) -> (i32, i32) {
    %c0_i32 = arith.constant 0 : i32
    %c0_i32_0 = arith.constant 0 : i32
    %c0_i32_1 = arith.constant 0 : i32
    return %c0_i32, %c0_i32_0 : i32, i32
  }
  func.func @transform_2(%arg0: i32) -> (i32, i32) {
    %c0_i32 = arith.constant 0 : i32
    %c0_i32_0 = arith.constant 0 : i32
    %c0_i32_1 = arith.constant 0 : i32
    return %c0_i32, %c0_i32_0 : i32, i32
  }
  func.func @transform_3(%arg0: i32) -> (i32, i32) {
    %c0_i32 = arith.constant 0 : i32
    %c0_i32_0 = arith.constant 0 : i32
    %c0_i32_1 = arith.constant 0 : i32
    return %c0_i32, %c0_i32_0 : i32, i32
  }
  func.func @transform_4(%arg0: i32) -> (i32, i32) {
    %c0_i32 = arith.constant 0 : i32
    %c0_i32_0 = arith.constant 0 : i32
    %c0_i32_1 = arith.constant 0 : i32
    return %c0_i32, %c0_i32_0 : i32, i32
  }
  func.func @transform_5(%arg0: i32) -> (i32, i32) {
    %c0_i32 = arith.constant 0 : i32
    %c0_i32_0 = arith.constant 0 : i32
    %c0_i32_1 = arith.constant 0 : i32
    return %c0_i32, %c0_i32_0 : i32, i32
  }
  func.func @transform_6(%arg0: i32) -> (i32, i32) {
    %c0_i32 = arith.constant 0 : i32
    %c0_i32_0 = arith.constant 0 : i32
    %c0_i32_1 = arith.constant 0 : i32
    return %c0_i32, %c0_i32_0 : i32, i32
  }
  func.func @transform_7(%arg0: i32) -> (i32, i32) {
    %c0_i32 = arith.constant 0 : i32
    %c0_i32_0 = arith.constant 0 : i32
    %c0_i32_1 = arith.constant 0 : i32
    return %c0_i32, %c0_i32_0 : i32, i32
  }
  func.func @transform_8(%arg0: i32) -> (i32, i32) {
    %c0_i32 = arith.constant 0 : i32
    %c0_i32_0 = arith.constant 0 : i32
    %c0_i32_1 = arith.constant 0 : i32
    return %c0_i32, %c0_i32_0 : i32, i32
  }
  func.func @transform_9(%arg0: i32) -> (i32, i32) {
    %c0_i32 = arith.constant 0 : i32
    %c0_i32_0 = arith.constant 0 : i32
    %c0_i32_1 = arith.constant 0 : i32
    return %c0_i32, %c0_i32_0 : i32, i32
  }
  func.func @transform_10(%arg0: i32) -> (i32, i32) {
    %c0_i32 = arith.constant 0 : i32
    %c0_i32_0 = arith.constant 0 : i32
    %c0_i32_1 = arith.constant 0 : i32
    return %c0_i32, %c0_i32_0 : i32, i32
  }
  func.func @transform_11(%arg0: i32) -> (i32, i32, i32) {
    %c0_i32 = arith.constant 0 : i32
    %c0_i32_0 = arith.constant 0 : i32
    %c0_i32_1 = arith.constant 0 : i32
    return %arg0, %c0_i32, %c0_i32_0 : i32, i32, i32
  }
}

</mosaic_0001>

<bundles_post_ra>
// kernel: digit_classifier_forward.1
= control target key start
LH: loop header
LB: loop body
LE: loop exit
PB: predicated region body
PF: predicated region fallthrough
CT: control target
= control target key end

     0   :  { %s5692_s0 = inlined_call_operand.vmem [shape: f32[2,4,64,9], index: 0, kind: input, shape index: {}]   ;;  %s5693_s1 = inlined_call_operand.vmem [shape: f32[9,32], index: 1, kind: input, shape index: {}]   ;;  %s5694_s2 = inlined_call_operand.vmem [shape: f32[1,32], index: 2, kind: input, shape index: {}]   ;;  %s5695_s3 = inlined_call_operand.vmem [shape: f32[288,64], index: 3, kind: input, shape index: {}]   ;;  %s5696_s4 = inlined_call_operand.vmem [shape: f32[1,64], index: 4, kind: input, shape index: {}]   ;;  %s5697_s5 = inlined_call_operand.vmem [shape: f32[576,128], index: 5, kind: input, shape index: {}]   ;;  %s5698_s6 = inlined_call_operand.vmem [shape: f32[1,128], index: 6, kind: input, shape index: {}]   ;;  %s5699_s7 = inlined_call_operand.vmem [shape: f32[128,64], index: 7, kind: input, shape index: {}]   ;;  %s5700_s8 = inlined_call_operand.vmem [shape: f32[1,64], index: 8, kind: input, shape index: {}]   ;;  %s5701_s9 = inlined_call_operand.vmem [shape: f32[64,10], index: 9, kind: input, shape index: {}]   ;;  %s5702_s10 = inlined_call_operand.vmem [shape: f32[1,10], index: 10, kind: input, shape index: {}]   ;;  %s5703_s11 = inlined_call_operand.hbm [shape: f32[2,1,10], index: 11, kind: output, shape index: {}]  }
   0x1   :  { %5704 = sst [smem:[#allocation7_spill]] %s5692_s0 }
   0x2   :  { %16 = vsyncpa [#allocation5], 0 }
   0x3   :  { %18 = vsyncpa [#allocation5 + $0x1], 0  ;;  %s4429_s17 = smov 0   ;;  %s4431_s18 = smov 0  }
   0x4   :  { %s4433_s19 = smov 0   ;;  %s4435_s20 = smov 0  }
   0x5 LB: > { %s4450_s21 = sadd.s32 4294967295, %s4359_s20   ;;  %s2947_s22 = sadd.s32 4294967294, %s4359_s20   ;;  %s4359_s20 = sphi %s4435_s20, %s5713_s20   ;;  %s4355_s19 = sphi %s4433_s19, %s5712_s19   ;;  %s4351_s18 = sphi %s4431_s18, %s5711_s18   ;;  %s4347_s17 = sphi %s4429_s17, %s5710_s17  }
   0x6   : > { %s4454_s23 = sadd.s32 1, %s4359_s20   ;;  %s267_s24 = sadd.s32 1, %s4355_s19 }
   0x7   : > { %s264_s25 = ssub.s32 %s4359_s20, %s4454_s23  ;;  %p277_p0 = scmp.ne.s32.totalorder %s4355_s19, %s4351_s18 }
   0x8   : > { %p265_p1 = scmp.eq.s32.totalorder %s264_s25, 0  ;;  %p278_p2 = scmp.eq.s32.totalorder %s4450_s21, 1 }
   0x9   : > { %p283_p3 = scmp.ne.s32.totalorder %s4351_s18, %s4347_s17  ;;  %p284_p4 = scmp.eq.s32.totalorder %s2947_s22, 1 }
   0xa   : > { %s4465_s26 = scalar_select %p265_p1, %s4355_s19, %s267_s24  }
   0xb   : > { %p4467_p5 = por %p278_p2, %p277_p0  ;;  %p4471_p6 = por %p284_p4, %p283_p3 }
   0xc   : > { %p2950_p7 = scmp.ge.s32.totalorder %s4359_s20, 1  ;;  %p340_p8 = scmp.lt.s32.totalorder %s4359_s20, 3 }
   0xe   : > { %p341_p9 = pnand %p2950_p7, %p340_p8 }
   0xf   : > { %v392_v0 = vld [vmem:[%s5693_s1] sm:$0xff] (!%p341_p9)  ;;  %v393_v1 = vld [vmem:[%s5693_s1 + $0x8] sm:$0x1] (!%p341_p9)  ;;  %vm426_vm0 = vcmask (!%p341_p9), 1040384   ;;  %p379_p10 = scmp.lt.s32.totalorder (!%p341_p9), %s4450_s21, 1  ;;  %vm4361_vm1 = vmmov (!%p341_p9), 1  }
  0x10   : > { %344 = sbr.rel (%p341_p9) target bundleno = 1582 (0x62e), region = 64  ;;  %v3697_v2 = vpack.c.bf16 (!%p341_p9), %v393_v1, %v392_v0  ;;  %vm4485_vm2 = vmpackc.low (!%p341_p9), %vm426_vm0, %vm4361_vm1  ;;  %vm401_vm3 = vcmask (!%p341_p9), 72704   ;;  %s5709_s0 = sld [smem:[#allocation7_spill]] (!%p341_p9)  ;;  %vm1005_vm4 = vcmask (!%p341_p9), 261120   ;;  %vm1007_vm5 = vcmask (!%p341_p9), 254976   ;;  %v1328_v37 = vld [vmem:[%s5695_s3 + $0x100] sm:$0xff] (!%p341_p9) }
  0x11   : > { %v4362_v36 = vmov (!%p341_p9), 0.0   ;;  %v1329_v38 = vld [vmem:[%s5695_s3 + $0x108] sm:$0xff] (!%p341_p9)  ;;  %v1330_v40 = vld [vmem:[%s5695_s3 + $0x110] sm:$0xff] (!%p341_p9)  ;;  %v1331_v41 = vld [vmem:[%s5695_s3 + $0x118] sm:$0xff] (!%p341_p9)  ;;  %s4363_s22 = smov (!%p341_p9), 64   ;;  %s4365_s25 = smov (!%p341_p9), 32  }
  0x12   : > { %3699 = vmatprep.subr.msk.bf16.mxu0 (!%p341_p9), %vm4485_vm2, %v3697_v2  ;;  %3705 = vmatprep.subr.msk.bf16.mxu1 (!%p341_p9), %vm4485_vm2, %v3697_v2  ;;  %1011 = vst.msk [vmem:[#allocation2 + $0x20] sm:$0xff] (!%p341_p9), %vm1005_vm4, %v4362_v36  ;;  %1006 = vst.msk [vmem:[#allocation2] sm:$0xff] (!%p341_p9), %vm1005_vm4, %v4362_v36  ;;  %v3753_v39 = vpack.c.bf16 (!%p341_p9), %v1329_v38, %v1328_v37  ;;  %v3757_v42 = vpack.c.bf16 (!%p341_p9), %v1331_v41, %v1330_v40  ;;  %v1312_v43 = vld [vmem:[%s5695_s3 + $0x80] sm:$0xff] (!%p341_p9)  ;;  %v1313_v44 = vld [vmem:[%s5695_s3 + $0x88] sm:$0xff] (!%p341_p9)  ;;  %vm1077_vm6 = vcmask (!%p341_p9), 523264   ;;  %vm1079_vm7 = vcmask (!%p341_p9), 785408  }
  0x13   : > { %3702 = vmatpush3.bf16.msk.msra.mxu0 (!%p341_p9), %vm4485_vm2, %v3697_v2  ;;  %3708 = vmatpush3.bf16.msk.msra.mxu1 (!%p341_p9), %vm4485_vm2, %v3697_v2  ;;  %1012 = vst.msk [vmem:[#allocation2 + $0x28] sm:$0x3] (!%p341_p9), %vm1007_vm5, %v4362_v36  ;;  %1008 = vst.msk [vmem:[#allocation2 + $0x8] sm:$0x3] (!%p341_p9), %vm1007_vm5, %v4362_v36  ;;  %v1296_v45 = vld [vmem:[%s5695_s3] sm:$0xff] (!%p341_p9)  ;;  %v3721_v46 = vpack.c.bf16 (!%p341_p9), %v1313_v44, %v1312_v43  ;;  %v1297_v47 = vld [vmem:[%s5695_s3 + $0x8] sm:$0xff] (!%p341_p9) }
  0x14   : > { %3711 = vmatprep.subr.msk.bf16.mxu0 (!%p341_p9), %vm4485_vm2, %v3697_v2  ;;  %3717 = vmatprep.subr.msk.bf16.mxu1 (!%p341_p9), %vm4485_vm2, %v3697_v2  ;;  %1009 = vst.msk [vmem:[#allocation2 + $0x10] sm:$0xff] (!%p341_p9), %vm1005_vm4, %v4362_v36  ;;  %1013 = vst.msk [vmem:[#allocation2 + $0x30] sm:$0xff] (!%p341_p9), %vm1005_vm4, %v4362_v36  ;;  %v1314_v48 = vld [vmem:[%s5695_s3 + $0x90] sm:$0xff] (!%p341_p9)  ;;  %v1315_v49 = vld [vmem:[%s5695_s3 + $0x98] sm:$0xff] (!%p341_p9)  ;;  %v3723_v50 = vpack.c.bf16 (!%p341_p9), %v1297_v47, %v1296_v45  ;;  %vm1574_vm8 = vcmask (!%p341_p9), 521216   ;;  %vm1594_vm9 = vcmask (!%p341_p9), 1041408  }
  0x15   : > { %1010 = vst.msk [vmem:[#allocation2 + $0x18] sm:$0x3] (!%p341_p9), %vm1007_vm5, %v4362_v36  ;;  %1014 = vst.msk [vmem:[#allocation2 + $0x38] sm:$0x3] (!%p341_p9), %vm1007_vm5, %v4362_v36  ;;  %v3725_v51 = vpack.c.bf16 (!%p341_p9), %v1315_v49, %v1314_v48  ;;  %v1298_v52 = vld [vmem:[%s5695_s3 + $0x10] sm:$0xff] (!%p341_p9)  ;;  %v1299_v53 = vld [vmem:[%s5695_s3 + $0x18] sm:$0xff] (!%p341_p9) }
  0x16   : > { %1015 = vst.msk [vmem:[#allocation2 + $0x40] sm:$0xff] (!%p341_p9), %vm1005_vm4, %v4362_v36  ;;  %1017 = vst.msk [vmem:[#allocation2 + $0x50] sm:$0xff] (!%p341_p9), %vm1005_vm4, %v4362_v36  ;;  %v1316_v54 = vld [vmem:[%s5695_s3 + $0xa0] sm:$0xff] (!%p341_p9)  ;;  %v1317_v55 = vld [vmem:[%s5695_s3 + $0xa8] sm:$0xff] (!%p341_p9)  ;;  %v3727_v56 = vpack.c.bf16 (!%p341_p9), %v1299_v53, %v1298_v52  ;;  %vm1596_vm10 = vcmask (!%p341_p9), 1042432   ;;  %vm1599_vm11 = vcmask (!%p341_p9), 519168  }
  0x17   : > { %s380_s14 = scalar_select %p379_p10, %s4450_s21, 1  ;;  %1016 = vst.msk [vmem:[#allocation2 + $0x48] sm:$0x3] %vm1007_vm5, %v4362_v36  ;;  %1018 = vst.msk [vmem:[#allocation2 + $0x58] sm:$0x3] %vm1007_vm5, %v4362_v36  ;;  %v3729_v57 = vpack.c.bf16 %v1317_v55, %v1316_v54  ;;  %v1300_v58 = vld [vmem:[%s5695_s3 + $0x20] sm:$0xff] }
  0x18   : > { %1019 = vst.msk [vmem:[#allocation2 + $0x60] sm:$0xff] %vm1005_vm4, %v4362_v36  ;;  %1021 = vst.msk [vmem:[#allocation2 + $0x70] sm:$0xff] %vm1005_vm4, %v4362_v36  ;;  %v1301_v59 = vld [vmem:[%s5695_s3 + $0x28] sm:$0xff]  ;;  %v1318_v60 = vld [vmem:[%s5695_s3 + $0xb0] sm:$0xff]  ;;  %vm4367_vm12 = vmmov 0   ;;  %vm1974_vm13 = vcmask 1043456  }
  0x19   : > { %s3032_s15 = sshll.u32 %s380_s14, 8  ;;  %1020 = vst.msk [vmem:[#allocation2 + $0x68] sm:$0x3] %vm1007_vm5, %v4362_v36  ;;  %1022 = vst.msk [vmem:[#allocation2 + $0x78] sm:$0x3] %vm1007_vm5, %v4362_v36  ;;  %v1319_v61 = vld [vmem:[%s5695_s3 + $0xb8] sm:$0xff]  ;;  %v3731_v62 = vpack.c.bf16 %v1301_v59, %v1300_v58 }
  0x1a   : > { %s4501_s24 = scalar_lea.vmem %s5709_s0, %s3032_s15  ;;  %1023 = vst.msk [vmem:[#allocation2 + $0x80] sm:$0xff] %vm1005_vm4, %v4362_v36  ;;  %1025 = vst.msk [vmem:[#allocation2 + $0x90] sm:$0xff] %vm1005_vm4, %v4362_v36  ;;  %v3733_v63 = vpack.c.bf16 %v1319_v61, %v1318_v60  ;;  %v1302_v0 = vld [vmem:[%s5695_s3 + $0x30] sm:$0xff]  ;;  %v1303_v1 = vld [vmem:[%s5695_s3 + $0x38] sm:$0xff]  ;;  %s377_s12 = sand.u32 1, %s4351_s18   ;;  %vm2877_vm14 = vcmask 73728  }
  0x1b   : > { %v384_v4 = vld [vmem:[%s4501_s24] sm:$0xff]  ;;  %v385_v6 = vld [vmem:[%s4501_s24 + $0x8] sm:$0xff]  ;;  %v386_v8 = vld [vmem:[%s4501_s24 + $0x10] sm:$0xff]  ;;  %1024 = vst.msk [vmem:[#allocation2 + $0x88] sm:$0x3] %vm1007_vm5, %v4362_v36  ;;  %s3029_s14 = sshll.u32 %s4450_s21, 4 }
  0x1c   : > { %v2963_v5 = vld [vmem:[%s4501_s24 + $0x40] sm:$0xff]  ;;  %3487 = vmatprep.mubr.msk.f32.mxu0 %vm401_vm3, %v384_v4  ;;  %v2964_v7 = vld [vmem:[%s4501_s24 + $0x48] sm:$0xff]  ;;  %v2965_v9 = vld [vmem:[%s4501_s24 + $0x50] sm:$0xff]  ;;  %1026 = vst.msk [vmem:[#allocation2 + $0x98] sm:$0x3] %vm1007_vm5, %v4362_v36  ;;  %v3735_v4 = vpack.c.bf16 %v1303_v1, %v1302_v0  ;;  %s378_s15 = scalar_lea.vmem [#allocation4], %s377_s12 }
  0x1d   : > { %3503 = vmatprep.mubr.msk.f32.mxu1 %vm401_vm3, %v2963_v5  ;;  %3488 = vmatmul.mubr.msk.f32.vlgmr.msra.gmra.mrb[0].mxu0 %vm401_vm3, %v385_v6  ;;  %v387_v10 = vld [vmem:[%s4501_s24 + $0x18] sm:$0xff]  ;;  %v388_v12 = vld [vmem:[%s4501_s24 + $0x20] sm:$0xff]  ;;  %v389_v14 = vld [vmem:[%s4501_s24 + $0x28] sm:$0xff]  ;;  %1576 = vst.msk [vmem:[#allocation3 + $0x8] sm:$0x3f] %vm1574_vm8, %v4362_v36  ;;  %s2892_s0 = sshll.u32 %s378_s15, 4  ;;  %s5652_s0 = int_to_ptr.vmem [resolvable:$true] %s2892_s0 }
  0x1e   : > { %3504 = vmatmul.mubr.msk.f32.vlgmr.msra.gmra.mrb[0].mxu1 %vm401_vm3, %v2964_v7  ;;  %3714 = vmatpush3.bf16.msk.msra.mxu0 %vm4485_vm2, %v3697_v2  ;;  %v2966_v11 = vld [vmem:[%s4501_s24 + $0x58] sm:$0xff]  ;;  %v2967_v13 = vld [vmem:[%s4501_s24 + $0x60] sm:$0xff]  ;;  %v2968_v15 = vld [vmem:[%s4501_s24 + $0x68] sm:$0xff]  ;;  %1575 = vst.msk [vmem:[#allocation3] sm:$0x3f] %vm1574_vm8, %v4362_v36  ;;  %s2880_s29 = scalar_lea.sflag [#allocation5], %s377_s12 }
  0x1f   : > { %3720 = vmatpush3.bf16.msk.msra.mxu1 %vm4485_vm2, %v3697_v2  ;;  %3490 = vmatprep.mubr.msk.f32.mxu0 %vm401_vm3, %v386_v8  ;;  %v390_v16 = vld [vmem:[%s4501_s24 + $0x30] sm:$0xff]  ;;  %v391_v18 = vld [vmem:[%s4501_s24 + $0x38] sm:$0xff]  ;;  %v2980_v20 = vld [vmem:[%s4501_s24 + $0x80] sm:$0xff]  ;;  %1577 = vst.msk [vmem:[#allocation3 + $0x10] sm:$0x3f] %vm1574_vm8, %v4362_v36  ;;  %s4297_s30 = scalar_lea.vmem %s5652_s0, 16 }
  0x20   : > { %3506 = vmatprep.mubr.msk.f32.mxu1 %vm401_vm3, %v2965_v9  ;;  %v2969_v17 = vld [vmem:[%s4501_s24 + $0x70] sm:$0xff]  ;;  %v2970_v19 = vld [vmem:[%s4501_s24 + $0x78] sm:$0xff]  ;;  %v2997_v21 = vld [vmem:[%s4501_s24 + $0xc0] sm:$0xff]  ;;  %3754 = vmatprep.subr.bf16.mxu1 %v3753_v39  ;;  %1578 = vst.msk [vmem:[#allocation3 + $0x18] sm:$0x3f] %vm1574_vm8, %v4362_v36  ;;  %p4298_p11 = scmp.ne.s32.totalorder %s5652_s0, %s4297_s30  ;;  %s4368_s21 = smov [#allocation4]  }
  0x21   : > { %3491 = vmatmul.mubr.msk.f32.gmra.mrb[2].mxu0 %vm401_vm3, %v387_v10  ;;  %v2981_v22 = vld [vmem:[%s4501_s24 + $0x88] sm:$0xff]  ;;  %v2982_v24 = vld [vmem:[%s4501_s24 + $0x90] sm:$0xff]  ;;  %v2983_v26 = vld [vmem:[%s4501_s24 + $0x98] sm:$0xff]  ;;  %3722 = vmatprep.subr.bf16.mxu0 %v3721_v46  ;;  %1579 = vst.msk [vmem:[#allocation3 + $0x20] sm:$0x3f] %vm1574_vm8, %v4362_v36  ;;  %s4301_s13 = sshll.u32 %s4368_s21, 4  ;;  %s4302_s13 = int_to_ptr.vmem [resolvable:$false] %s4301_s13 }
  0x22   : > { %3507 = vmatmul.mubr.msk.f32.gmra.mrb[2].mxu1 %vm401_vm3, %v2966_v11  ;;  %3493 = vmatprep.mubr.msk.f32.mxu0 %vm401_vm3, %v388_v12  ;;  %v2998_v23 = vld [vmem:[%s4501_s24 + $0xc8] sm:$0xff]  ;;  %v2999_v25 = vld [vmem:[%s4501_s24 + $0xd0] sm:$0xff]  ;;  %v3000_v27 = vld [vmem:[%s4501_s24 + $0xd8] sm:$0xff]  ;;  %1580 = vst.msk [vmem:[#allocation3 + $0x28] sm:$0x3f] %vm1574_vm8, %v4362_v36  ;;  %p4299_p12 = pnand %p4298_p11, %p4467_p5  ;;  %p4304_p0 = scmp.lt.s32.totalorder %s5652_s0, %s4302_s13 }
  0x23   : > { %3509 = vmatprep.mubr.msk.f32.mxu1 %vm401_vm3, %v2967_v13  ;;  %v2984_v28 = vld [vmem:[%s4501_s24 + $0xa0] sm:$0xff]  ;;  %v2985_v30 = vld [vmem:[%s4501_s24 + $0xa8] sm:$0xff]  ;;  %v2986_v32 = vld [vmem:[%s4501_s24 + $0xb0] sm:$0xff] }
  0x24   : > { %v3001_v29 = vld [vmem:[%s4501_s24 + $0xe0] sm:$0xff]  ;;  %v3002_v31 = vld [vmem:[%s4501_s24 + $0xe8] sm:$0xff]  ;;  %v3003_v33 = vld [vmem:[%s4501_s24 + $0xf0] sm:$0xff]  ;;  %p4300_p13 = pneg %p4299_p12 }
  0x25   : > { %3494 = vmatmul.mubr.msk.f32.gmra.mrb[4].mxu0 %vm401_vm3, %v389_v14  ;;  %v2987_v34 = vld [vmem:[%s4501_s24 + $0xb8] sm:$0xff]  ;;  %v1320_v2 = vld [vmem:[%s5695_s3 + $0xc0] sm:$0xff]  ;;  %v1321_v3 = vld [vmem:[%s5695_s3 + $0xc8] sm:$0xff] }
  0x26   : > { %3510 = vmatmul.mubr.msk.f32.gmra.mrb[4].mxu1 %vm401_vm3, %v2968_v15  ;;  %3496 = vmatprep.mubr.msk.f32.mxu0 %vm401_vm3, %v390_v16  ;;  %v3004_v35 = vld [vmem:[%s4501_s24 + $0xf8] sm:$0xff]  ;;  %v3737_v5 = vpack.c.bf16 %v1321_v3, %v1320_v2  ;;  %v1304_v6 = vld [vmem:[%s5695_s3 + $0x40] sm:$0xff]  ;;  %v1305_v7 = vld [vmem:[%s5695_s3 + $0x48] sm:$0xff]  ;;  %s4364_s24 = smov 96  }
  0x27   : > { %3512 = vmatprep.mubr.msk.f32.mxu1 %vm401_vm3, %v2969_v17  ;;  %v1322_v8 = vld [vmem:[%s5695_s3 + $0xd0] sm:$0xff]  ;;  %v1323_v9 = vld [vmem:[%s5695_s3 + $0xd8] sm:$0xff]  ;;  %v3739_v10 = vpack.c.bf16 %v1305_v7, %v1304_v6  ;;  %v4702_v15 = vld [vmem:[%s5694_s2] ss:$0 sm:$0xff] }
  0x28   : > { %v3741_v11 = vpack.c.bf16 %v1323_v9, %v1322_v8  ;;  %v1306_v12 = vld [vmem:[%s5695_s3 + $0x50] sm:$0xff]  ;;  %v1307_v13 = vld [vmem:[%s5695_s3 + $0x58] sm:$0xff] }
  0x29   : > { %3497 = vmatmul.mubr.msk.f32.gmra.mrb[6].mxu0 %vm401_vm3, %v391_v18  ;;  %v3743_v14 = vpack.c.bf16 %v1307_v13, %v1306_v12 }
  0x2a   : > { %3513 = vmatmul.mubr.msk.f32.gmra.mrb[6].mxu1 %vm401_vm3, %v2970_v19  ;;  %3519 = vmatprep.mubr.msk.f32.mxu0 %vm401_vm3, %v2980_v20 }
  0x2b   : > { %3535 = vmatprep.mubr.msk.f32.mxu1 %vm401_vm3, %v2997_v21 }
  0x2d   : > { %3520 = vmatmul.mubr.msk.f32.vlgmr.msra.gmra.mrb[8].mxu0 %vm401_vm3, %v2981_v22 }
  0x2e   : > { %3536 = vmatmul.mubr.msk.f32.vlgmr.msra.gmra.mrb[8].mxu1 %vm401_vm3, %v2998_v23  ;;  %3522 = vmatprep.mubr.msk.f32.mxu0 %vm401_vm3, %v2982_v24 }
  0x2f   : > { %3538 = vmatprep.mubr.msk.f32.mxu1 %vm401_vm3, %v2999_v25  ;;  %3756 = vmatpush3.bf16.msra.mxu1 %v3753_v39 }
  0x30   : > { %3758 = vmatprep.subr.bf16.mxu1 %v3757_v42  ;;  %3724 = vmatpush3.bf16.msra.mxu0 %v3723_v50 }
  0x31   : > { %3523 = vmatmul.mubr.msk.f32.gmra.mrb[10].mxu0 %vm401_vm3, %v2983_v26  ;;  %3726 = vmatprep.subr.bf16.mxu0 %v3725_v51 }
  0x32   : > { %3539 = vmatmul.mubr.msk.f32.gmra.mrb[10].mxu1 %vm401_vm3, %v3000_v27  ;;  %3525 = vmatprep.mubr.msk.f32.mxu0 %vm401_vm3, %v2984_v28 }
  0x33   : > { %3541 = vmatprep.mubr.msk.f32.mxu1 %vm401_vm3, %v3001_v29  ;;  %3760 = vmatpush3.bf16.msra.mxu1 %v3757_v42 }
  0x34   : > { %3728 = vmatpush3.bf16.msra.mxu0 %v3727_v56 }
  0x35   : > { %3526 = vmatmul.mubr.msk.f32.gmra.mrb[12].mxu0 %vm401_vm3, %v2985_v30  ;;  %3730 = vmatprep.subr.bf16.mxu0 %v3729_v57 }
  0x36   : > { %3542 = vmatmul.mubr.msk.f32.gmra.mrb[12].mxu1 %vm401_vm3, %v3002_v31  ;;  %3528 = vmatprep.mubr.msk.f32.mxu0 %vm401_vm3, %v2986_v32 }
  0x37   : > { %3544 = vmatprep.mubr.msk.f32.mxu1 %vm401_vm3, %v3003_v33 }
  0x38   : > { %3732 = vmatpush3.bf16.msra.mxu0 %v3731_v62 }
  0x39   : > { %3529 = vmatmul.mubr.msk.f32.gmra.mrb[14].mxu0 %vm401_vm3, %v2987_v34  ;;  %3734 = vmatprep.subr.bf16.mxu0 %v3733_v63 }
  0x3a   : > { %3545 = vmatmul.mubr.msk.f32.gmra.mrb[14].mxu1 %vm401_vm3, %v3004_v35 }
  0x3c   : > { %3736 = vmatpush3.bf16.msra.mxu0 %v3735_v4 }
  0x3d   : > { %3738 = vmatprep.subr.bf16.mxu0 %v3737_v5 }
  0x40   : > { %3740 = vmatpush3.bf16.msra.mxu0 %v3739_v10 }
  0x41   : > { %3742 = vmatprep.subr.bf16.mxu0 %v3741_v11 }
  0x44   : > { %3744 = vmatpush3.bf16.msra.mxu0 %v3743_v14 }
  0xf0   : > { %v3489_v16 = vpop.f32.mrb[0].mxu0 }
  0xf1   : > { %v3505_v17 = vpop.f32.mrb[0].mxu1  ;;  %v502_v18 = vadd.f32 %v3489_v16, %v4702_v15  ;;  %v496_v20 = vpop.f32.mrb[1].mxu0 }
  0xf2   : > { %v648_v19 = vadd.f32 %v3505_v17, %v4702_v15  ;;  %v642_v21 = vpop.f32.mrb[1].mxu1  ;;  %v497_v22 = vadd.f32 %v4702_v15, %v496_v20 }
  0xf3   : > { %v643_v23 = vadd.f32 %v4702_v15, %v642_v21  ;;  %v536_v24 = vmax.f32 %v502_v18, 0.0 }
  0xf4   : > { %v682_v25 = vmax.f32 %v648_v19, 0.0  ;;  %v535_v26 = vmax.f32 %v497_v22, 0.0  ;;  %v3492_v28 = vpop.f32.mrb[2].mxu0 }
  0xf5   : > { %v681_v27 = vmax.f32 %v643_v23, 0.0  ;;  %v3508_v29 = vpop.f32.mrb[2].mxu1  ;;  %v512_v31 = vadd.f32 %v3492_v28, %v4702_v15  ;;  %v506_v33 = vpop.f32.mrb[3].mxu0 }
  0xf6   : > { %v690_v30 = vmax.f32 %v536_v24, %v682_v25  ;;  %v658_v32 = vadd.f32 %v3508_v29, %v4702_v15  ;;  %v652_v34 = vpop.f32.mrb[3].mxu1  ;;  %v507_v37 = vadd.f32 %v4702_v15, %v506_v33  ;;  %v1324_v33 = vld [vmem:[%s5695_s3 + $0xe0] sm:$0xff] }
  0xf7   : > { %v689_v35 = vmax.f32 %v535_v26, %v681_v27  ;;  %v653_v38 = vadd.f32 %v4702_v15, %v652_v34  ;;  %v538_v39 = vmax.f32 %v512_v31, 0.0  ;;  %v1325_v34 = vld [vmem:[%s5695_s3 + $0xe8] sm:$0xff] }
  0xf8   : > { %v684_v40 = vmax.f32 %v658_v32, 0.0  ;;  %v537_v41 = vmax.f32 %v507_v37, 0.0  ;;  %v3495_v43 = vpop.f32.mrb[4].mxu0 }
  0xf9   : > { %v683_v42 = vmax.f32 %v653_v38, 0.0  ;;  %v3511_v44 = vpop.f32.mrb[4].mxu1  ;;  %v522_v46 = vadd.f32 %v3495_v43, %v4702_v15  ;;  %v516_v48 = vpop.f32.mrb[5].mxu0 }
  0xfa   : > { %v4712_v45 = vmax.f32 %v538_v39, %v684_v40  ;;  %v668_v47 = vadd.f32 %v3511_v44, %v4702_v15  ;;  %v662_v49 = vpop.f32.mrb[5].mxu1  ;;  %v517_v51 = vadd.f32 %v4702_v15, %v516_v48  ;;  %v3745_v39 = vpack.c.bf16 %v1325_v34, %v1324_v33  ;;  %v1309_v40 = vld [vmem:[%s5695_s3 + $0x68] sm:$0xff] }
  0xfb   : > { %v4716_v50 = vmax.f32 %v537_v41, %v683_v42  ;;  %v663_v52 = vadd.f32 %v4702_v15, %v662_v49  ;;  %v540_v53 = vmax.f32 %v522_v46, 0.0 }
  0xfc   : > { %v686_v54 = vmax.f32 %v668_v47, 0.0  ;;  %v539_v55 = vmax.f32 %v517_v51, 0.0  ;;  %v3498_v57 = vpop.f32.mrb[6].mxu0  ;;  %3746 = vmatprep.subr.bf16.mxu0 %v3745_v39 }
  0xfd   : > { %v685_v56 = vmax.f32 %v663_v52, 0.0  ;;  %v3514_v58 = vpop.f32.mrb[6].mxu1  ;;  %v532_v60 = vadd.f32 %v3498_v57, %v4702_v15  ;;  %v526_v62 = vpop.f32.mrb[7].mxu0  ;;  %v1327_v57 = vld [vmem:[%s5695_s3 + $0xf8] sm:$0xff] }
  0xfe   : > { %v4720_v59 = vmax.f32 %v540_v53, %v686_v54  ;;  %v678_v61 = vadd.f32 %v3514_v58, %v4702_v15  ;;  %v672_v63 = vpop.f32.mrb[7].mxu1  ;;  %v527_v1 = vadd.f32 %v4702_v15, %v526_v62 }
  0xff   : > { %v4724_v0 = vmax.f32 %v539_v55, %v685_v56  ;;  %v673_v2 = vadd.f32 %v4702_v15, %v672_v63  ;;  %v542_v3 = vmax.f32 %v532_v60, 0.0  ;;  %v1311_v63 = vld [vmem:[%s5695_s3 + $0x78] sm:$0xff] }
 0x100   : > { %v688_v4 = vmax.f32 %v678_v61, 0.0  ;;  %v541_v5 = vmax.f32 %v527_v1, 0.0  ;;  %v3521_v7 = vpop.f32.mrb[8].mxu0 }
 0x101   : > { %v687_v6 = vmax.f32 %v673_v2, 0.0  ;;  %v3537_v8 = vpop.f32.mrb[8].mxu1  ;;  %v802_v10 = vadd.f32 %v3521_v7, %v4702_v15  ;;  %v796_v11 = vpop.f32.mrb[9].mxu0 }
 0x102   : > { %v4728_v9 = vmax.f32 %v542_v3, %v688_v4  ;;  %v956_v12 = vadd.f32 %v3537_v8, %v4702_v15  ;;  %v950_v13 = vpop.f32.mrb[9].mxu1  ;;  %v797_v16 = vadd.f32 %v4702_v15, %v796_v11 }
 0x103   : > { %v4732_v14 = vmax.f32 %v541_v5, %v687_v6  ;;  %v951_v17 = vadd.f32 %v4702_v15, %v950_v13  ;;  %v836_v18 = vmax.f32 %v802_v10, 0.0 }
 0x104   : > { %v990_v19 = vmax.f32 %v956_v12, 0.0  ;;  %v835_v20 = vmax.f32 %v797_v16, 0.0  ;;  %v3524_v22 = vpop.f32.mrb[10].mxu0 }
 0x105   : > { %v989_v21 = vmax.f32 %v951_v17, 0.0  ;;  %v3540_v23 = vpop.f32.mrb[10].mxu1  ;;  %v844_v24 = vmax.f32 %v690_v30, %v836_v18  ;;  %v812_v25 = vadd.f32 %v3524_v22, %v4702_v15  ;;  %v806_v26 = vpop.f32.mrb[11].mxu0  ;;  %v1045_v18 = vld [vmem:[#allocation2 + $0x2] sm:$0xff] }
 0x106   : > { %v966_v27 = vadd.f32 %v3540_v23, %v4702_v15  ;;  %v960_v28 = vpop.f32.mrb[11].mxu1  ;;  %v843_v29 = vmax.f32 %v689_v35, %v835_v20  ;;  %v807_v31 = vadd.f32 %v4702_v15, %v806_v26  ;;  %v1308_v35 = vld [vmem:[%s5695_s3 + $0x60] sm:$0xff] }
 0x107   : > { %v961_v32 = vadd.f32 %v4702_v15, %v960_v28  ;;  %v998_v30 = vmax.f32 %v844_v24, %v990_v19  ;;  %v838_v37 = vmax.f32 %v812_v25, 0.0  ;;  %v3747_v47 = vpack.c.bf16 %v1309_v40, %v1308_v35 }
 0x108   : > { %v992_v38 = vmax.f32 %v966_v27, 0.0  ;;  %v997_v41 = vmax.f32 %v843_v29, %v989_v21  ;;  %v837_v42 = vmax.f32 %v807_v31, 0.0  ;;  %v3527_v44 = vpop.f32.mrb[12].mxu0  ;;  %v1044_v31 = vld [vmem:[#allocation2 + $0x1] sm:$0xff] }
 0x109   : > { %v991_v43 = vmax.f32 %v961_v32, 0.0  ;;  %v3543_v46 = vpop.f32.mrb[12].mxu1  ;;  %1030 = vst.msk [vmem:[#allocation2 + $0x21] sm:$0xff] %vm1005_vm4, %v998_v30  ;;  %v846_v48 = vmax.f32 %v4712_v45, %v838_v37  ;;  %v822_v49 = vadd.f32 %v3527_v44, %v4702_v15  ;;  %v816_v51 = vpop.f32.mrb[13].mxu0  ;;  %3748 = vmatpush3.bf16.msra.mxu0 %v3747_v47  ;;  %v1326_v45 = vld [vmem:[%s5695_s3 + $0xf0] sm:$0xff] }
 0x10a   : > { %v976_v52 = vadd.f32 %v3543_v46, %v4702_v15  ;;  %v970_v53 = vpop.f32.mrb[13].mxu1  ;;  %1028 = vst.msk [vmem:[#allocation2 + $0x11] sm:$0xff] %vm1005_vm4, %v997_v41  ;;  %v845_v54 = vmax.f32 %v4716_v50, %v837_v42  ;;  %v817_v55 = vadd.f32 %v4702_v15, %v816_v51  ;;  %v3749_v62 = vpack.c.bf16 %v1327_v57, %v1326_v45  ;;  %v1310_v50 = vld [vmem:[%s5695_s3 + $0x70] sm:$0xff] }
 0x10b   : > { %v971_v56 = vadd.f32 %v4702_v15, %v970_v53  ;;  %v1000_v58 = vmax.f32 %v846_v48, %v992_v38  ;;  %v840_v60 = vmax.f32 %v822_v49, 0.0  ;;  %v3751_v6 = vpack.c.bf16 %v1311_v63, %v1310_v50 }
 0x10c   : > { %v994_v61 = vmax.f32 %v976_v52, 0.0  ;;  %v999_v1 = vmax.f32 %v845_v54, %v991_v43  ;;  %v839_v2 = vmax.f32 %v817_v55, 0.0  ;;  %v3530_v4 = vpop.f32.mrb[14].mxu0  ;;  %3750 = vmatprep.subr.bf16.mxu0 %v3749_v62 }
 0x10d   : > { %v993_v3 = vmax.f32 %v971_v56, 0.0  ;;  %v3546_v5 = vpop.f32.mrb[14].mxu1  ;;  %1034 = vst.msk [vmem:[#allocation2 + $0x41] sm:$0xff] %vm1005_vm4, %v1000_v58  ;;  %v848_v7 = vmax.f32 %v4720_v59, %v840_v60  ;;  %v832_v8 = vadd.f32 %v3530_v4, %v4702_v15  ;;  %v826_v10 = vpop.f32.mrb[15].mxu0  ;;  %3752 = vmatpush3.bf16.msra.mxu0 %v3751_v6 }
 0x10e   : > { %v986_v11 = vadd.f32 %v3546_v5, %v4702_v15  ;;  %v980_v12 = vpop.f32.mrb[15].mxu1  ;;  %1032 = vst.msk [vmem:[#allocation2 + $0x31] sm:$0xff] %vm1005_vm4, %v999_v1  ;;  %v847_v13 = vmax.f32 %v4724_v0, %v839_v2  ;;  %v827_v16 = vadd.f32 %v4702_v15, %v826_v10 }
 0x10f   : > { %v981_v17 = vadd.f32 %v4702_v15, %v980_v12  ;;  %v1002_v19 = vmax.f32 %v848_v7, %v994_v61  ;;  %v842_v20 = vmax.f32 %v832_v8, 0.0  ;;  %v1268_v8 = vld [vmem:[#allocation2 + $0x92] sm:$0xff] }
 0x110   : > { %v996_v59 = vmax.f32 %v986_v11, 0.0  ;;  %v1001_v21 = vmax.f32 %v847_v13, %v993_v3  ;;  %v841_v22 = vmax.f32 %v827_v16, 0.0  ;;  %v1051_v24 = vld [vmem:[#allocation2 + $0x22] sm:$0xff]  ;;  %v1266_v12 = vld [vmem:[#allocation2 + $0x90] sm:$0xff] }
 0x111   : > { %v995_v23 = vmax.f32 %v981_v17, 0.0  ;;  %v4780_v25 = vld [vmem:[#allocation2 + $0x20] sm:$0xff]  ;;  %1038 = vst.msk [vmem:[#allocation2 + $0x61] sm:$0xff] %vm1005_vm4, %v1002_v19  ;;  %v850_v0 = vmax.f32 %v4728_v9, %v842_v20  ;;  %3555 = vmatprep.mubr.msk.f32.mxu1 %vm1005_vm4, %v1051_v24  ;;  %v4788_v27 = vld [vmem:[#allocation2 + $0x10] sm:$0xff] }
 0x112   : > { %v4782_v26 = vld [vmem:[#allocation2 + $0x21] sm:$0xff]  ;;  %v4147_v15 = vpack.i.bf16 %v1045_v18, %v4780_v25  ;;  %1036 = vst.msk [vmem:[#allocation2 + $0x51] sm:$0xff] %vm1005_vm4, %v1001_v21  ;;  %v849_v28 = vmax.f32 %v4732_v14, %v841_v22  ;;  %v1048_v32 = vld [vmem:[#allocation2 + $0x12] sm:$0xff] }
 0x113   : > { %v4157_v29 = vpack.i.bf16 %v4788_v27, %v4782_v26  ;;  %v1004_v33 = vmax.f32 %v850_v0, %v996_v59  ;;  %v4795_v9 = vld [vmem:[#allocation2 + $0x11] sm:$0xff]  ;;  %v4152_v37 = vpack.i.bf16 %v1044_v31, %v1048_v32  ;;  %v1043_v20 = vld [vmem:[#allocation2] sm:$0xff] }
 0x114   : > { %4148 = vrot.lane.b32.xlu0 %v4147_v15, %s4363_s22  ;;  %v1003_v34 = vmax.f32 %v849_v28, %v995_v23  ;;  %v1117_v14 = vld [vmem:[#allocation2 + $0x42] sm:$0xff]  ;;  %v4162_v38 = vpack.i.bf16 %v4795_v9, %v1051_v24  ;;  %v1267_v13 = vld [vmem:[#allocation2 + $0x91] sm:$0xff] }
 0x115   : > { %4158 = vrot.lane.b32.xlu1 %v4157_v29, %s4364_s24  ;;  %1042 = vst.msk [vmem:[#allocation2 + $0x81] sm:$0xff] %vm1005_vm4, %v1004_v33  ;;  %v1086_v30 = vld [vmem:[#allocation2 + $0x32] sm:$0xff]  ;;  %v4806_v35 = vld [vmem:[#allocation2 + $0x40] sm:$0xff] }
 0x116   : > { %1040 = vst.msk [vmem:[#allocation2 + $0x71] sm:$0xff] %vm1005_vm4, %v1003_v34  ;;  %3556 = vmatmul.mubr.msk.f32.vlgmr.msra.gmra.mrb[16].mxu1 %vm1005_vm4, %v1086_v30  ;;  %v4802_v39 = vld [vmem:[#allocation2 + $0x30] sm:$0xff]  ;;  %v4167_v43 = vpack.i.bf16 %v1051_v24, %v4806_v35  ;;  %v4182_v47 = vpack.i.bf16 %v4782_v26, %v1086_v30  ;;  %v4821_v51 = vld [vmem:[#allocation2 + $0x41] sm:$0xff] }
 0x117   : > { %3558 = vmatprep.mubr.msk.f32.mxu1 %vm1005_vm4, %v1117_v14  ;;  %v4172_v41 = vpack.i.bf16 %v1048_v32, %v4802_v39  ;;  %v4814_v44 = vld [vmem:[#allocation2 + $0x31] sm:$0xff]  ;;  %v4187_v52 = vpack.i.bf16 %v4802_v39, %v4821_v51 }
 0x118   : > { %4153 = vrot.lane.b32.xlu0 %v4152_v37, %s4365_s25  ;;  %v1177_v42 = vld [vmem:[#allocation2 + $0x62] sm:$0xff]  ;;  %v4177_v49 = vpack.i.bf16 %v4780_v25, %v4814_v44  ;;  %v4192_v53 = vpack.i.bf16 %v4814_v44, %v1117_v14 }
 0x119   : > { %4163 = vrot.lane.b32.xlu1 %v4162_v38, %s4365_s25  ;;  %v1147_v40 = vld [vmem:[#allocation2 + $0x52] sm:$0xff]  ;;  %v4839_v57 = vld [vmem:[#allocation2 + $0x60] sm:$0xff] }
 0x11a   : > { %3559 = vmatmul.mubr.msk.f32.gmra.mrb[18].mxu1 %vm1005_vm4, %v1147_v40  ;;  %v4829_v54 = vld [vmem:[#allocation2 + $0x50] sm:$0xff]  ;;  %v4212_v58 = vpack.i.bf16 %v4821_v51, %v1147_v40  ;;  %v4207_v60 = vpack.i.bf16 %v1117_v14, %v4839_v57  ;;  %v4844_v61 = vld [vmem:[#allocation2 + $0x61] sm:$0xff] }
 0x11b   : > { %3561 = vmatprep.mubr.msk.f32.mxu1 %vm1005_vm4, %v1177_v42  ;;  %v4832_v55 = vld [vmem:[#allocation2 + $0x51] sm:$0xff]  ;;  %v4197_v56 = vpack.i.bf16 %v1086_v30, %v4829_v54  ;;  %v4217_v62 = vpack.i.bf16 %v4829_v54, %v4844_v61 }
 0x11c   : > { %4173 = vrot.lane.b32.xlu0 %v4172_v41, %s4363_s22  ;;  %v1237_v48 = vld [vmem:[#allocation2 + $0x82] sm:$0xff]  ;;  %v4202_v45 = vpack.i.bf16 %v4806_v35, %v4832_v55  ;;  %v4222_v50 = vpack.i.bf16 %v4832_v55, %v1177_v42 }
 0x11d   : > { %4168 = vrot.lane.b32.xlu1 %v4167_v43, %s4363_s22  ;;  %v1207_v46 = vld [vmem:[#allocation2 + $0x72] sm:$0xff]  ;;  %v1235_v4 = vld [vmem:[#allocation2 + $0x80] sm:$0xff] }
 0x11e   : > { %3562 = vmatmul.mubr.msk.f32.gmra.mrb[20].mxu1 %vm1005_vm4, %v1207_v46  ;;  %v4851_v63 = vld [vmem:[#allocation2 + $0x70] sm:$0xff]  ;;  %v4242_v5 = vpack.i.bf16 %v4844_v61, %v1207_v46  ;;  %v4237_v6 = vpack.i.bf16 %v1177_v42, %v1235_v4  ;;  %v4863_v7 = vld [vmem:[#allocation2 + $0x81] sm:$0xff]  ;;  %v4257_v16 = vpack.i.bf16 %v1207_v46, %v1266_v12  ;;  %v4262_v17 = vpack.i.bf16 %v1235_v4, %v1267_v13 }
 0x11f   : > { %3564 = vmatprep.mubr.msk.f32.mxu1 %vm1005_vm4, %v1237_v48  ;;  %v4854_v1 = vld [vmem:[#allocation2 + $0x71] sm:$0xff]  ;;  %v4227_v2 = vpack.i.bf16 %v1147_v40, %v4851_v63  ;;  %v4247_v10 = vpack.i.bf16 %v4851_v63, %v4863_v7 }
 0x120   : > { %4183 = vrot.lane.b32.xlu0 %v4182_v47, %s4365_s25  ;;  %v4232_v3 = vpack.i.bf16 %v4839_v57, %v4854_v1  ;;  %v4252_v11 = vpack.i.bf16 %v4854_v1, %v1237_v48 }
 0x121   : > { %4178 = vrot.lane.b32.xlu1 %v4177_v49, %s4364_s24 }
 0x122   : > { %3565 = vmatmul.mubr.msk.f32.gmra.mrb[22].mxu1 %vm1005_vm4, %v1268_v8 }
 0x124   : > { %4188 = vrot.lane.b32.xlu0 %v4187_v52, %s4364_s24 }
 0x125   : > { %4193 = vrot.lane.b32.xlu1 %v4192_v53, %s4365_s25 }
 0x128   : > { %4198 = vrot.lane.b32.xlu0 %v4197_v56, %s4363_s22 }
 0x129   : > { %4203 = vrot.lane.b32.xlu1 %v4202_v45, %s4364_s24 }
 0x12c   : > { %4213 = vrot.lane.b32.xlu0 %v4212_v58, %s4365_s25 }
 0x12d   : > { %4208 = vrot.lane.b32.xlu1 %v4207_v60, %s4363_s22 }
 0x130   : > { %4218 = vrot.lane.b32.xlu0 %v4217_v62, %s4364_s24 }
 0x131   : > { %4223 = vrot.lane.b32.xlu1 %v4222_v50, %s4365_s25 }
 0x134   : > { %4228 = vrot.lane.b32.xlu0 %v4227_v2, %s4363_s22 }
 0x135   : > { %4233 = vrot.lane.b32.xlu1 %v4232_v3, %s4364_s24 }
 0x138   : > { %4243 = vrot.lane.b32.xlu0 %v4242_v5, %s4365_s25 }
 0x139   : > { %4238 = vrot.lane.b32.xlu1 %v4237_v6, %s4363_s22 }
 0x13c   : > { %4248 = vrot.lane.b32.xlu0 %v4247_v10, %s4364_s24 }
 0x13d   : > { %4253 = vrot.lane.b32.xlu1 %v4252_v11, %s4365_s25  ;;  %s5650_s25 = scalar_lea.hbm %s5703_s11, %s3029_s14 }
 0x140   : > { %4258 = vrot.lane.b32.xlu0 %v4257_v16, %s4363_s22 }
 0x141   : > { %4263 = vrot.lane.b32.xlu1 %v4262_v17, %s4364_s24 }
 0x186   : > { %v4149_v18 = vpop.permute.xlu0 %4148 }
 0x187   : > { %v4159_v19 = vpop.permute.xlu1 %4158  ;;  %v4151_v24 = vunpack.i.h.bf16 %v4149_v18  ;;  %v4150_v0 = vunpack.i.l.bf16 %v4149_v18 }
 0x188   : > { %v4161_v15 = vunpack.i.h.bf16 %v4159_v19  ;;  %v4160_v28 = vunpack.i.l.bf16 %v4159_v19 }
 0x18a   : > { %v4154_v59 = vpop.permute.xlu0 %4153 }
 0x18b   : > { %v4156_v21 = vunpack.i.h.bf16 %v4154_v59  ;;  %v4155_v22 = vunpack.i.l.bf16 %v4154_v59  ;;  %v4164_v23 = vpop.permute.xlu1 %4163 }
 0x18c   : > { %v4166_v38 = vunpack.i.h.bf16 %v4164_v23  ;;  %v4165_v40 = vunpack.i.l.bf16 %v4164_v23 }
 0x18d   : > { %v1076_v29 = vsel %vm1005_vm4, %v1043_v20, %v4156_v21  ;;  %v1081_v31 = vsel %vm1005_vm4, %v4795_v9, %v4155_v22 }
 0x18e   : > { %v4174_v32 = vpop.permute.xlu0 %4173  ;;  %v1082_v33 = vsel %vm1077_vm6, %v1081_v31, %v4150_v0  ;;  %v1078_v34 = vsel %vm1077_vm6, %v1076_v29, %v4151_v24  ;;  %v1112_v52 = vsel %vm1005_vm4, %v4782_v26, %v4165_v40  ;;  %v1109_v53 = vsel %vm1005_vm4, %v4788_v27, %v4166_v38 }
 0x18f   : > { %v4169_v30 = vpop.permute.xlu1 %4168  ;;  %v1083_v37 = vsel %vm1079_vm7, %v1082_v33, %v4160_v28  ;;  %v1080_v14 = vsel %vm1079_vm7, %v1078_v34, %v4161_v15  ;;  %v4176_v41 = vunpack.i.h.bf16 %v4174_v32  ;;  %v4175_v42 = vunpack.i.l.bf16 %v4174_v32 }
 0x190   : > { %1420 = vmatprep.mubr.f32.mxu0 %v1083_v37  ;;  %v4170_v60 = vunpack.i.l.bf16 %v4169_v30  ;;  %v4171_v27 = vunpack.i.h.bf16 %v4169_v30 }
 0x191   : > { %1421 = vmatmul.mubr.f32.vlgmr.msra.gmra.mrb[16].mxu0 %v1080_v14  ;;  %v1113_v56 = vsel %vm1077_vm6, %v1112_v52, %v4175_v42  ;;  %v1110_v45 = vsel %vm1077_vm6, %v1109_v53, %v4176_v41 }
 0x192   : > { %v4184_v43 = vpop.permute.xlu0 %4183 }
 0x193   : > { %v4186_v46 = vunpack.i.h.bf16 %v4184_v43  ;;  %v4185_v47 = vunpack.i.l.bf16 %v4184_v43  ;;  %v4179_v9 = vpop.permute.xlu1 %4178 }
 0x194   : > { %v4181_v48 = vunpack.i.h.bf16 %v4179_v9  ;;  %v4180_v49 = vunpack.i.l.bf16 %v4179_v9 }
 0x195   : > { %v1142_v58 = vsel %vm1005_vm4, %v4814_v44, %v4185_v47  ;;  %v1139_v26 = vsel %vm1005_vm4, %v4780_v25, %v4186_v46 }
 0x196   : > { %v4189_v62 = vpop.permute.xlu0 %4188  ;;  %v1114_v50 = vsel %vm1079_vm7, %v1113_v56, %v4180_v49  ;;  %v1111_v2 = vsel %vm1079_vm7, %v1110_v45, %v4181_v48  ;;  %v1143_v10 = vsel %vm1077_vm6, %v1142_v58, %v4170_v60  ;;  %v1140_v12 = vsel %vm1077_vm6, %v1139_v26, %v4171_v27 }
 0x197   : > { %v4191_v3 = vunpack.i.h.bf16 %v4189_v62  ;;  %v4190_v4 = vunpack.i.l.bf16 %v4189_v62  ;;  %v4194_v5 = vpop.permute.xlu1 %4193  ;;  %1425 = vmatprep.mubr.f32.mxu0 %v1114_v50 }
 0x198   : > { %v4196_v6 = vunpack.i.h.bf16 %v4194_v5  ;;  %v4195_v8 = vunpack.i.l.bf16 %v4194_v5  ;;  %1426 = vmatmul.mubr.f32.gmra.mrb[18].mxu0 %v1111_v2 }
 0x199   : > { %v1144_v44 = vsel %vm1079_vm7, %v1143_v10, %v4190_v4  ;;  %v1141_v18 = vsel %vm1079_vm7, %v1140_v12, %v4191_v3 }
 0x19a   : > { %v4199_v11 = vpop.permute.xlu0 %4198  ;;  %1430 = vmatprep.mubr.f32.mxu0 %v1144_v44  ;;  %v1172_v25 = vsel %vm1005_vm4, %v4821_v51, %v4195_v8  ;;  %v1169_v59 = vsel %vm1005_vm4, %v4802_v39, %v4196_v6 }
 0x19b   : > { %v4201_v13 = vunpack.i.h.bf16 %v4199_v11  ;;  %v4200_v16 = vunpack.i.l.bf16 %v4199_v11  ;;  %v4204_v17 = vpop.permute.xlu1 %4203 }
 0x19c   : > { %v4206_v19 = vunpack.i.h.bf16 %v4204_v17  ;;  %v4205_v20 = vunpack.i.l.bf16 %v4204_v17  ;;  %1431 = vmatmul.mubr.f32.gmra.mrb[20].mxu0 %v1141_v18 }
 0x19d   : > { %v1173_v21 = vsel %vm1077_vm6, %v1172_v25, %v4200_v16  ;;  %v1170_v22 = vsel %vm1077_vm6, %v1169_v59, %v4201_v13 }
 0x19e   : > { %v4214_v23 = vpop.permute.xlu0 %4213  ;;  %v1174_v24 = vsel %vm1079_vm7, %v1173_v21, %v4205_v20  ;;  %v1171_v0 = vsel %vm1079_vm7, %v1170_v22, %v4206_v19 }
 0x19f   : > { %v4216_v15 = vunpack.i.h.bf16 %v4214_v23  ;;  %v4215_v28 = vunpack.i.l.bf16 %v4214_v23  ;;  %v4209_v29 = vpop.permute.xlu1 %4208  ;;  %1435 = vmatprep.mubr.f32.mxu0 %v1174_v24 }
 0x1a0   : > { %v4211_v31 = vunpack.i.h.bf16 %v4209_v29  ;;  %v4210_v32 = vunpack.i.l.bf16 %v4209_v29  ;;  %1436 = vmatmul.mubr.f32.gmra.mrb[22].mxu0 %v1171_v0 }
 0x1a1   : > { %v1202_v51 = vsel %vm1005_vm4, %v4832_v55, %v4215_v28  ;;  %v1199_v39 = vsel %vm1005_vm4, %v4806_v35, %v4216_v15 }
 0x1a2   : > { %v4219_v33 = vpop.permute.xlu0 %4218  ;;  %v1203_v40 = vsel %vm1077_vm6, %v1202_v51, %v4210_v32  ;;  %v1200_v41 = vsel %vm1077_vm6, %v1199_v39, %v4211_v31  ;;  %v1697_v32 = vld [vmem:[%s5697_s5 + $0x80] sm:$0xff]  ;;  %v1698_v51 = vld [vmem:[%s5697_s5 + $0x88] sm:$0xff] }
 0x1a3   : > { %v4221_v34 = vunpack.i.h.bf16 %v4219_v33  ;;  %v4220_v30 = vunpack.i.l.bf16 %v4219_v33  ;;  %v4224_v37 = vpop.permute.xlu1 %4223  ;;  %v1681_v39 = vld [vmem:[%s5697_s5] sm:$0xff]  ;;  %v4969_v33 = vpack.c.bf16 %v1698_v51, %v1697_v32  ;;  %v1738_v32 = vld [vmem:[%s5697_s5 + $0x1c8] sm:$0xff] }
 0x1a4   : > { %v4226_v14 = vunpack.i.h.bf16 %v4224_v37  ;;  %v4225_v38 = vunpack.i.l.bf16 %v4224_v37  ;;  %v1700_v37 = vld [vmem:[%s5697_s5 + $0x98] sm:$0xff] }
 0x1a5   : > { %v1204_v42 = vsel %vm1079_vm7, %v1203_v40, %v4220_v30  ;;  %v1201_v43 = vsel %vm1079_vm7, %v1200_v41, %v4221_v34  ;;  %v1682_v34 = vld [vmem:[%s5697_s5 + $0x8] sm:$0xff]  ;;  %v1699_v30 = vld [vmem:[%s5697_s5 + $0x90] sm:$0xff]  ;;  %v1684_v41 = vld [vmem:[%s5697_s5 + $0x18] sm:$0xff]  ;;  %3762 = vmatprep.subr.bf16.mxu1 %v4969_v33 }
 0x1a6   : > { %v4229_v46 = vpop.permute.xlu0 %4228  ;;  %1440 = vmatprep.mubr.f32.mxu0 %v1204_v42  ;;  %v1232_v49 = vsel %vm1005_vm4, %v4844_v61, %v4225_v38  ;;  %v1229_v52 = vsel %vm1005_vm4, %v4829_v54, %v4226_v14  ;;  %v4980_v14 = vpack.c.bf16 %v1682_v34, %v1681_v39  ;;  %v4982_v38 = vpack.c.bf16 %v1700_v37, %v1699_v30  ;;  %v1683_v40 = vld [vmem:[%s5697_s5 + $0x10] sm:$0xff]  ;;  %v1701_v42 = vld [vmem:[%s5697_s5 + $0xa0] sm:$0xff]  ;;  %v1692_v34 = vld [vmem:[%s5697_s5 + $0x58] sm:$0xff] }
 0x1a7   : > { %v4231_v55 = vunpack.i.h.bf16 %v4229_v46  ;;  %v4230_v47 = vunpack.i.l.bf16 %v4229_v46  ;;  %v4234_v9 = vpop.permute.xlu1 %4233  ;;  %1441 = vmatmul.mubr.f32.gmra.mrb[24].mxu0 %v1201_v43  ;;  %v1702_v43 = vld [vmem:[%s5697_s5 + $0xa8] sm:$0xff]  ;;  %v1729_v46 = vld [vmem:[%s5697_s5 + $0x180] sm:$0xff]  ;;  %v1691_v39 = vld [vmem:[%s5697_s5 + $0x50] sm:$0xff] }
 0x1a8   : > { %v4236_v35 = vunpack.i.h.bf16 %v4234_v9  ;;  %v4235_v48 = vunpack.i.l.bf16 %v4234_v9  ;;  %3764 = vmatpush3.bf16.msra.mxu1 %v4980_v14 }
 0x1a9   : > { %v1233_v53 = vsel %vm1077_vm6, %v1232_v49, %v4230_v47  ;;  %v1230_v56 = vsel %vm1077_vm6, %v1229_v52, %v4231_v55  ;;  %v1730_v55 = vld [vmem:[%s5697_s5 + $0x188] sm:$0xff]  ;;  %v5004_v47 = vpack.c.bf16 %v1684_v41, %v1683_v40  ;;  %3766 = vmatprep.subr.bf16.mxu1 %v4982_v38  ;;  %v5015_v49 = vpack.c.bf16 %v1702_v43, %v1701_v42  ;;  %v1709_v40 = vld [vmem:[%s5697_s5 + $0xe0] sm:$0xff] }
 0x1aa   : > { %v4244_v45 = vpop.permute.xlu0 %4243  ;;  %v1234_v58 = vsel %vm1079_vm7, %v1233_v53, %v4235_v48  ;;  %v1231_v60 = vsel %vm1079_vm7, %v1230_v56, %v4236_v35  ;;  %v5006_v9 = vpack.c.bf16 %v1730_v55, %v1729_v46  ;;  %v1685_v35 = vld [vmem:[%s5697_s5 + $0x20] sm:$0xff]  ;;  %v1686_v52 = vld [vmem:[%s5697_s5 + $0x28] sm:$0xff]  ;;  %v1703_v56 = vld [vmem:[%s5697_s5 + $0xb0] sm:$0xff] }
 0x1ab   : > { %v4246_v62 = vunpack.i.h.bf16 %v4244_v45  ;;  %v4245_v50 = vunpack.i.l.bf16 %v4244_v45  ;;  %v4239_v2 = vpop.permute.xlu1 %4238  ;;  %1445 = vmatprep.mubr.f32.mxu0 %v1234_v58  ;;  %v1713_v48 = vld [vmem:[%s5697_s5 + $0x100] sm:$0xff]  ;;  %v1714_v53 = vld [vmem:[%s5697_s5 + $0x108] sm:$0xff]  ;;  %v1704_v58 = vld [vmem:[%s5697_s5 + $0xb8] sm:$0xff] }
 0x1ac   : > { %v4241_v3 = vunpack.i.h.bf16 %v4239_v2  ;;  %v4240_v4 = vunpack.i.l.bf16 %v4239_v2  ;;  %1446 = vmatmul.mubr.f32.gmra.mrb[26].mxu0 %v1231_v60  ;;  %3794 = vmatprep.subr.bf16.mxu0 %v5006_v9  ;;  %v5027_v45 = vpack.c.bf16 %v1714_v53, %v1713_v48  ;;  %v1731_v60 = vld [vmem:[%s5697_s5 + $0x190] sm:$0xff]  ;;  %v1721_v42 = vld [vmem:[%s5697_s5 + $0x140] sm:$0xff]  ;;  %v1722_v43 = vld [vmem:[%s5697_s5 + $0x148] sm:$0xff]  ;;  %v5161_v48 = vpack.c.bf16 %v1692_v34, %v1691_v39 }
 0x1ad   : > { %v1262_v61 = vsel %vm1005_vm4, %v4854_v1, %v4245_v50  ;;  %v1259_v54 = vsel %vm1005_vm4, %v4839_v57, %v4246_v62  ;;  %v1732_v62 = vld [vmem:[%s5697_s5 + $0x198] sm:$0xff]  ;;  %v1715_v2 = vld [vmem:[%s5697_s5 + $0x110] sm:$0xff]  ;;  %3768 = vmatpush3.bf16.msra.mxu1 %v5004_v47  ;;  %v1710_v46 = vld [vmem:[%s5697_s5 + $0xe8] sm:$0xff] }
 0x1ae   : > { %v4249_v5 = vpop.permute.xlu0 %4248  ;;  %v1263_v44 = vsel %vm1077_vm6, %v1262_v61, %v4240_v4  ;;  %v1260_v11 = vsel %vm1077_vm6, %v1259_v54, %v4241_v3  ;;  %v5038_v50 = vpack.c.bf16 %v1732_v62, %v1731_v60  ;;  %v1716_v3 = vld [vmem:[%s5697_s5 + $0x118] sm:$0xff]  ;;  %v5047_v4 = vpack.c.bf16 %v1686_v52, %v1685_v35  ;;  %3796 = vmatpush3.bf16.msra.mxu0 %v5027_v45  ;;  %v1687_v61 = vld [vmem:[%s5697_s5 + $0x30] sm:$0xff] }
 0x1af   : > { %v4251_v26 = vunpack.i.h.bf16 %v4249_v5  ;;  %v4250_v27 = vunpack.i.l.bf16 %v4249_v5  ;;  %v4254_v6 = vpop.permute.xlu1 %4253  ;;  %v5053_v54 = vpack.c.bf16 %v1716_v3, %v1715_v2  ;;  %v1733_v5 = vld [vmem:[%s5697_s5 + $0x1a0] sm:$0xff]  ;;  %3770 = vmatprep.subr.bf16.mxu1 %v5015_v49  ;;  %v1739_v55 = vld [vmem:[%s5697_s5 + $0x1d0] sm:$0xff]  ;;  %v1740_v35 = vld [vmem:[%s5697_s5 + $0x1d8] sm:$0xff]  ;;  %v5164_v52 = vpack.c.bf16 %v1722_v43, %v1721_v42 }
 0x1b0   : > { %v4256_v8 = vunpack.i.h.bf16 %v4254_v6  ;;  %v4255_v10 = vunpack.i.l.bf16 %v4254_v6  ;;  %3798 = vmatprep.subr.bf16.mxu0 %v5038_v50  ;;  %v1705_v6 = vld [vmem:[%s5697_s5 + $0xc0] sm:$0xff]  ;;  %v5167_v53 = vpack.c.bf16 %v1710_v46, %v1709_v40  ;;  %v5176_v60 = vpack.c.bf16 %v1740_v35, %v1739_v55  ;;  %v1711_v62 = vld [vmem:[%s5697_s5 + $0xf0] sm:$0xff]  ;;  %v1712_v2 = vld [vmem:[%s5697_s5 + $0xf8] sm:$0xff] }
 0x1b1   : > { %v1264_v12 = vsel %vm1079_vm7, %v1263_v44, %v4250_v27  ;;  %v1261_v13 = vsel %vm1079_vm7, %v1260_v11, %v4251_v26  ;;  %v5059_v26 = vpack.c.bf16 %v1704_v58, %v1703_v56  ;;  %v1688_v27 = vld [vmem:[%s5697_s5 + $0x38] sm:$0xff]  ;;  %v1717_v11 = vld [vmem:[%s5697_s5 + $0x120] sm:$0xff]  ;;  %3772 = vmatpush3.bf16.msra.mxu1 %v5047_v4  ;;  %v1694_v58 = vld [vmem:[%s5697_s5 + $0x68] sm:$0xff] }
 0x1b2   : > { %v4259_v16 = vpop.permute.xlu0 %4258  ;;  %1450 = vmatprep.mubr.f32.mxu0 %v1264_v12  ;;  %v1293_v20 = vsel %vm1005_vm4, %v4863_v7, %v4255_v10  ;;  %v1290_v25 = vsel %vm1005_vm4, %v4851_v63, %v4256_v8  ;;  %v1734_v8 = vld [vmem:[%s5697_s5 + $0x1a8] sm:$0xff]  ;;  %3800 = vmatpush3.bf16.msra.mxu0 %v5053_v54  ;;  %v1693_v56 = vld [vmem:[%s5697_s5 + $0x60] sm:$0xff] }
 0x1b3   : > { %v4261_v1 = vunpack.i.h.bf16 %v4259_v16  ;;  %v4260_v17 = vunpack.i.l.bf16 %v4259_v16  ;;  %v4264_v18 = vpop.permute.xlu1 %4263  ;;  %1451 = vmatmul.mubr.f32.gmra.mrb[28].mxu0 %v1261_v13  ;;  %v1706_v10 = vld [vmem:[%s5697_s5 + $0xc8] sm:$0xff]  ;;  %v5074_v44 = vpack.c.bf16 %v1734_v8, %v1733_v5  ;;  %v1735_v13 = vld [vmem:[%s5697_s5 + $0x1b0] sm:$0xff]  ;;  %v1736_v16 = vld [vmem:[%s5697_s5 + $0x1b8] sm:$0xff]  ;;  %3774 = vmatprep.subr.bf16.mxu1 %v5059_v26  ;;  %v5185_v3 = vpack.c.bf16 %v1694_v58, %v1693_v56 }
 0x1b4   : > { %v4266_v57 = vunpack.i.h.bf16 %v4264_v18  ;;  %v4265_v19 = vunpack.i.l.bf16 %v4264_v18  ;;  %v1718_v12 = vld [vmem:[%s5697_s5 + $0x128] sm:$0xff] }
 0x1b5   : > { %v1294_v59 = vsel %vm1077_vm6, %v1293_v20, %v4260_v17  ;;  %v1291_v21 = vsel %vm1077_vm6, %v1290_v25, %v4261_v1  ;;  %v5089_v1 = vpack.c.bf16 %v1688_v27, %v1687_v61  ;;  %v1689_v17 = vld [vmem:[%s5697_s5 + $0x40] sm:$0xff]  ;;  %v1690_v18 = vld [vmem:[%s5697_s5 + $0x48] sm:$0xff]  ;;  %3802 = vmatprep.subr.bf16.mxu0 %v5074_v44  ;;  %v1707_v20 = vld [vmem:[%s5697_s5 + $0xd0] sm:$0xff]  ;;  %v5107_v25 = vpack.c.bf16 %v1736_v16, %v1735_v13 }
 0x1b6   : > { %v1295_v22 = vsel %vm1079_vm7, %v1294_v59, %v4265_v19  ;;  %v1292_v23 = vsel %vm1079_vm7, %v1291_v21, %v4266_v57  ;;  %v5098_v57 = vpack.c.bf16 %v1718_v12, %v1717_v11  ;;  %v5101_v19 = vpack.c.bf16 %v1706_v10, %v1705_v6  ;;  %v1719_v59 = vld [vmem:[%s5697_s5 + $0x130] sm:$0xff]  ;;  %v1720_v21 = vld [vmem:[%s5697_s5 + $0x138] sm:$0xff]  ;;  %v5197_v27 = vld [vmem:[%s5696_s4] ss:$0 sm:$0xff] }
 0x1b7   : > { %1455 = vmatprep.mubr.f32.mxu0 %v1295_v22  ;;  %v1708_v22 = vld [vmem:[%s5697_s5 + $0xd8] sm:$0xff]  ;;  %3776 = vmatpush3.bf16.msra.mxu1 %v5089_v1  ;;  %v5125_v51 = vpack.c.bf16 %v1690_v18, %v1689_v17  ;;  %v5134_v30 = vpack.c.bf16 %v1720_v21, %v1719_v59  ;;  %v5189_v61 = vpack.c.bf16 %v1712_v2, %v1711_v62 }
 0x1b8   : > { %1456 = vmatmul.mubr.f32.gmra.mrb[30].mxu0 %v1292_v23  ;;  %v1737_v23 = vld [vmem:[%s5697_s5 + $0x1c0] sm:$0xff]  ;;  %3778 = vmatprep.subr.bf16.mxu1 %v5101_v19  ;;  %v5137_v37 = vpack.c.bf16 %v1708_v22, %v1707_v20 }
 0x1b9   : > { %3804 = vmatpush3.bf16.msra.mxu0 %v5098_v57  ;;  %v5143_v41 = vpack.c.bf16 %v1738_v32, %v1737_v23 }
 0x1ba   : > { %3806 = vmatprep.subr.bf16.mxu0 %v5107_v25 }
 0x1bb   : > { %3780 = vmatpush3.bf16.msra.mxu1 %v5125_v51 }
 0x1bc   : > { %3782 = vmatprep.subr.bf16.mxu1 %v5137_v37 }
 0x1bd   : > { %3808 = vmatpush3.bf16.msra.mxu0 %v5134_v30 }
 0x1be   : > { %3810 = vmatprep.subr.bf16.mxu0 %v5143_v41 }
 0x1bf   : > { %3784 = vmatpush3.bf16.msra.mxu1 %v5161_v48 }
 0x1c0   : > { %3786 = vmatprep.subr.bf16.mxu1 %v5167_v53 }
 0x1c1   : > { %3812 = vmatpush3.bf16.msra.mxu0 %v5164_v52 }
 0x1c2   : > { %3814 = vmatprep.subr.bf16.mxu0 %v5176_v60 }
 0x1c3   : > { %3788 = vmatpush3.bf16.msra.mxu1 %v5185_v3 }
 0x1c4   : > { %3790 = vmatprep.subr.bf16.mxu1 %v5189_v61 }
 0x1e9   : > { %v4938_v24 = vpop.f32.mrb[16].mxu1 }
 0x1ea   : > { %v4940_v0 = vpop.f32.mrb[17].mxu1 }
 0x1ed   : > { %v4942_v15 = vpop.f32.mrb[18].mxu1 }
 0x1ee   : > { %v4944_v7 = vpop.f32.mrb[19].mxu1 }
 0x1f1   : > { %v4946_v28 = vpop.f32.mrb[20].mxu1 }
 0x1f2   : > { %v4948_v63 = vpop.f32.mrb[21].mxu1 }
 0x1f5   : > { %v4956_v29 = vpop.f32.mrb[22].mxu1 }
 0x1f6   : > { %v4958_v31 = vpop.f32.mrb[23].mxu1 }
 0x264   : > { %v3105_v5 = vpop.f32.mrb[16].mxu0 }
 0x265   : > { %v3106_v6 = vpop.f32.mrb[17].mxu0 }
 0x266   : > { %v3107_v8 = vadd.f32 %v3106_v6, %v3105_v5  ;;  %v1695_v6 = vld [vmem:[%s5697_s5 + $0x70] sm:$0xff] }
 0x268   : > { %v1423_v10 = vadd.f32 %v3107_v8, %v5197_v27 }
 0x26a   : > { %v1528_v11 = vadd.f32 %v4940_v0, %v1423_v10  ;;  %v1696_v10 = vld [vmem:[%s5697_s5 + $0x78] sm:$0xff] }
 0x26b   : > { %v3108_v12 = vpop.f32.mrb[18].mxu0 }
 0x26c   : > { %v3109_v13 = vpop.f32.mrb[19].mxu0  ;;  %v1566_v22 = vmax.f32 %v1528_v11, 0.0  ;;  %v1724_v11 = vld [vmem:[%s5697_s5 + $0x158] sm:$0xff] }
 0x26d   : > { %v3110_v16 = vadd.f32 %v3109_v13, %v3108_v12 }
 0x26f   : > { %v1428_v17 = vadd.f32 %v3110_v16, %v5197_v27  ;;  %v3111_v18 = vpop.f32.mrb[20].mxu0  ;;  %v5220_v16 = vpack.c.bf16 %v1696_v10, %v1695_v6 }
 0x270   : > { %v3112_v20 = vpop.f32.mrb[21].mxu0 }
 0x271   : > { %v1533_v59 = vadd.f32 %v4938_v24, %v1428_v17  ;;  %v3113_v21 = vadd.f32 %v3112_v20, %v3111_v18  ;;  %3792 = vmatpush3.bf16.msra.mxu1 %v5220_v16 }
 0x273   : > { %v1567_v23 = vmax.f32 %v1533_v59, 0.0  ;;  %v1433_v32 = vadd.f32 %v3113_v21, %v5197_v27  ;;  %v3114_v39 = vpop.f32.mrb[22].mxu0  ;;  %v1741_v59 = vld [vmem:[%s5697_s5 + $0x1e0] sm:$0xff]  ;;  %v1742_v21 = vld [vmem:[%s5697_s5 + $0x1e8] sm:$0xff] }
 0x274   : > { %v3115_v34 = vpop.f32.mrb[23].mxu0 }
 0x275   : > { %v1581_v40 = vmax.f32 %v1566_v22, %v1567_v23  ;;  %v1538_v42 = vadd.f32 %v4944_v7, %v1433_v32  ;;  %v3116_v0 = vadd.f32 %v3115_v34, %v3114_v39  ;;  %v5235_v39 = vpack.c.bf16 %v1742_v21, %v1741_v59  ;;  %v1725_v34 = vld [vmem:[%s5697_s5 + $0x160] sm:$0xff] }
 0x277   : > { %v1583_v43 = vrot.slane %v1581_v40, 1  ;;  %v1438_v46 = vadd.f32 %v3116_v0, %v5197_v27  ;;  %v1568_v62 = vmax.f32 %v1538_v42, 0.0 }
 0x279   : > { %v1585_v55 = vmax.f32 %v1581_v40, %v1583_v43  ;;  %v1543_v35 = vadd.f32 %v4942_v15, %v1438_v46  ;;  %v1723_v15 = vld [vmem:[%s5697_s5 + $0x150] sm:$0xff]  ;;  %v1726_v40 = vld [vmem:[%s5697_s5 + $0x168] sm:$0xff] }
 0x27a   : > { %v3117_v56 = vpop.f32.mrb[24].mxu0  ;;  %v5222_v17 = vpack.c.bf16 %v1724_v11, %v1723_v15  ;;  %v5245_v43 = vpack.c.bf16 %v1726_v40, %v1725_v34  ;;  %v1653_v11 = vld [vmem:[#allocation3 + $0x1] sm:$0xf] }
 0x27b   : > { %v1587_v24 = vrot.slane %v1585_v55, 1  ;;  %v1589_v58 = vrot.slane %v1585_v55, 2  ;;  %v1569_v2 = vmax.f32 %v1543_v35, 0.0  ;;  %v3118_v5 = vpop.f32.mrb[25].mxu0  ;;  %v1591_v8 = vrot.slane %v1585_v55, 3 }
 0x27c   : > { %v3119_v7 = vadd.f32 %v3118_v5, %v3117_v56  ;;  %3816 = vmatpush3.bf16.msra.mxu0 %v5222_v17  ;;  %v4366_v35 = vmov 0.0|0.0   ;;  %v1743_v56 = vld [vmem:[%s5697_s5 + $0x1f0] sm:$0xff]  ;;  %v1728_v5 = vld [vmem:[%s5697_s5 + $0x178] sm:$0xff] }
 0x27d   : > { %v1593_v12 = vsel %vm426_vm0, %v1585_v55, %v1587_v24  ;;  %v1601_v13 = vmax.f32 %v1568_v62, %v1569_v2  ;;  %3818 = vmatprep.subr.bf16.mxu0 %v5235_v39  ;;  %3825 = vmatprep.subr.bf16.mxu1 %v4366_v35  ;;  %v1744_v24 = vld [vmem:[%s5697_s5 + $0x1f8] sm:$0xff]  ;;  %v1727_v2 = vld [vmem:[%s5697_s5 + $0x170] sm:$0xff] }
 0x27e   : > { %v1595_v18 = vsel %vm1594_vm9, %v1593_v12, %v1589_v58  ;;  %v1443_v20 = vadd.f32 %v3119_v7, %v5197_v27  ;;  %v5263_v6 = vpack.c.bf16 %v1744_v24, %v1743_v56 }
 0x27f   : > { %v1597_v22 = vsel %vm1596_vm10, %v1595_v18, %v1591_v8  ;;  %v1603_v23 = vrot.slane %v1601_v13, 1  ;;  %v3120_v32 = vpop.f32.mrb[26].mxu0  ;;  %v5265_v8 = vpack.c.bf16 %v1728_v5, %v1727_v2 }
 0x280   : > { %1600 = vst.msk [vmem:[#allocation3 + $0x9] sm:$0xf] %vm1599_vm11, %v1597_v22  ;;  %v1548_v42 = vadd.f32 %v4948_v63, %v1443_v20  ;;  %v3121_v0 = vpop.f32.mrb[27].mxu0  ;;  %3820 = vmatpush3.bf16.msra.mxu0 %v5245_v43 }
 0x281   : > { %v1605_v46 = vmax.f32 %v1601_v13, %v1603_v23  ;;  %v3122_v55 = vadd.f32 %v3121_v0, %v3120_v32  ;;  %3822 = vmatprep.subr.bf16.mxu0 %v5263_v6 }
 0x282   : > { %v1570_v20 = vmax.f32 %v1548_v42, 0.0 }
 0x283   : > { %v1607_v58 = vrot.slane %v1605_v46, 1  ;;  %v1609_v63 = vrot.slane %v1605_v46, 2  ;;  %v1448_v62 = vadd.f32 %v3122_v55, %v5197_v27  ;;  %v1611_v7 = vrot.slane %v1605_v46, 3 }
 0x284   : > { %3824 = vmatpush3.bf16.msra.mxu0 %v5265_v8 }
 0x285   : > { %v1613_v10 = vsel %vm426_vm0, %v1605_v46, %v1607_v58  ;;  %v1553_v15 = vadd.f32 %v4946_v28, %v1448_v62  ;;  %3838 = vmatprep.subr.bf16.mxu0 %v4969_v33 }
 0x286   : > { %v1614_v12 = vsel %vm1594_vm9, %v1613_v10, %v1609_v63  ;;  %v3123_v13 = vpop.f32.mrb[28].mxu0 }
 0x287   : > { %v1615_v18 = vsel %vm1596_vm10, %v1614_v12, %v1611_v7  ;;  %v1571_v59 = vmax.f32 %v1553_v15, 0.0  ;;  %v3124_v21 = vpop.f32.mrb[29].mxu0  ;;  %v5272_v22 = vld [vmem:[#allocation3 + $0x8] sm:$0xf] }
 0x288   : > { %1617 = vst.msk [vmem:[#allocation3 + $0x11] sm:$0xf] %vm1599_vm11, %v1615_v18  ;;  %v3125_v23 = vadd.f32 %v3124_v21, %v3123_v13  ;;  %v4267_v28 = vpack.i.bf16 %v1653_v11, %v5272_v22  ;;  %v5282_v62 = vld [vmem:[#allocation3 + $0xa] sm:$0xf] }
 0x289   : > { %v1618_v32 = vmax.f32 %v1570_v20, %v1571_v59  ;;  %v5288_v7 = vld [vmem:[#allocation3 + $0x9] sm:$0xf] }
 0x28a   : > { %4268 = vrot.lane.b32.xlu0 %v4267_v28, %s4363_s22  ;;  %v1453_v34 = vadd.f32 %v3125_v23, %v5197_v27 }
 0x28b   : > { %v1620_v40 = vrot.slane %v1618_v32, 1  ;;  %v3126_v42 = vpop.f32.mrb[30].mxu0 }
 0x28c   : > { %v1558_v0 = vadd.f32 %v4958_v31, %v1453_v34  ;;  %v3127_v46 = vpop.f32.mrb[31].mxu0 }
 0x28d   : > { %v1622_v55 = vmax.f32 %v1618_v32, %v1620_v40  ;;  %v3128_v56 = vadd.f32 %v3127_v46, %v3126_v42 }
 0x28e   : > { %v1572_v18 = vmax.f32 %v1558_v0, 0.0 }
 0x28f   : > { %v1624_v24 = vrot.slane %v1622_v55, 1  ;;  %v1626_v58 = vrot.slane %v1622_v55, 2  ;;  %v1458_v63 = vadd.f32 %v3128_v56, %v5197_v27  ;;  %v5284_v2 = vld [vmem:[#allocation3 + $0x11] sm:$0xf]  ;;  %v1628_v15 = vrot.slane %v1622_v55, 3 }
 0x290   : > { %v4272_v5 = vpack.i.bf16 %v5282_v62, %v5284_v2  ;;  %v5290_v10 = vld [vmem:[#allocation3 + $0x10] sm:$0xf] }
 0x291   : > { %v1630_v31 = vsel %vm426_vm0, %v1622_v55, %v1624_v24  ;;  %v1563_v11 = vadd.f32 %v4956_v29, %v1458_v63  ;;  %v4277_v12 = vpack.i.bf16 %v5288_v7, %v5290_v10  ;;  %v5305_v34 = vld [vmem:[#allocation3 + $0x12] sm:$0xf] }
 0x292   : > { %v1631_v27 = vsel %vm1594_vm9, %v1630_v31, %v1626_v58  ;;  %4273 = vrot.lane.b32.xlu1 %v4272_v5, %s4363_s22  ;;  %v2468_v31 = vld [vmem:[#allocation3 + $0x29] sm:$0xf] }
 0x293   : > { %v1632_v13 = vsel %vm1596_vm10, %v1631_v27, %v1628_v15  ;;  %v1573_v20 = vmax.f32 %v1563_v11, 0.0  ;;  %4278 = vrot.lane.b32.xlu0 %v4277_v12, %s4363_s22  ;;  %v1745_v12 = vld [vmem:[%s5697_s5 + $0x200] sm:$0xff]  ;;  %v1746_v27 = vld [vmem:[%s5697_s5 + $0x208] sm:$0xff] }
 0x294   : > { %1634 = vst.msk [vmem:[#allocation3 + $0x19] sm:$0xf] %vm1599_vm11, %v1632_v13 }
 0x295   : > { %v1635_v59 = vmax.f32 %v1572_v18, %v1573_v20  ;;  %v1654_v18 = vld [vmem:[#allocation3 + $0x2] sm:$0xf] }
 0x296   : > { %v1652_v20 = vld [vmem:[#allocation3] sm:$0xf] }
 0x297   : > { %v1637_v21 = vrot.slane %v1635_v59, 1 }
 0x299   : > { %v1639_v23 = vmax.f32 %v1635_v59, %v1637_v21 }
 0x29b   : > { %v1641_v28 = vrot.slane %v1639_v23, 1  ;;  %v1643_v29 = vrot.slane %v1639_v23, 2  ;;  %v5301_v32 = vld [vmem:[#allocation3 + $0x18] sm:$0xf]  ;;  %v1645_v42 = vrot.slane %v1639_v23, 3 }
 0x29c   : > { %2231 = vrot.lane.b32.xlu0 %v5301_v32, %s4363_s22  ;;  %v5307_v40 = vld [vmem:[#allocation3 + $0x19] sm:$0xf] }
 0x29d   : > { %v1647_v0 = vsel %vm426_vm0, %v1639_v23, %v1641_v28  ;;  %v4282_v46 = vpack.i.bf16 %v5305_v34, %v5307_v40  ;;  %v5318_v58 = vld [vmem:[#allocation3 + $0x1a] sm:$0xf]  ;;  %v5337_v23 = vpack.c.bf16 %v1746_v27, %v1745_v12 }
 0x29e   : > { %v1648_v55 = vsel %vm1594_vm9, %v1647_v0, %v1643_v29  ;;  %v1748_v0 = vld [vmem:[%s5697_s5 + $0x218] sm:$0xff] }
 0x29f   : > { %v1649_v56 = vsel %vm1596_vm10, %v1648_v55, %v1645_v42  ;;  %4283 = vrot.lane.b32.xlu1 %v4282_v46, %s4363_s22  ;;  %v1747_v42 = vld [vmem:[%s5697_s5 + $0x210] sm:$0xff]  ;;  %v1749_v55 = vld [vmem:[%s5697_s5 + $0x220] sm:$0xff] }
 0x2a0   : > { %1651 = vst.msk [vmem:[#allocation3 + $0x21] sm:$0xf] %vm1599_vm11, %v1649_v56  ;;  %v5348_v46 = vpack.c.bf16 %v1748_v0, %v1747_v42  ;;  %v1750_v56 = vld [vmem:[%s5697_s5 + $0x228] sm:$0xff] }
 0x2a7   : > { %v5316_v24 = vld [vmem:[#allocation3 + $0x20] sm:$0xf] }
 0x2a8   : > { %v5320_v63 = vld [vmem:[#allocation3 + $0x21] sm:$0xf]  ;;  %2471 = vrot.lane.b32.xlu0 %v5316_v24, %s4363_s22 }
 0x2a9   : > { %v4287_v5 = vpack.i.bf16 %v5318_v58, %v5320_v63  ;;  %v5326_v15 = vld [vmem:[#allocation3 + $0x22] sm:$0xf] }
 0x2aa   : > { %v4292_v11 = vpack.i.bf16 %v5326_v15, %v2468_v31 }
 0x2ab   : > { %4288 = vrot.lane.b32.xlu1 %v4287_v5, %s4363_s22 }
 0x2af   : > { %4293 = vrot.lane.b32.xlu1 %v4292_v11, %s4363_s22  ;;  %s4303_s22 = scalar_lea.vmem %s4302_s13, 32 }
 0x2b0   : > { %p4305_p1 = scmp.lt.s32.totalorder %s4303_s22, %s4297_s30 }
 0x2b2   : > { %p4306_p2 = por %p4305_p1, %p4304_p0 }
 0x2b4   : > { %p4307_p3 = pnand %p4306_p2, %p4300_p13 }
 0x2fc   : > { %v4269_v13 = vpop.permute.xlu0 %4268 }
 0x2fd   : > { %v4271_v59 = vunpack.i.h.bf16 %v4269_v13  ;;  %v4270_v21 = vunpack.i.l.bf16 %v4269_v13  ;;  %v5360_v13 = vpack.c.bf16 %v1750_v56, %v1749_v55 }
 0x2ff   : > { %v1678_v28 = vsel %vm1077_vm6, %v1654_v18, %v4270_v21  ;;  %v1677_v29 = vsel %vm1077_vm6, %v1652_v20, %v4271_v59  ;;  %v1751_v59 = vld [vmem:[%s5697_s5 + $0x230] sm:$0xff]  ;;  %v1752_v21 = vld [vmem:[%s5697_s5 + $0x238] sm:$0xff] }
 0x300   : > { %1827 = vmatprep.mubr.f32.mxu1 %v1678_v28  ;;  %v5380_v28 = vpack.c.bf16 %v1752_v21, %v1751_v59  ;;  %v2795_v59 = vld [vmem:[%s5701_s9] sm:$0xff]  ;;  %v2796_v21 = vld [vmem:[%s5701_s9 + $0x8] sm:$0xff] }
 0x301   : > { %1828 = vmatmul.mubr.f32.vlgmr.msra.gmra.mrb[24].mxu1 %v1677_v29 }
 0x302   : > { %3827 = vmatpush3.bf16.msra.mxu1 %v5337_v23  ;;  %3583 = vmatprep.mubr.msk.f32.mxu1 %vm4367_vm12, %v4362_v36 }
 0x303   : > { %3828 = vmatprep.subr.bf16.mxu1 %v4366_v35 }
 0x304   : > { %v4274_v5 = vpop.permute.xlu1 %4273 }
 0x305   : > { %v4276_v31 = vunpack.i.h.bf16 %v4274_v5  ;;  %v4275_v11 = vunpack.i.l.bf16 %v4274_v5  ;;  %v4279_v12 = vpop.permute.xlu0 %4278 }
 0x306   : > { %v4280_v27 = vunpack.i.l.bf16 %v4279_v12  ;;  %3830 = vmatpush3.bf16.msra.mxu1 %v5348_v46 }
 0x307   : > { %v5364_v18 = vsel %vm1077_vm6, %v5290_v10, %v4275_v11  ;;  %3831 = vmatprep.subr.bf16.mxu1 %v4366_v35  ;;  %v1679_v20 = vsel %vm1077_vm6, %v5288_v7, %v4276_v31 }
 0x308   : > { %1897 = vmatprep.mubr.f32.mxu0 %v5364_v18  ;;  %v2002_v10 = vsel %vm1077_vm6, %v5282_v62, %v4280_v27 }
 0x309   : > { %1898 = vmatmul.mubr.f32.vlgmr.msra.gmra.mrb[32].mxu0 %v1679_v20 }
 0x30a   : > { %3833 = vmatpush3.bf16.msra.mxu1 %v5360_v13  ;;  %3840 = vmatpush3.bf16.msra.mxu0 %v4980_v14 }
 0x30b   : > { %2072 = vmatprep.mubr.f32.mxu0 %v2002_v10  ;;  %3834 = vmatprep.subr.bf16.mxu1 %v4366_v35  ;;  %v2797_v10 = vld [vmem:[%s5701_s9 + $0x10] sm:$0xff] }
 0x30c   : > { %3842 = vmatprep.subr.bf16.mxu0 %v4982_v38 }
 0x30e   : > { %3836 = vmatpush3.bf16.msra.mxu1 %v5380_v28  ;;  %3844 = vmatpush3.bf16.msra.mxu0 %v5004_v47  ;;  %v2232_v55 = vpop.permute.xlu0 %2231 }
 0x30f   : > { %3846 = vmatprep.subr.bf16.mxu0 %v5015_v49  ;;  %3870 = vmatprep.subr.bf16.mxu1 %v5006_v9  ;;  %v2241_v56 = vsel %vm1077_vm6, %v5305_v34, %v2232_v55 }
 0x311   : > { %v4284_v7 = vpop.permute.xlu1 %4283  ;;  %3584 = vmatmul.mubr.msk.f32.vlgmr.msra.gmra.mrb[26].mxu1 %vm1077_vm6, %v5305_v34 }
 0x312   : > { %v4285_v62 = vunpack.i.l.bf16 %v4284_v7  ;;  %3848 = vmatpush3.bf16.msra.mxu0 %v5047_v4  ;;  %3872 = vmatpush3.bf16.msra.mxu1 %v5027_v45  ;;  %v4286_v0 = vunpack.i.h.bf16 %v4284_v7  ;;  %v2798_v7 = vld [vmem:[%s5701_s9 + $0x18] sm:$0xff] }
 0x313   : > { %3850 = vmatprep.subr.bf16.mxu0 %v5059_v26  ;;  %3874 = vmatprep.subr.bf16.mxu1 %v5038_v50 }
 0x314   : > { %v5396_v29 = vsel %vm1077_vm6, %v5301_v32, %v4285_v62  ;;  %v4281_v32 = vunpack.i.h.bf16 %v4279_v12  ;;  %v4093_v62 = vpack.c.bf16 %v2798_v7, %v2797_v10 }
 0x315   : > { %2142 = vmatprep.mubr.f32.mxu1 %v5396_v29 }
 0x316   : > { %3852 = vmatpush3.bf16.msra.mxu0 %v5089_v1  ;;  %3876 = vmatpush3.bf16.msra.mxu1 %v5053_v54  ;;  %v2001_v42 = vsel %vm1077_vm6, %v5272_v22, %v4281_v32  ;;  %v2003_v22 = vsel %vm1077_vm6, %v5284_v2, %v4286_v0  ;;  %v2800_v32 = vld [vmem:[%s5701_s9 + $0x28] sm:$0xff] }
 0x317   : > { %3854 = vmatprep.subr.bf16.mxu0 %v5101_v19  ;;  %3878 = vmatprep.subr.bf16.mxu1 %v5074_v44 }
 0x31a   : > { %3856 = vmatpush3.bf16.msra.mxu0 %v5125_v51  ;;  %3880 = vmatpush3.bf16.msra.mxu1 %v5098_v57 }
 0x31b   : > { %3858 = vmatprep.subr.bf16.mxu0 %v5137_v37  ;;  %3882 = vmatprep.subr.bf16.mxu1 %v5107_v25 }
 0x31d   : > { %v4289_v5 = vpop.permute.xlu1 %4288 }
 0x31e   : > { %3860 = vmatpush3.bf16.msra.mxu0 %v5161_v48  ;;  %3884 = vmatpush3.bf16.msra.mxu1 %v5134_v30  ;;  %v4290_v31 = vunpack.i.l.bf16 %v4289_v5  ;;  %v4291_v34 = vunpack.i.h.bf16 %v4289_v5 }
 0x31f   : > { %3862 = vmatprep.subr.bf16.mxu0 %v5167_v53  ;;  %3886 = vmatprep.subr.bf16.mxu1 %v5143_v41 }
 0x320   : > { %v2243_v2 = vsel %vm1077_vm6, %v5316_v24, %v4290_v31  ;;  %v2472_v24 = vpop.permute.xlu0 %2471  ;;  %v2242_v11 = vsel %vm1077_vm6, %v5307_v40, %v4291_v34  ;;  %v2718_v40 = vld [vmem:[%s5699_s7 + $0x58] sm:$0xff] }
 0x321   : > { %v2481_v12 = vsel %vm1077_vm6, %v5318_v58, %v2472_v24  ;;  %v4294_v27 = vpop.permute.xlu1 %4293 }
 0x322   : > { %3864 = vmatpush3.bf16.msra.mxu0 %v5185_v3  ;;  %3888 = vmatpush3.bf16.msra.mxu1 %v5164_v52 }
 0x323   : > { %3866 = vmatprep.subr.bf16.mxu0 %v5189_v61  ;;  %3890 = vmatprep.subr.bf16.mxu1 %v5176_v60 }
 0x326   : > { %3868 = vmatpush3.bf16.msra.mxu0 %v5220_v16  ;;  %3892 = vmatpush3.bf16.msra.mxu1 %v5222_v17 }
 0x327   : > { %3894 = vmatprep.subr.bf16.mxu1 %v5235_v39  ;;  %3901 = vmatprep.subr.bf16.mxu0 %v4366_v35 }
 0x329   : > { %2073 = vmatmul.mubr.f32.vlgmr.msra.gmra.mrb[34].mxu0 %v2001_v42 }
 0x32a   : > { %3896 = vmatpush3.bf16.msra.mxu1 %v5245_v43  ;;  %3903 = vmatpush3.bf16.msra.mxu0 %v5337_v23 }
 0x32b   : > { %3898 = vmatprep.subr.bf16.mxu1 %v5263_v6  ;;  %3904 = vmatprep.subr.bf16.mxu0 %v4366_v35 }
 0x32c   : > { %3602 = vmatprep.mubr.msk.f32.mxu0 %vm4367_vm12, %v4362_v36 }
 0x32e   : > { %3900 = vmatpush3.bf16.msra.mxu1 %v5265_v8  ;;  %3906 = vmatpush3.bf16.msra.mxu0 %v5348_v46 }
 0x32f   : > { %3907 = vmatprep.subr.bf16.mxu0 %v4366_v35  ;;  %3914 = vmatprep.subr.bf16.mxu1 %v4969_v33 }
 0x331   : > { %2143 = vmatmul.mubr.f32.vlgmr.msra.gmra.mrb[28].mxu1 %v2003_v22 }
 0x332   : > { %3909 = vmatpush3.bf16.msra.mxu0 %v5360_v13  ;;  %3916 = vmatpush3.bf16.msra.mxu1 %v4980_v14 }
 0x333   : > { %2311 = vmatprep.mubr.f32.mxu1 %v2241_v56  ;;  %3910 = vmatprep.subr.bf16.mxu0 %v4366_v35 }
 0x334   : > { %3918 = vmatprep.subr.bf16.mxu1 %v4982_v38 }
 0x336   : > { %3912 = vmatpush3.bf16.msra.mxu0 %v5380_v28  ;;  %3920 = vmatpush3.bf16.msra.mxu1 %v5004_v47 }
 0x337   : > { %3922 = vmatprep.subr.bf16.mxu1 %v5015_v49  ;;  %3946 = vmatprep.subr.bf16.mxu0 %v5006_v9 }
 0x339   : > { %3603 = vmatmul.mubr.msk.f32.vlgmr.msra.gmra.mrb[36].mxu0 %vm1077_vm6, %v5318_v58 }
 0x33a   : > { %3924 = vmatpush3.bf16.msra.mxu1 %v5047_v4  ;;  %3948 = vmatpush3.bf16.msra.mxu0 %v5027_v45 }
 0x33b   : > { %2381 = vmatprep.mubr.f32.mxu0 %v2243_v2  ;;  %3926 = vmatprep.subr.bf16.mxu1 %v5059_v26 }
 0x33c   : > { %3950 = vmatprep.subr.bf16.mxu0 %v5038_v50 }
 0x33e   : > { %3928 = vmatpush3.bf16.msra.mxu1 %v5089_v1  ;;  %3952 = vmatpush3.bf16.msra.mxu0 %v5053_v54 }
 0x33f   : > { %3930 = vmatprep.subr.bf16.mxu1 %v5101_v19  ;;  %3954 = vmatprep.subr.bf16.mxu0 %v5074_v44 }
 0x342   : > { %3932 = vmatpush3.bf16.msra.mxu1 %v5125_v51  ;;  %3956 = vmatpush3.bf16.msra.mxu0 %v5098_v57 }
 0x343   : > { %3934 = vmatprep.subr.bf16.mxu1 %v5137_v37  ;;  %3958 = vmatprep.subr.bf16.mxu0 %v5107_v25 }
 0x346   : > { %3936 = vmatpush3.bf16.msra.mxu1 %v5161_v48  ;;  %3960 = vmatpush3.bf16.msra.mxu0 %v5134_v30 }
 0x347   : > { %3938 = vmatprep.subr.bf16.mxu1 %v5167_v53  ;;  %3962 = vmatprep.subr.bf16.mxu0 %v5143_v41 }
 0x34a   : > { %3940 = vmatpush3.bf16.msra.mxu1 %v5185_v3  ;;  %3964 = vmatpush3.bf16.msra.mxu0 %v5164_v52 }
 0x34b   : > { %3942 = vmatprep.subr.bf16.mxu1 %v5189_v61  ;;  %3966 = vmatprep.subr.bf16.mxu0 %v5176_v60 }
 0x34e   : > { %3944 = vmatpush3.bf16.msra.mxu1 %v5220_v16  ;;  %3968 = vmatpush3.bf16.msra.mxu0 %v5222_v17 }
 0x34f   : > { %3970 = vmatprep.subr.bf16.mxu0 %v5235_v39  ;;  %3977 = vmatprep.subr.bf16.mxu1 %v4366_v35 }
 0x351   : > { %2312 = vmatmul.mubr.f32.vlgmr.msra.gmra.mrb[30].mxu1 %v5364_v18  ;;  %v4295_v18 = vunpack.i.l.bf16 %v4294_v27 }
 0x352   : > { %3972 = vmatpush3.bf16.msra.mxu0 %v5245_v43  ;;  %3979 = vmatpush3.bf16.msra.mxu1 %v5337_v23 }
 0x353   : > { %3974 = vmatprep.subr.bf16.mxu0 %v5263_v6  ;;  %3980 = vmatprep.subr.bf16.mxu1 %v4366_v35 }
 0x354   : > { %3621 = vmatprep.mubr.msk.f32.mxu1 %vm4367_vm12, %v4362_v36 }
 0x356   : > { %3976 = vmatpush3.bf16.msra.mxu0 %v5265_v8  ;;  %3982 = vmatpush3.bf16.msra.mxu1 %v5348_v46 }
 0x357   : > { %3983 = vmatprep.subr.bf16.mxu1 %v4366_v35  ;;  %3990 = vmatprep.subr.bf16.mxu0 %v4969_v33  ;;  %v2467_v33 = vld [vmem:[#allocation3 + $0x28] sm:$0xf] }
 0x359   : > { %2382 = vmatmul.mubr.f32.vlgmr.msra.gmra.mrb[38].mxu0 %v2242_v11 }
 0x35a   : > { %3985 = vmatpush3.bf16.msra.mxu1 %v5360_v13  ;;  %3992 = vmatpush3.bf16.msra.mxu0 %v4980_v14  ;;  %v2483_v14 = vsel %vm1077_vm6, %v2467_v33, %v4295_v18 }
 0x35b   : > { %2551 = vmatprep.mubr.f32.mxu0 %v2481_v12  ;;  %3986 = vmatprep.subr.bf16.mxu1 %v4366_v35 }
 0x35c   : > { %3994 = vmatprep.subr.bf16.mxu0 %v4982_v38  ;;  %v4296_v38 = vunpack.i.h.bf16 %v4294_v27 }
 0x35e   : > { %3988 = vmatpush3.bf16.msra.mxu1 %v5380_v28  ;;  %3996 = vmatpush3.bf16.msra.mxu0 %v5004_v47  ;;  %v2482_v47 = vsel %vm1077_vm6, %v5320_v63, %v4296_v38  ;;  %v2719_v63 = vld [vmem:[%s5699_s7 + $0x60] sm:$0xff] }
 0x35f   : > { %3998 = vmatprep.subr.bf16.mxu0 %v5015_v49  ;;  %4022 = vmatprep.subr.bf16.mxu1 %v5006_v9  ;;  %v2469_v9 = vld [vmem:[#allocation3 + $0x2a] sm:$0xf]  ;;  %v2707_v49 = vld [vmem:[%s5699_s7] sm:$0xff] }
 0x361   : > { %3622 = vmatmul.mubr.msk.f32.vlgmr.msra.gmra.mrb[32].mxu1 %vm1077_vm6, %v5326_v15  ;;  %v2720_v15 = vld [vmem:[%s5699_s7 + $0x68] sm:$0xff] }
 0x362   : > { %4000 = vmatpush3.bf16.msra.mxu0 %v5047_v4  ;;  %4024 = vmatpush3.bf16.msra.mxu1 %v5027_v45  ;;  %v2708_v45 = vld [vmem:[%s5699_s7 + $0x8] sm:$0xff] }
 0x363   : > { %2621 = vmatprep.mubr.f32.mxu1 %v2483_v14  ;;  %4002 = vmatprep.subr.bf16.mxu0 %v5059_v26  ;;  %v2709_v26 = vld [vmem:[%s5699_s7 + $0x10] sm:$0xff] }
 0x364   : > { %4026 = vmatprep.subr.bf16.mxu1 %v5038_v50  ;;  %v4066_v50 = vpack.c.bf16 %v2708_v45, %v2707_v49 }
 0x366   : > { %4004 = vmatpush3.bf16.msra.mxu0 %v5089_v1  ;;  %4028 = vmatpush3.bf16.msra.mxu1 %v5053_v54 }
 0x367   : > { %4006 = vmatprep.subr.bf16.mxu0 %v5101_v19  ;;  %4030 = vmatprep.subr.bf16.mxu1 %v5074_v44  ;;  %v2712_v19 = vld [vmem:[%s5699_s7 + $0x28] sm:$0xff] }
 0x36a   : > { %4008 = vmatpush3.bf16.msra.mxu0 %v5125_v51  ;;  %4032 = vmatpush3.bf16.msra.mxu1 %v5098_v57  ;;  %v2711_v57 = vld [vmem:[%s5699_s7 + $0x20] sm:$0xff] }
 0x36b   : > { %4010 = vmatprep.subr.bf16.mxu0 %v5137_v37  ;;  %4034 = vmatprep.subr.bf16.mxu1 %v5107_v25  ;;  %v4072_v25 = vpack.c.bf16 %v2712_v19, %v2711_v57  ;;  %v5566_v51 = vld [vmem:[%s5698_s6] ss:$0 sm:$0xff] }
 0x36e   : > { %4012 = vmatpush3.bf16.msra.mxu0 %v5161_v48  ;;  %4036 = vmatpush3.bf16.msra.mxu1 %v5134_v30  ;;  %v2714_v48 = vld [vmem:[%s5699_s7 + $0x38] sm:$0xff] }
 0x36f   : > { %4014 = vmatprep.subr.bf16.mxu0 %v5167_v53  ;;  %4038 = vmatprep.subr.bf16.mxu1 %v5143_v41  ;;  %v2713_v41 = vld [vmem:[%s5699_s7 + $0x30] sm:$0xff] }
 0x372   : > { %4016 = vmatpush3.bf16.msra.mxu0 %v5185_v3  ;;  %4040 = vmatpush3.bf16.msra.mxu1 %v5164_v52 }
 0x373   : > { %4018 = vmatprep.subr.bf16.mxu0 %v5189_v61  ;;  %4042 = vmatprep.subr.bf16.mxu1 %v5176_v60  ;;  %v4075_v60 = vpack.c.bf16 %v2714_v48, %v2713_v41  ;;  %v2715_v61 = vld [vmem:[%s5699_s7 + $0x40] sm:$0xff] }
 0x376   : > { %4020 = vmatpush3.bf16.msra.mxu0 %v5220_v16  ;;  %4044 = vmatpush3.bf16.msra.mxu1 %v5222_v17  ;;  %v2716_v16 = vld [vmem:[%s5699_s7 + $0x48] sm:$0xff] }
 0x377   : > { %4046 = vmatprep.subr.bf16.mxu1 %v5235_v39  ;;  %4053 = vmatprep.subr.bf16.mxu0 %v4366_v35  ;;  %v4078_v17 = vpack.c.bf16 %v2716_v16, %v2715_v61 }
 0x379   : > { %2552 = vmatmul.mubr.f32.vlgmr.msra.gmra.mrb[40].mxu0 %v5396_v29  ;;  %v2799_v29 = vld [vmem:[%s5701_s9 + $0x20] sm:$0xff] }
 0x37a   : > { %4048 = vmatpush3.bf16.msra.mxu1 %v5245_v43  ;;  %4055 = vmatpush3.bf16.msra.mxu0 %v5337_v23  ;;  %v4084_v23 = vpack.c.bf16 %v2720_v15, %v2719_v63  ;;  %v4096_v42 = vpack.c.bf16 %v2800_v32, %v2799_v29 }
 0x37b   : > { %4050 = vmatprep.subr.bf16.mxu1 %v5263_v6  ;;  %4056 = vmatprep.subr.bf16.mxu0 %v4366_v35 }
 0x37c   : > { %3640 = vmatprep.mubr.msk.f32.mxu0 %vm4367_vm12, %v4362_v36 }
 0x37e   : > { %4052 = vmatpush3.bf16.msra.mxu1 %v5265_v8  ;;  %4058 = vmatpush3.bf16.msra.mxu0 %v5348_v46  ;;  %v2717_v8 = vld [vmem:[%s5699_s7 + $0x50] sm:$0xff] }
 0x37f   : > { %4059 = vmatprep.subr.bf16.mxu0 %v4366_v35  ;;  %4065 = vmatprep.subr.bf16.mxu1 %v4366_v35  ;;  %v4081_v58 = vpack.c.bf16 %v2718_v40, %v2717_v8  ;;  %v2721_v46 = vld [vmem:[%s5699_s7 + $0x70] sm:$0xff] }
 0x381   : > { %2622 = vmatmul.mubr.f32.vlgmr.msra.gmra.mrb[34].mxu1 %v2482_v47 }
 0x382   : > { %4061 = vmatpush3.bf16.msra.mxu0 %v5360_v13  ;;  %3675 = vmatprep.mubr.msk.f32.mxu1 %vm4367_vm12, %v4362_v36  ;;  %v2722_v13 = vld [vmem:[%s5699_s7 + $0x78] sm:$0xff] }
 0x383   : > { %4062 = vmatprep.subr.bf16.mxu0 %v4366_v35  ;;  %4067 = vmatpush3.bf16.msra.mxu1 %v4066_v50  ;;  %v4087_v20 = vpack.c.bf16 %v2722_v13, %v2721_v46 }
 0x384   : > { %4068 = vmatprep.subr.bf16.mxu1 %v4366_v35 }
 0x386   : > { %4064 = vmatpush3.bf16.msra.mxu0 %v5380_v28  ;;  %v4090_v28 = vpack.c.bf16 %v2796_v21, %v2795_v59 }
 0x387   : > { %4089 = vmatprep.subr.bf16.mxu0 %v4366_v35 }
 0x389   : > { %3641 = vmatmul.mubr.msk.f32.vlgmr.msra.gmra.mrb[42].mxu0 %vm1077_vm6, %v2469_v9 }
 0x38a   : > { %3694 = vmatprep.mubr.msk.f32.mxu0 %vm4367_vm12, %v4362_v36  ;;  %v2710_v36 = vld [vmem:[%s5699_s7 + $0x18] sm:$0xff]  ;;  %4091 = vmatpush3.bf16.msra.mxu0 %v4090_v28 }
 0x38b   : > { %v4069_v1 = vpack.c.bf16 %v2710_v36, %v2709_v26  ;;  %4092 = vmatprep.subr.bf16.mxu0 %v4366_v35 }
 0x38d   : > { %4070 = vmatpush3.bf16.msra.mxu1 %v4069_v1 }
 0x38e   : > { %4071 = vmatprep.subr.bf16.mxu1 %v4366_v35  ;;  %4094 = vmatpush3.bf16.msra.mxu0 %v4093_v62 }
 0x38f   : > { %4095 = vmatprep.subr.bf16.mxu0 %v4366_v35 }
 0x391   : > { %4073 = vmatpush3.bf16.msra.mxu1 %v4072_v25 }
 0x392   : > { %4074 = vmatprep.subr.bf16.mxu1 %v4366_v35  ;;  %4097 = vmatpush3.bf16.msra.mxu0 %v4096_v42 }
 0x393   : > { %4098 = vmatprep.subr.bf16.mxu0 %v4366_v35 }
 0x395   : > { %4076 = vmatpush3.bf16.msra.mxu1 %v4075_v60 }
 0x396   : > { %4077 = vmatprep.subr.bf16.mxu1 %v4366_v35 }
 0x399   : > { %4079 = vmatpush3.bf16.msra.mxu1 %v4078_v17 }
 0x39a   : > { %4080 = vmatprep.subr.bf16.mxu1 %v4366_v35 }
 0x39d   : > { %4082 = vmatpush3.bf16.msra.mxu1 %v4081_v58 }
 0x39e   : > { %4083 = vmatprep.subr.bf16.mxu1 %v4366_v35 }
 0x3a1   : > { %4085 = vmatpush3.bf16.msra.mxu1 %v4084_v23 }
 0x3a2   : > { %4086 = vmatprep.subr.bf16.mxu1 %v4366_v35 }
 0x3a5   : > { %4088 = vmatpush3.bf16.msra.mxu1 %v4087_v20 }
 0x3d4   : > { %v3173_v4 = vpop.f32.mrb[24].mxu1 }
 0x3d5   : > { %v3174_v54 = vpop.f32.mrb[25].mxu1 }
 0x3d6   : > { %v3175_v44 = vadd.f32 %v3174_v54, %v3173_v4 }
 0x3d8   : > { %v1830_v52 = vadd.f32 %v3175_v44, %v5566_v51 }
 0x3dc   : > { %v3208_v30 = vpop.f32.mrb[32].mxu0 }
 0x3dd   : > { %v3209_v37 = vpop.f32.mrb[33].mxu0 }
 0x3de   : > { %v3210_v53 = vadd.f32 %v3209_v37, %v3208_v30 }
 0x3e0   : > { %v1900_v3 = vadd.f32 %v3210_v53, %v1830_v52 }
 0x3e4   : > { %v1969_v39 = vpop.f32.mrb[26].mxu1 }
 0x3e5   : > { %v1970_v43 = vadd.f32 %v1969_v39, %v1900_v3  ;;  %v3585_v6 = vpop.f32.mrb[27].mxu1 }
 0x3e7   : > { %v1973_v56 = vmax.f32 %v1970_v43, 0.0 }
 0x3e9   : > { %v1975_v31 = vsel %vm1974_vm13, %v1973_v56, 0.0 }
 0x3ea   : > { %v1976_v11 = vrot.slane %v1975_v31, 4 }
 0x3ec   : > { %v1977_v27 = vadd.f32 %v1976_v11, %v1975_v31 }
 0x3ee   : > { %v1978_v47 = vrot.slane %v1977_v27, 2 }
 0x3f0   : > { %v1979_v49 = vadd.f32 %v1978_v47, %v1977_v27 }
 0x3f2   : > { %v1980_v4 = vrot.slane %v1979_v49, 1 }
 0x3f4   : > { %v1981_v36 = vadd.f32 %v1980_v4, %v1979_v49 }
 0x3fc   : > { %v3252_v0 = vpop.f32.mrb[34].mxu0 }
 0x3fd   : > { %v3253_v55 = vpop.f32.mrb[35].mxu0 }
 0x3fe   : > { %v3254_v22 = vadd.f32 %v3253_v55, %v3252_v0 }
 0x400   : > { %v2075_v34 = vadd.f32 %v3254_v22, %v5566_v51 }
 0x404   : > { %v3287_v5 = vpop.f32.mrb[28].mxu1 }
 0x405   : > { %v3288_v2 = vpop.f32.mrb[29].mxu1 }
 0x406   : > { %v3289_v24 = vadd.f32 %v3288_v2, %v3287_v5  ;;  %v2802_v2 = vld [vmem:[%s5701_s9 + $0x38] sm:$0xff] }
 0x408   : > { %v2145_v12 = vadd.f32 %v3289_v24, %v2075_v34  ;;  %v2723_v24 = vld [vmem:[%s5700_s8] sm:$0x1] }
 0x40c   : > { %v2214_v18 = vpop.f32.mrb[36].mxu0 }
 0x40d   : > { %v2215_v33 = vadd.f32 %v2214_v18, %v2145_v12  ;;  %v3604_v14 = vpop.f32.mrb[37].mxu0 }
 0x40f   : > { %v2218_v38 = vmax.f32 %v2215_v33, 0.0  ;;  %v2803_v33 = vld [vmem:[%s5702_s10] sm:$0x1] }
 0x411   : > { %v2219_v9 = vsel %vm1974_vm13, %v2218_v38, 0.0 }
 0x412   : > { %v2220_v35 = vrot.slane %v2219_v9, 4 }
 0x414   : > { %v2221_v45 = vadd.f32 %v2220_v35, %v2219_v9 }
 0x416   : > { %v2222_v50 = vrot.slane %v2221_v45, 2 }
 0x418   : > { %v2223_v54 = vadd.f32 %v2222_v50, %v2221_v45 }
 0x41a   : > { %v2224_v26 = vrot.slane %v2223_v54, 1 }
 0x41c   : > { %v2225_v44 = vadd.f32 %v2224_v26, %v2223_v54 }
 0x41e   : > { %v2226_v1 = vadd.f32 %v2225_v44, %v1981_v36 }
 0x424   : > { %v3331_v57 = vpop.f32.mrb[30].mxu1 }
 0x425   : > { %v3332_v19 = vpop.f32.mrb[31].mxu1 }
 0x426   : > { %v3333_v25 = vadd.f32 %v3332_v19, %v3331_v57 }
 0x428   : > { %v2314_v41 = vadd.f32 %v3333_v25, %v5566_v51 }
 0x42c   : > { %v3366_v30 = vpop.f32.mrb[38].mxu0 }
 0x42d   : > { %v3367_v37 = vpop.f32.mrb[39].mxu0 }
 0x42e   : > { %v3368_v48 = vadd.f32 %v3367_v37, %v3366_v30 }
 0x430   : > { %v2384_v52 = vadd.f32 %v3368_v48, %v2314_v41 }
 0x434   : > { %v2453_v53 = vpop.f32.mrb[32].mxu1 }
 0x435   : > { %v2454_v60 = vadd.f32 %v2453_v53, %v2384_v52  ;;  %v3623_v3 = vpop.f32.mrb[33].mxu1 }
 0x437   : > { %v2457_v61 = vmax.f32 %v2454_v60, 0.0 }
 0x439   : > { %v2458_v16 = vsel %vm1974_vm13, %v2457_v61, 0.0 }
 0x43a   : > { %v2459_v17 = vrot.slane %v2458_v16, 4 }
 0x43c   : > { %v2460_v39 = vadd.f32 %v2459_v17, %v2458_v16 }
 0x43e   : > { %v2461_v43 = vrot.slane %v2460_v39, 2 }
 0x440   : > { %v2462_v6 = vadd.f32 %v2461_v43, %v2460_v39 }
 0x442   : > { %v2463_v8 = vrot.slane %v2462_v6, 1 }
 0x444   : > { %v2464_v40 = vadd.f32 %v2463_v8, %v2462_v6 }
 0x446   : > { %v2465_v58 = vadd.f32 %v2464_v40, %v2226_v1 }
 0x44c   : > { %v3410_v63 = vpop.f32.mrb[40].mxu0 }
 0x44d   : > { %v3411_v15 = vpop.f32.mrb[41].mxu0 }
 0x44e   : > { %v3412_v23 = vadd.f32 %v3411_v15, %v3410_v63 }
 0x450   : > { %v2554_v20 = vadd.f32 %v3412_v23, %v5566_v51  ;;  %v2801_v51 = vld [vmem:[%s5701_s9 + $0x30] sm:$0xff] }
 0x451   : > { %v4099_v34 = vpack.c.bf16 %v2802_v2, %v2801_v51 }
 0x453   : > { %4100 = vmatpush3.bf16.msra.mxu0 %v4099_v34 }
 0x454   : > { %v3445_v46 = vpop.f32.mrb[34].mxu1 }
 0x455   : > { %v3446_v13 = vpop.f32.mrb[35].mxu1 }
 0x456   : > { %v3447_v59 = vadd.f32 %v3446_v13, %v3445_v46 }
 0x458   : > { %v2624_v21 = vadd.f32 %v3447_v59, %v2554_v20 }
 0x45c   : > { %v2693_v10 = vpop.f32.mrb[42].mxu0 }
 0x45d   : > { %v2694_v28 = vadd.f32 %v2693_v10, %v2624_v21  ;;  %v3642_v7 = vpop.f32.mrb[43].mxu0 }
 0x45f   : > { %v2697_v62 = vmax.f32 %v2694_v28, 0.0 }
 0x461   : > { %v2698_v29 = vsel %vm1974_vm13, %v2697_v62, 0.0 }
 0x462   : > { %v2699_v32 = vrot.slane %v2698_v29, 4 }
 0x464   : > { %v2700_v42 = vadd.f32 %v2699_v32, %v2698_v29 }
 0x466   : > { %v2701_v0 = vrot.slane %v2700_v42, 2 }
 0x468   : > { %v2702_v55 = vadd.f32 %v2701_v0, %v2700_v42 }
 0x46a   : > { %v2703_v22 = vrot.slane %v2702_v55, 1 }
 0x46c   : > { %v2704_v56 = vadd.f32 %v2703_v22, %v2702_v55 }
 0x46e   : > { %v2705_v5 = vadd.f32 %v2704_v56, %v2465_v58 }
 0x470   : > { %v2706_v31 = vmul.f32 0.0625, %v2705_v5 }
 0x472   : > { %3676 = vmatmul.mubr.f32.vlgmr.msra.gmra.mrb[36].mxu1 %v2706_v31 }
 0x545   : > { %v2790_v11 = vpop.f32.mrb[36].mxu1 }
 0x546   : > { %v2791_v12 = vadd.f32 %v2790_v11, %v2723_v24  ;;  %v3677_v27 = vpop.f32.mrb[37].mxu1 }
 0x548   : > { %v2794_v18 = vmax.f32 %v2791_v12, 0.0 }
 0x54a   : > { %3695 = vmatmul.mubr.msk.f32.vlgmr.msra.gmra.mrb[44].mxu0 %vm1077_vm6, %v2794_v18 }
 0x61d   : > { %v2873_v14 = vpop.f32.mrb[44].mxu0 }
 0x61e   : > { %v2874_v38 = vadd.f32 %v2873_v14, %v2803_v33  ;;  %v3696_v47 = vpop.f32.mrb[45].mxu0 }
 0x620   : > { %2878 = vst.msk [vmem:[%s378_s15] sm:$0x1] %vm2877_vm14, %v2874_v38 }
 0x621   : > { %4310 = shalt.err (!%p4307_p3)
}
 0x622   : > { %s4311_s12 = scalar_lea.hbm %s5650_s25, 16  ;;  %s4315_s16 = scalar_lea.hbm %s5703_s11, 32 }
 0x623   : > { %p4312_p4 = scmp.ne.s32.totalorder %s5650_s25, %s4311_s12  ;;  %p4316_p9 = scmp.lt.u32.totalorder %s5650_s25, %s5703_s11 }
 0x624   : > { %p4317_p10 = scmp.lt.u32.totalorder %s4315_s16, %s4311_s12  ;;  %p4319_p12 = scmp.lt.u32.totalorder %s4311_s12, %s5650_s25 }
 0x625   : > { %p4313_p7 = pnand %p4312_p4, %p4467_p5 }
 0x626   : > { %p4318_p11 = por %p4317_p10, %p4316_p9 }
 0x627   : > { %p4314_p8 = pneg %p4313_p7 }
 0x628   : > { %p4320_p13 = por %p4319_p12, %p4318_p11 }
 0x62a   : > { %p4321_p0 = pnand %p4320_p13, %p4314_p8 }
 0x62c   : > { %4324 = shalt.err (!%p4321_p0)
}
 0x62d   : > { %4101 = dma.vmem_to_hbm [thread:$0]  (%p4467_p5), %s5652_s0, 16, %s5650_s25, %s2880_s29  }
 0x62e PF: > { %p4107_p1 = scmp.ge.s32.totalorder %s4359_s20, 2  ;;  %s2904_s30 = sand.u32 1, %s4347_s17  }
 0x62f   : > { %s2905_s13 = scalar_lea.sflag [#allocation5], %s2904_s30 }
 0x630   : > { %p4104_p2 = pnand %p4107_p1, %p4471_p6 }
 0x632   : > { %4342 = dma.done.wait (!%p4104_p2), %s2905_s13, 16  }
 0x633   : > { %4344 = vsyncadd (!%p4104_p2), %s2905_s13, 4294967280  ;;  %p21_p3 = scmp.ge.s32.totalorder %s4454_s23, 4   ;;  %s5710_s17 = smov %s4351_s18 }
 0x634   : > { %s5711_s18 = smov %s4355_s19  ;;  %s5712_s19 = smov %s4465_s26 }
 0x635   : > { %s5713_s20 = smov %s4454_s23  ;;  %23 = sbr.rel (!%p21_p3) target bundleno = 5 (0x5), region = 116 }
 0x63c   :  { %2909 = vsyncpa [#allocation5], 1 }
 0x63d   :  { %2911 = vsyncpa [#allocation5 + $0x1], 1 }

</bundles_post_ra>
